<compile_context>
chip_gen: v7x
topology: tpu7x:2x2x1
jax: 0.10.0
libtpu: 0.0.40
codegen_flags: <defaults>
</compile_context>

<pallas_src>
import jax
import jax.numpy as jnp
from jax.experimental import pallas as pl
from jax.experimental.pallas import tpu as pltpu

IN_FEATS = 784
HID_FEATS = 1000
NUM_CLASSES = 10

IN_PAD = 896      # 784  -> 7*128
HID_PAD = 1024    # 1000 -> 8*128
OUT_PAD = 128     # 10   -> 128 (lane-dense output slab)

NEG_BIG = -1e30   # finite "minus infinity" baked into the padded l3 bias


def _round_up(n, m):
    return ((n + m - 1) // m) * m


def _choose_tb(batch):
    """Batch tile: multiple of 16 (bf16 sublanes), >=2 grid steps when the
    batch allows (so v7x's two TensorCores both get work), capped at 256."""
    half = _round_up(max(1, -(-batch // 2)), 16)   # ceil(B/2) rounded to 16
    return min(256, half)


def mlp_kernel(x_ref, w1_ref, b1_ref, w2_ref, b2_ref, w3_ref, b3_ref, o_ref):
    # Layer 1: bf16 operands, f32 accumulation on the MXU; elementwise in f32.
    h1 = jnp.dot(x_ref[...], w1_ref[...], preferred_element_type=jnp.float32)
    h1 = jnp.maximum(h1 + b1_ref[...], 0.0)

    # Layer 2
    h2 = jnp.dot(h1.astype(jnp.bfloat16), w2_ref[...],
                 preferred_element_type=jnp.float32)
    h2 = jnp.maximum(h2 + b2_ref[...], 0.0)

    # Layer 3 (padded class columns already carry a -1e30 bias -> exp() == 0,
    # so no explicit masking pass is needed here).
    logits = jnp.dot(h2.astype(jnp.bfloat16), w3_ref[...],
                     preferred_element_type=jnp.float32)
    logits = logits + b3_ref[...]

    # Numerically-stable softmax; exact reciprocal (EUP has slack, so it's free).
    m = jnp.max(logits, axis=-1, keepdims=True)
    e = jnp.exp(logits - m)
    denom = jnp.sum(e, axis=-1, keepdims=True)
    o_ref[...] = e * pl.reciprocal(denom)


def pad_params(params):
    """One-time: zero-pad to 128-aligned shapes, cast matmul operands to bf16,
    and bake the padded-class mask (-1e30) into the l3 bias.  Call this once
    and reuse the result across forward calls."""
    w1, b1, w2, b2, w3, b3 = params
    w1p = (jnp.zeros((IN_PAD, HID_PAD), jnp.bfloat16)
           .at[:IN_FEATS, :HID_FEATS].set(w1.astype(jnp.bfloat16)))
    b1p = jnp.zeros((1, HID_PAD), jnp.float32).at[:, :HID_FEATS].set(b1)
    w2p = (jnp.zeros((HID_PAD, HID_PAD), jnp.bfloat16)
           .at[:HID_FEATS, :HID_FEATS].set(w2.astype(jnp.bfloat16)))
    b2p = jnp.zeros((1, HID_PAD), jnp.float32).at[:, :HID_FEATS].set(b2)
    w3p = (jnp.zeros((HID_PAD, OUT_PAD), jnp.bfloat16)
           .at[:HID_FEATS, :NUM_CLASSES].set(w3.astype(jnp.bfloat16)))
    b3p = (jnp.full((1, OUT_PAD), NEG_BIG, jnp.float32)
           .at[:, :NUM_CLASSES].set(b3[0]))
    return (w1p, b1p, w2p, b2p, w3p, b3p)


def mlp_forward(x_nchw, padded_params):
    w1p, b1p, w2p, b2p, w3p, b3p = padded_params
    B = x_nchw.shape[0]
    x = x_nchw.reshape(B, IN_FEATS)  # == torch .view(-1, 784)

    TB = _choose_tb(B)
    B_pad = _round_up(B, TB)

    # Build the padded x slab directly in bf16 (no intermediate f32 copy).
    xp = (jnp.zeros((B_pad, IN_PAD), jnp.bfloat16)
          .at[:B, :IN_FEATS].set(x.astype(jnp.bfloat16)))

    # Weights/biases: constant index_map => fetched once and VMEM-resident
    # across the whole batch grid; x/out tiles stream and pipeline.
    resident = lambda shape: pl.BlockSpec(shape, lambda i: (0, 0))

    flops = 2 * B_pad * (IN_PAD * HID_PAD + HID_PAD * HID_PAD + HID_PAD * OUT_PAD)
    bytes_accessed = (
        xp.size * 2                                   # bf16 input slab
        + (w1p.size + w2p.size + w3p.size) * 2        # bf16 weights
        + (b1p.size + b2p.size + b3p.size) * 4        # f32 biases
        + B_pad * OUT_PAD * 4                         # f32 output slab
    )
    cost = pl.CostEstimate(flops=flops,
                           transcendentals=B_pad * OUT_PAD,
                           bytes_accessed=bytes_accessed)

    out = pl.pallas_call(
        mlp_kernel,
        out_shape=jax.ShapeDtypeStruct((B_pad, OUT_PAD), jnp.float32),
        grid=(B_pad // TB,),
        in_specs=[
            pl.BlockSpec((TB, IN_PAD), lambda i: (i, 0)),
            resident((IN_PAD, HID_PAD)), resident((1, HID_PAD)),
            resident((HID_PAD, HID_PAD)), resident((1, HID_PAD)),
            resident((HID_PAD, OUT_PAD)), resident((1, OUT_PAD)),
        ],
        out_specs=pl.BlockSpec((TB, OUT_PAD), lambda i: (i, 0)),
        compiler_params=pltpu.CompilerParams(
            dimension_semantics=("parallel",),   # batch tiles shard across TCs
            vmem_limit_bytes=32 << 20,           # safe on v7x's 64 MiB VMEM
        ),
        cost_estimate=cost,
    )(xp, w1p, b1p, w2p, b2p, w3p, b3p)

    # Strip batch and class padding.
    return out[:B, :NUM_CLASSES]


def init_params(key):
    # Deterministic init mimicking nn.Linear's U(-1/sqrt(fan_in), 1/sqrt(fan_in)).
    def linear(key, fan_in, fan_out):
        kw, kb = jax.random.split(key)
        bound = 1.0 / jnp.sqrt(jnp.float32(fan_in))
        w = jax.random.uniform(kw, (fan_in, fan_out), jnp.float32, -bound, bound)
        b = jax.random.uniform(kb, (1, fan_out), jnp.float32, -bound, bound)
        return w, b

    k1, k2, k3 = jax.random.split(key, 3)
    w1, b1 = linear(k1, IN_FEATS, HID_FEATS)
    w2, b2 = linear(k2, HID_FEATS, HID_FEATS)
    w3, b3 = linear(k3, HID_FEATS, NUM_CLASSES)
    return (w1, b1, w2, b2, w3, b3)


if __name__ == "__main__":
    key = jax.random.PRNGKey(0)
    k_params, k_x = jax.random.split(key)

    params = init_params(k_params)
    padded_params = pad_params(params)   # one-time padding + bf16 cast (hoisted)
    jax.block_until_ready(padded_params)

    # Small MNIST-like batch: (B=2, C=1, H=28, W=28) NCHW, flattens to (2, 784).
    x = jax.random.normal(k_x, (2, 1, 28, 28), dtype=jnp.float32)

    forward = jax.jit(mlp_forward)
    probs = forward(x, padded_params)
    jax.block_until_ready(probs)

    # Pure-JAX f32 reference (same math as the PyTorch module).
    w1, b1, w2, b2, w3, b3 = params
    xf = x.reshape(2, IN_FEATS)
    h1 = jnp.maximum(xf @ w1 + b1, 0.0)
    h2 = jnp.maximum(h1 @ w2 + b2, 0.0)
    ref = jax.nn.softmax(h2 @ w3 + b3, axis=-1)

    assert probs.shape == (2, NUM_CLASSES)
    # Exact reciprocal -> rows sum to 1 to f32 precision.
    assert bool(jnp.all(jnp.abs(jnp.sum(probs, axis=-1) - 1.0) < 1e-3))
    # Agree with the f32 reference up to bf16 matmul rounding.
    assert bool(jnp.max(jnp.abs(probs - ref)) < 5e-2)
    print("KERNEL_OK")
</pallas_src>

<mosaic_0001>
module attributes {stable_mosaic.version = 11 : i64} {
  func.func @mlp_kernel(%arg0: i32, %arg1: memref<16x896xbf16, #tpu.memory_space<vmem>>, %arg2: memref<896x1024xbf16, #tpu.memory_space<vmem>>, %arg3: memref<1x1024xf32, #tpu.memory_space<vmem>>, %arg4: memref<1024x1024xbf16, #tpu.memory_space<vmem>>, %arg5: memref<1x1024xf32, #tpu.memory_space<vmem>>, %arg6: memref<1024x128xbf16, #tpu.memory_space<vmem>>, %arg7: memref<1x128xf32, #tpu.memory_space<vmem>>, %arg8: memref<16x128xf32, #tpu.memory_space<vmem>>) attributes {dimension_semantics = [#tpu.dimension_semantics<parallel>], iteration_bounds = array<i64: 1>, scalar_prefetch = 0 : i64, scratch_operands = 0 : i64, tpu.core_type = #tpu.core_type<tc>, window_params = [{transform_indices = @transform_0, window_bounds = array<i64: 16, 896>}, {pipeline_mode = #tpu.pipeline_mode<synchronous>, transform_indices = @transform_1, window_bounds = array<i64: 896, 1024>}, {pipeline_mode = #tpu.pipeline_mode<synchronous>, transform_indices = @transform_2, window_bounds = array<i64: 1, 1024>}, {pipeline_mode = #tpu.pipeline_mode<synchronous>, transform_indices = @transform_3, window_bounds = array<i64: 1024, 1024>}, {pipeline_mode = #tpu.pipeline_mode<synchronous>, transform_indices = @transform_4, window_bounds = array<i64: 1, 1024>}, {pipeline_mode = #tpu.pipeline_mode<synchronous>, transform_indices = @transform_5, window_bounds = array<i64: 1024, 128>}, {pipeline_mode = #tpu.pipeline_mode<synchronous>, transform_indices = @transform_6, window_bounds = array<i64: 1, 128>}, {transform_indices = @transform_7, window_bounds = array<i64: 16, 128>}]} {
    %c0 = arith.constant 0 : index
    %c0_0 = arith.constant 0 : index
    %0 = vector.load %arg1[%c0, %c0_0] : memref<16x896xbf16, #tpu.memory_space<vmem>>, vector<16x896xbf16>
    %c0_1 = arith.constant 0 : index
    %c0_2 = arith.constant 0 : index
    %1 = vector.load %arg2[%c0_1, %c0_2] : memref<896x1024xbf16, #tpu.memory_space<vmem>>, vector<896x1024xbf16>
    %cst = arith.constant dense<0.000000e+00> : vector<16x1024xf32>
    %2 = tpu.matmul %0, %1, %cst {dimension_numbers = #tpu.dot_dimension_numbers<[1], [0], [0], [1], [0, 0, 1, 1], [], []>} : vector<16x896xbf16>, vector<896x1024xbf16>, vector<16x1024xf32> -> vector<16x1024xf32>
    %c0_3 = arith.constant 0 : index
    %c0_4 = arith.constant 0 : index
    %3 = vector.load %arg3[%c0_3, %c0_4] : memref<1x1024xf32, #tpu.memory_space<vmem>>, vector<1x1024xf32>
    %4 = vector.broadcast %3 : vector<1x1024xf32> to vector<16x1024xf32>
    %5 = arith.addf %2, %4 : vector<16x1024xf32>
    %cst_5 = arith.constant 0.000000e+00 : f32
    %6 = vector.broadcast %cst_5 : f32 to vector<16x1024xf32>
    %7 = arith.maximumf %5, %6 : vector<16x1024xf32>
    %8 = arith.truncf %7 : vector<16x1024xf32> to vector<16x1024xbf16>
    %c0_6 = arith.constant 0 : index
    %c0_7 = arith.constant 0 : index
    %9 = vector.load %arg4[%c0_6, %c0_7] : memref<1024x1024xbf16, #tpu.memory_space<vmem>>, vector<1024x1024xbf16>
    %cst_8 = arith.constant dense<0.000000e+00> : vector<16x1024xf32>
    %10 = tpu.matmul %8, %9, %cst_8 {dimension_numbers = #tpu.dot_dimension_numbers<[1], [0], [0], [1], [0, 0, 1, 1], [], []>} : vector<16x1024xbf16>, vector<1024x1024xbf16>, vector<16x1024xf32> -> vector<16x1024xf32>
    %c0_9 = arith.constant 0 : index
    %c0_10 = arith.constant 0 : index
    %11 = vector.load %arg5[%c0_9, %c0_10] : memref<1x1024xf32, #tpu.memory_space<vmem>>, vector<1x1024xf32>
    %12 = vector.broadcast %11 : vector<1x1024xf32> to vector<16x1024xf32>
    %13 = arith.addf %10, %12 : vector<16x1024xf32>
    %cst_11 = arith.constant 0.000000e+00 : f32
    %14 = vector.broadcast %cst_11 : f32 to vector<16x1024xf32>
    %15 = arith.maximumf %13, %14 : vector<16x1024xf32>
    %16 = arith.truncf %15 : vector<16x1024xf32> to vector<16x1024xbf16>
    %c0_12 = arith.constant 0 : index
    %c0_13 = arith.constant 0 : index
    %17 = vector.load %arg6[%c0_12, %c0_13] : memref<1024x128xbf16, #tpu.memory_space<vmem>>, vector<1024x128xbf16>
    %cst_14 = arith.constant dense<0.000000e+00> : vector<16x128xf32>
    %18 = tpu.matmul %16, %17, %cst_14 {dimension_numbers = #tpu.dot_dimension_numbers<[1], [0], [0], [1], [0, 0, 1, 1], [], []>} : vector<16x1024xbf16>, vector<1024x128xbf16>, vector<16x128xf32> -> vector<16x128xf32>
    %c0_15 = arith.constant 0 : index
    %c0_16 = arith.constant 0 : index
    %19 = vector.load %arg7[%c0_15, %c0_16] : memref<1x128xf32, #tpu.memory_space<vmem>>, vector<1x128xf32>
    %20 = vector.broadcast %19 : vector<1x128xf32> to vector<16x128xf32>
    %21 = arith.addf %18, %20 : vector<16x128xf32>
    %cst_17 = arith.constant dense<0xFF800000> : vector<16xf32>
    %22 = vector.multi_reduction <maximumf>, %21, %cst_17 [1] : vector<16x128xf32> to vector<16xf32>
    %23 = vector.shape_cast %22 : vector<16xf32> to vector<16x1xf32>
    %24 = vector.broadcast %23 : vector<16x1xf32> to vector<16x128xf32>
    %25 = arith.subf %21, %24 : vector<16x128xf32>
    %26 = math.exp %25 : vector<16x128xf32>
    %cst_18 = arith.constant dense<0.000000e+00> : vector<16xf32>
    %27 = vector.multi_reduction <add>, %26, %cst_18 [1] : vector<16x128xf32> to vector<16xf32>
    %28 = vector.shape_cast %27 : vector<16xf32> to vector<16x1xf32>
    %29 = tpu.reciprocal %28 : vector<16x1xf32> -> vector<16x1xf32>
    %30 = vector.broadcast %29 : vector<16x1xf32> to vector<16x128xf32>
    %31 = arith.mulf %26, %30 : vector<16x128xf32>
    %c0_19 = arith.constant 0 : index
    %c0_20 = arith.constant 0 : index
    %32 = vector.load %arg8[%c0_19, %c0_20] : memref<16x128xf32, #tpu.memory_space<vmem>>, vector<16x128xf32>
    tpu.vector_store %arg8[%c0_19, %c0_20], %31 {strides = array<i32>} : memref<16x128xf32, #tpu.memory_space<vmem>>, vector<16x128xf32>,
    return
  }
  func.func @transform_0(%arg0: i32) -> (i32, i32) {
    %c0_i32 = arith.constant 0 : i32
    %c0_i32_0 = arith.constant 0 : i32
    return %arg0, %c0_i32 : i32, i32
  }
  func.func @transform_1(%arg0: i32) -> (i32, i32) {
    %c0_i32 = arith.constant 0 : i32
    %c0_i32_0 = arith.constant 0 : i32
    %c0_i32_1 = arith.constant 0 : i32
    return %c0_i32, %c0_i32_0 : i32, i32
  }
  func.func @transform_2(%arg0: i32) -> (i32, i32) {
    %c0_i32 = arith.constant 0 : i32
    %c0_i32_0 = arith.constant 0 : i32
    %c0_i32_1 = arith.constant 0 : i32
    return %c0_i32, %c0_i32_0 : i32, i32
  }
  func.func @transform_3(%arg0: i32) -> (i32, i32) {
    %c0_i32 = arith.constant 0 : i32
    %c0_i32_0 = arith.constant 0 : i32
    %c0_i32_1 = arith.constant 0 : i32
    return %c0_i32, %c0_i32_0 : i32, i32
  }
  func.func @transform_4(%arg0: i32) -> (i32, i32) {
    %c0_i32 = arith.constant 0 : i32
    %c0_i32_0 = arith.constant 0 : i32
    %c0_i32_1 = arith.constant 0 : i32
    return %c0_i32, %c0_i32_0 : i32, i32
  }
  func.func @transform_5(%arg0: i32) -> (i32, i32) {
    %c0_i32 = arith.constant 0 : i32
    %c0_i32_0 = arith.constant 0 : i32
    %c0_i32_1 = arith.constant 0 : i32
    return %c0_i32, %c0_i32_0 : i32, i32
  }
  func.func @transform_6(%arg0: i32) -> (i32, i32) {
    %c0_i32 = arith.constant 0 : i32
    %c0_i32_0 = arith.constant 0 : i32
    %c0_i32_1 = arith.constant 0 : i32
    return %c0_i32, %c0_i32_0 : i32, i32
  }
  func.func @transform_7(%arg0: i32) -> (i32, i32) {
    %c0_i32 = arith.constant 0 : i32
    %c0_i32_0 = arith.constant 0 : i32
    return %arg0, %c0_i32 : i32, i32
  }
}

</mosaic_0001>

<bundles_post_ra>
// kernel: mlp_forward.1
= control target key start
LH: loop header
LB: loop body
LE: loop exit
PB: predicated region body
PF: predicated region fallthrough
CT: control target
= control target key end

     0   :  { %12 = vsyncpa [#allocation3], 0  ;;  %s9918_s0 = inlined_call_operand.vmem [shape: bf16[16,896], index: 0, kind: input, shape index: {}]   ;;  %s9919_s1 = inlined_call_operand.hbm [shape: bf16[896,1024], index: 1, kind: input, shape index: {}]   ;;  %s9920_s2 = inlined_call_operand.hbm [shape: f32[1,1024], index: 2, kind: input, shape index: {}]   ;;  %s9921_s3 = inlined_call_operand.hbm [shape: bf16[1024,1024], index: 3, kind: input, shape index: {}]   ;;  %s9922_s4 = inlined_call_operand.hbm [shape: f32[1,1024], index: 4, kind: input, shape index: {}]   ;;  %s9923_s5 = inlined_call_operand.hbm [shape: bf16[1024,128], index: 5, kind: input, shape index: {}]   ;;  %s9924_s6 = inlined_call_operand.hbm [shape: f32[1,128], index: 6, kind: input, shape index: {}]   ;;  %s9925_s7 = inlined_call_operand.vmem [shape: f32[16,128], index: 7, kind: output, shape index: {}]  }
   0x1   :  { %13 = vsyncpa [#allocation5], 0 }
   0x2   :  { %14 = vsyncpa [#allocation8], 0 }
   0x3   :  { %15 = vsyncpa [#allocation11], 0  ;;  %s9615_s24 = smov [#allocation4]   ;;  %s9616_s26 = smov [#allocation7]  }
   0x4   :  { %s36_s25 = sshll.u32 %s9615_s24, 4  ;;  %s58_s27 = sshll.u32 %s9616_s26, 4  ;;  %s37_s25 = int_to_ptr.vmem [resolvable:$true] %s36_s25  ;;  %s59_s27 = int_to_ptr.vmem [resolvable:$true] %s58_s27 }
   0x5   :  { %s9475_s30 = scalar_lea.hbm %s9920_s2, 128 }
   0x6   :  { %p9476_p0 = scmp.ne.s32.totalorder %s9920_s2, %s9475_s30  ;;  %p9479_p1 = scmp.lt.u32.totalorder %s9475_s30, %s9920_s2 }
   0x8   :  { %p9481_p2 = pnand %p9479_p1, %p9476_p0 }
   0xa   :  { %9484 = shalt.err (!%p9481_p2)
}
   0xb   :  { %s9485_s12 = scalar_lea.vmem %s37_s25, 128  ;;  %p9490_p4 = scmp.lt.s32.totalorder %s37_s25, %s37_s25 }
   0xc   :  { %p9486_p3 = scmp.ne.s32.totalorder %s37_s25, %s9485_s12  ;;  %p9491_p5 = scmp.lt.s32.totalorder %s9485_s12, %s9485_s12 }
   0xe   :  { %p9492_p6 = por %p9491_p5, %p9490_p4 }
  0x10   :  { %p9493_p7 = pnand %p9492_p6, %p9486_p3 }
  0x12   :  { %9496 = shalt.err (!%p9493_p7)
}
  0x13   :  { %39 = dma.hbm_to_vmem [thread:$0]  %s9920_s2, 128, %s37_s25, [#allocation5]  }
  0x14   :  { %s9497_s17 = scalar_lea.hbm %s9922_s4, 128 }
  0x15   :  { %p9498_p8 = scmp.ne.s32.totalorder %s9922_s4, %s9497_s17  ;;  %p9501_p9 = scmp.lt.u32.totalorder %s9497_s17, %s9922_s4 }
  0x17   :  { %p9503_p10 = pnand %p9501_p9, %p9498_p8 }
  0x19   :  { %9506 = shalt.err (!%p9503_p10)
}
  0x1a   :  { %s9507_s22 = scalar_lea.vmem %s59_s27, 128  ;;  %p9512_p12 = scmp.lt.s32.totalorder %s59_s27, %s59_s27 }
  0x1b   :  { %p9508_p11 = scmp.ne.s32.totalorder %s59_s27, %s9507_s22  ;;  %p9513_p13 = scmp.lt.s32.totalorder %s9507_s22, %s9507_s22 }
  0x1d   :  { %p9514_p0 = por %p9513_p13, %p9512_p12 }
  0x1f   :  { %p9515_p1 = pnand %p9514_p0, %p9508_p11 }
  0x21   :  { %9518 = shalt.err (!%p9515_p1)
}
  0x22   :  { %61 = dma.hbm_to_vmem [thread:$0]  %s9922_s4, 128, %s59_s27, [#allocation8]  }
  0x23   :  { %s9617_s24 = smov [#allocation2]   ;;  %s9519_s29 = scalar_lea.hbm %s9919_s1, 57344 }
  0x24   :  { %s23_s25 = sshll.u32 %s9617_s24, 4  ;;  %p9520_p2 = scmp.ne.s32.totalorder %s9919_s1, %s9519_s29  ;;  %s24_s25 = int_to_ptr.vmem [resolvable:$true] %s23_s25 }
  0x25   :  { %p9523_p3 = scmp.lt.u32.totalorder %s9519_s29, %s9919_s1 }
  0x27   :  { %p9525_p4 = pnand %p9523_p3, %p9520_p2 }
  0x29   :  { %9528 = shalt.err (!%p9525_p4)
}
  0x2a   :  { %s9529_s11 = scalar_lea.vmem %s24_s25, 57344  ;;  %p9534_p6 = scmp.lt.s32.totalorder %s24_s25, %s24_s25 }
  0x2b   :  { %p9530_p5 = scmp.ne.s32.totalorder %s24_s25, %s9529_s11  ;;  %p9535_p7 = scmp.lt.s32.totalorder %s9529_s11, %s9529_s11 }
  0x2d   :  { %p9536_p8 = por %p9535_p7, %p9534_p6 }
  0x2f   :  { %p9537_p9 = pnand %p9536_p8, %p9530_p5 }
  0x31   :  { %9540 = shalt.err (!%p9537_p9)
}
  0x32   :  { %s9618_s4 = smov 512   ;;  %s9619_s27 = smov 32  }
  0x33   :  { %29 = dma.hbm_to_vmem [thread:$0]  %s9919_s1, 57344, %s24_s25, [#allocation3], %s9618_s4, %s9618_s4, %s9619_s27  }
  0x34   :  { %s9620_s14 = smov [#allocation6]   ;;  %s9621_s16 = smov [#allocation9]  }
  0x35   :  { %s45_s15 = sshll.u32 %s9620_s14, 4  ;;  %s67_s17 = sshll.u32 %s9621_s16, 4  ;;  %s46_s15 = int_to_ptr.vmem [resolvable:$true] %s45_s15  ;;  %s68_s17 = int_to_ptr.vmem [resolvable:$true] %s67_s17 }
  0x36   :  { %s9541_s20 = scalar_lea.hbm %s9921_s3, 65536 }
  0x37   :  { %p9542_p10 = scmp.ne.s32.totalorder %s9921_s3, %s9541_s20  ;;  %p9545_p11 = scmp.lt.u32.totalorder %s9541_s20, %s9921_s3 }
  0x39   :  { %p9547_p12 = pnand %p9545_p11, %p9542_p10 }
  0x3b   :  { %9550 = shalt.err (!%p9547_p12)
}
  0x3c   :  { %s9551_s1 = scalar_lea.vmem %s46_s15, 65536  ;;  %p9556_p0 = scmp.lt.s32.totalorder %s46_s15, %s46_s15 }
  0x3d   :  { %p9552_p13 = scmp.ne.s32.totalorder %s46_s15, %s9551_s1  ;;  %p9557_p1 = scmp.lt.s32.totalorder %s9551_s1, %s9551_s1 }
  0x3f   :  { %p9558_p2 = por %p9557_p1, %p9556_p0 }
  0x41   :  { %p9559_p3 = pnand %p9558_p2, %p9552_p13 }
  0x43   :  { %9562 = shalt.err (!%p9559_p3)
}
  0x44   :  { %51 = dma.hbm_to_vmem [thread:$0]  %s9921_s3, 65536, %s46_s15, [#allocation5], %s9618_s4, %s9618_s4, %s9619_s27  }
  0x45   :  { %s9563_s29 = scalar_lea.hbm %s9923_s5, 8192 }
  0x46   :  { %p9564_p4 = scmp.ne.s32.totalorder %s9923_s5, %s9563_s29  ;;  %p9567_p5 = scmp.lt.u32.totalorder %s9563_s29, %s9923_s5 }
  0x48   :  { %p9569_p6 = pnand %p9567_p5, %p9564_p4 }
  0x4a   :  { %9572 = shalt.err (!%p9569_p6)
}
  0x4b   :  { %s9573_s11 = scalar_lea.vmem %s68_s17, 8192  ;;  %p9578_p8 = scmp.lt.s32.totalorder %s68_s17, %s68_s17 }
  0x4c   :  { %p9574_p7 = scmp.ne.s32.totalorder %s68_s17, %s9573_s11  ;;  %p9579_p9 = scmp.lt.s32.totalorder %s9573_s11, %s9573_s11 }
  0x4e   :  { %p9580_p10 = por %p9579_p9, %p9578_p8 }
  0x50   :  { %p9581_p11 = pnand %p9580_p10, %p9574_p7 }
  0x52   :  { %9584 = shalt.err (!%p9581_p11)
}
  0x53   :  { %s9622_s3 = smov 64   ;;  %s9623_s4 = smov 4  }
  0x54   :  { %73 = dma.hbm_to_vmem [thread:$0]  %s9923_s5, 8192, %s68_s17, [#allocation8], %s9622_s3, %s9622_s3, %s9623_s4  }
  0x55   :  { %s9624_s13 = smov [#allocation10]   ;;  %s9585_s18 = scalar_lea.hbm %s9924_s6, 16 }
  0x56   :  { %s80_s14 = sshll.u32 %s9624_s13, 4  ;;  %p9586_p12 = scmp.ne.s32.totalorder %s9924_s6, %s9585_s18  ;;  %s81_s14 = int_to_ptr.vmem [resolvable:$true] %s80_s14 }
  0x57   :  { %p9589_p13 = scmp.lt.u32.totalorder %s9585_s18, %s9924_s6 }
  0x59   :  { %p9591_p0 = pnand %p9589_p13, %p9586_p12 }
  0x5b   :  { %9594 = shalt.err (!%p9591_p0)
}
  0x5c   :  { %s9595_s2 = scalar_lea.vmem %s81_s14, 16  ;;  %s9599_s5 = scalar_lea.vmem %s81_s14, 32 }
  0x5d   :  { %p9596_p1 = scmp.ne.s32.totalorder %s81_s14, %s9595_s2  ;;  %p9600_p2 = scmp.lt.s32.totalorder %s81_s14, %s81_s14 }
  0x5e   :  { %p9601_p3 = scmp.lt.s32.totalorder %s9599_s5, %s9595_s2 }
  0x60   :  { %p9602_p4 = por %p9601_p3, %p9600_p2 }
  0x62   :  { %p9603_p5 = pnand %p9602_p4, %p9596_p1 }
  0x64   :  { %9606 = shalt.err (!%p9603_p5)
}
  0x65   :  { %83 = dma.hbm_to_vmem [thread:$0]  %s9924_s6, 16, %s81_s14, [#allocation11]  }
  0x66   :  { %9607 = dma.done.wait [#allocation3], 57344  }
  0x67   :  { %9608 = vsyncadd [#allocation3], 4294909952 }
  0x68   :  { %9609 = dma.done.wait [#allocation5], 65664  }
  0x69   :  { %9610 = vsyncadd [#allocation5], 4294901632 }
  0x6a   :  { %9611 = dma.done.wait [#allocation8], 8320  }
  0x6b   :  { %9612 = vsyncadd [#allocation8], 4294958976 }
  0x6c   :  { %9613 = dma.done.wait [#allocation11], 16  }
  0x6d   :  { %9614 = vsyncadd [#allocation11], 4294967280  ;;  %v111_v0 = vld [vmem:[#allocation2] sm:$0xff]  ;;  %v112_v2 = vld [vmem:[#allocation2 + $0x8] sm:$0xff] }
  0x6e   :  { %v115_v1 = vld [vmem:[#allocation2 + $0x20] sm:$0xff]  ;;  %v116_v4 = vld [vmem:[#allocation2 + $0x28] sm:$0xff] }
  0x6f   :  { %v8134_v3 = vcombine.high %v111_v0, %v115_v1  ;;  %v8133_v5 = vcombine.low %v111_v0, %v115_v1  ;;  %v119_v6 = vld [vmem:[#allocation2 + $0x40] sm:$0xff]  ;;  %v8136_v8 = vcombine.high %v112_v2, %v116_v4  ;;  %v8135_v9 = vcombine.low %v112_v2, %v116_v4  ;;  %v120_v11 = vld [vmem:[#allocation2 + $0x48] sm:$0xff] }
  0x70   :  { %v123_v7 = vld [vmem:[#allocation2 + $0x60] sm:$0xff]  ;;  %v124_v12 = vld [vmem:[#allocation2 + $0x68] sm:$0xff] }
  0x71   :  { %v8142_v10 = vcombine.high %v119_v6, %v123_v7  ;;  %v127_v13 = vld [vmem:[#allocation2 + $0x80] sm:$0xff]  ;;  %2877 = vmatprep.subr.bf16.mxu0 %v8134_v3  ;;  %v8144_v14 = vcombine.high %v120_v11, %v124_v12  ;;  %v128_v16 = vld [vmem:[#allocation2 + $0x88] sm:$0xff]  ;;  %3049 = vmatprep.subr.bf16.mxu1 %v8136_v8  ;;  %v8141_v18 = vcombine.low %v119_v6, %v123_v7 }
  0x72   :  { %v131_v15 = vld [vmem:[#allocation2 + $0xa0] sm:$0xff]  ;;  %v132_v17 = vld [vmem:[#allocation2 + $0xa8] sm:$0xff]  ;;  %2878 = vmatpush1.bf16.msra.mxu0 %v8133_v5  ;;  %3050 = vmatpush1.bf16.msra.mxu1 %v8135_v9  ;;  %v8143_v19 = vcombine.low %v120_v11, %v124_v12 }
  0x73   :  { %2879 = vmatprep.subr.bf16.mxu0 %v8142_v10  ;;  %v8150_v20 = vcombine.high %v127_v13, %v131_v15  ;;  %3051 = vmatprep.subr.bf16.mxu1 %v8144_v14  ;;  %v8152_v21 = vcombine.high %v128_v16, %v132_v17  ;;  %v135_v22 = vld [vmem:[#allocation2 + $0xc0] sm:$0xff]  ;;  %v136_v24 = vld [vmem:[#allocation2 + $0xc8] sm:$0xff]  ;;  %v8149_v26 = vcombine.low %v127_v13, %v131_v15 }
  0x74   :  { %v139_v23 = vld [vmem:[#allocation2 + $0xe0] sm:$0xff]  ;;  %v140_v25 = vld [vmem:[#allocation2 + $0xe8] sm:$0xff]  ;;  %v8151_v27 = vcombine.low %v128_v16, %v132_v17 }
  0x75   :  { %v8158_v28 = vcombine.high %v135_v22, %v139_v23  ;;  %v8160_v29 = vcombine.high %v136_v24, %v140_v25  ;;  %v143_v30 = vld [vmem:[#allocation2 + $0x100] sm:$0xff]  ;;  %v144_v32 = vld [vmem:[#allocation2 + $0x108] sm:$0xff]  ;;  %v8157_v34 = vcombine.low %v135_v22, %v139_v23  ;;  %v8159_v35 = vcombine.low %v136_v24, %v140_v25 }
  0x76   :  { %2880 = vmatpush1.bf16.msra.mxu0 %v8141_v18  ;;  %3052 = vmatpush1.bf16.msra.mxu1 %v8143_v19  ;;  %v147_v31 = vld [vmem:[#allocation2 + $0x120] sm:$0xff]  ;;  %v148_v33 = vld [vmem:[#allocation2 + $0x128] sm:$0xff] }
  0x77   :  { %2881 = vmatprep.subr.bf16.mxu0 %v8150_v20  ;;  %3053 = vmatprep.subr.bf16.mxu1 %v8152_v21  ;;  %v8166_v36 = vcombine.high %v143_v30, %v147_v31  ;;  %v8168_v37 = vcombine.high %v144_v32, %v148_v33  ;;  %v151_v38 = vld [vmem:[#allocation2 + $0x140] sm:$0xff]  ;;  %v152_v40 = vld [vmem:[#allocation2 + $0x148] sm:$0xff]  ;;  %v8165_v42 = vcombine.low %v143_v30, %v147_v31 }
  0x78   :  { %v155_v39 = vld [vmem:[#allocation2 + $0x160] sm:$0xff]  ;;  %v156_v41 = vld [vmem:[#allocation2 + $0x168] sm:$0xff]  ;;  %v8167_v43 = vcombine.low %v144_v32, %v148_v33 }
  0x79   :  { %v8174_v44 = vcombine.high %v151_v38, %v155_v39  ;;  %v8176_v45 = vcombine.high %v152_v40, %v156_v41  ;;  %v159_v46 = vld [vmem:[#allocation2 + $0x180] sm:$0xff]  ;;  %v160_v48 = vld [vmem:[#allocation2 + $0x188] sm:$0xff]  ;;  %v8173_v50 = vcombine.low %v151_v38, %v155_v39  ;;  %v8175_v51 = vcombine.low %v152_v40, %v156_v41 }
  0x7a   :  { %2882 = vmatpush1.bf16.msra.mxu0 %v8149_v26  ;;  %3054 = vmatpush1.bf16.msra.mxu1 %v8151_v27  ;;  %v163_v47 = vld [vmem:[#allocation2 + $0x1a0] sm:$0xff]  ;;  %v164_v49 = vld [vmem:[#allocation2 + $0x1a8] sm:$0xff] }
  0x7b   :  { %2883 = vmatprep.subr.bf16.mxu0 %v8158_v28  ;;  %3055 = vmatprep.subr.bf16.mxu1 %v8160_v29  ;;  %v8182_v52 = vcombine.high %v159_v46, %v163_v47  ;;  %v8184_v53 = vcombine.high %v160_v48, %v164_v49  ;;  %v167_v54 = vld [vmem:[#allocation2 + $0x1c0] sm:$0xff]  ;;  %v168_v57 = vld [vmem:[#allocation2 + $0x1c8] sm:$0xff]  ;;  %v8181_v59 = vcombine.low %v159_v46, %v163_v47 }
  0x7c   :  { %v171_v55 = vld [vmem:[#allocation2 + $0x1e0] sm:$0xff]  ;;  %v172_v58 = vld [vmem:[#allocation2 + $0x1e8] sm:$0xff]  ;;  %v8183_v60 = vcombine.low %v160_v48, %v164_v49 }
  0x7d   :  { %v9385_v56 = vld [vmem:[%s9918_s0 + $0x4] ss:$28 sps:$4 sm:$0xff]   ;;  %v8190_v61 = vcombine.high %v167_v54, %v171_v55  ;;  %v8192_v62 = vcombine.high %v168_v57, %v172_v58  ;;  %v176_v1 = vld [vmem:[#allocation2 + $0x208] sm:$0xff]  ;;  %v8189_v3 = vcombine.low %v167_v54, %v171_v55  ;;  %v8191_v4 = vcombine.low %v168_v57, %v172_v58 }
  0x7e   :  { %2884 = vmatpush1.bf16.msra.mxu0 %v8157_v34  ;;  %3056 = vmatpush1.bf16.msra.mxu1 %v8159_v35  ;;  %v175_v63 = vld [vmem:[#allocation2 + $0x200] sm:$0xff]  ;;  %v180_v2 = vld [vmem:[#allocation2 + $0x228] sm:$0xff] }
  0x7f   :  { %2885 = vmatprep.subr.bf16.mxu0 %v8166_v36  ;;  %3057 = vmatprep.subr.bf16.mxu1 %v8168_v37  ;;  %v179_v0 = vld [vmem:[#allocation2 + $0x220] sm:$0xff]  ;;  %v8200_v6 = vcombine.high %v176_v1, %v180_v2  ;;  %v184_v9 = vld [vmem:[#allocation2 + $0x248] sm:$0xff]  ;;  %v8199_v12 = vcombine.low %v176_v1, %v180_v2 }
  0x80   :  { %2909 = vmatprep.mubr.bf16.mxu0 %v9385_v56  ;;  %3081 = vmatprep.mubr.bf16.mxu1 %v9385_v56  ;;  %v8198_v5 = vcombine.high %v175_v63, %v179_v0  ;;  %v183_v7 = vld [vmem:[#allocation2 + $0x240] sm:$0xff]  ;;  %v188_v10 = vld [vmem:[#allocation2 + $0x268] sm:$0xff]  ;;  %v8197_v11 = vcombine.low %v175_v63, %v179_v0 }
  0x81   :  { %v187_v8 = vld [vmem:[#allocation2 + $0x260] sm:$0xff]  ;;  %v8208_v14 = vcombine.high %v184_v9, %v188_v10  ;;  %v192_v17 = vld [vmem:[#allocation2 + $0x288] sm:$0xff]  ;;  %v8207_v20 = vcombine.low %v184_v9, %v188_v10 }
  0x82   :  { %2886 = vmatpush1.bf16.msra.mxu0 %v8165_v42  ;;  %3058 = vmatpush1.bf16.msra.mxu1 %v8167_v43  ;;  %v8206_v13 = vcombine.high %v183_v7, %v187_v8  ;;  %v191_v15 = vld [vmem:[#allocation2 + $0x280] sm:$0xff]  ;;  %v196_v18 = vld [vmem:[#allocation2 + $0x2a8] sm:$0xff]  ;;  %v8205_v19 = vcombine.low %v183_v7, %v187_v8 }
  0x83   :  { %2887 = vmatprep.subr.bf16.mxu0 %v8174_v44  ;;  %3059 = vmatprep.subr.bf16.mxu1 %v8176_v45  ;;  %v195_v16 = vld [vmem:[#allocation2 + $0x2a0] sm:$0xff]  ;;  %v8216_v22 = vcombine.high %v192_v17, %v196_v18  ;;  %v200_v25 = vld [vmem:[#allocation2 + $0x2c8] sm:$0xff]  ;;  %v8215_v28 = vcombine.low %v192_v17, %v196_v18 }
  0x84   :  { %v8214_v21 = vcombine.high %v191_v15, %v195_v16  ;;  %v199_v23 = vld [vmem:[#allocation2 + $0x2c0] sm:$0xff]  ;;  %v204_v26 = vld [vmem:[#allocation2 + $0x2e8] sm:$0xff]  ;;  %v8213_v27 = vcombine.low %v191_v15, %v195_v16 }
  0x85   :  { %v203_v24 = vld [vmem:[#allocation2 + $0x2e0] sm:$0xff]  ;;  %v8224_v30 = vcombine.high %v200_v25, %v204_v26  ;;  %v208_v33 = vld [vmem:[#allocation2 + $0x308] sm:$0xff]  ;;  %v8223_v36 = vcombine.low %v200_v25, %v204_v26 }
  0x86   :  { %2888 = vmatpush1.bf16.msra.mxu0 %v8173_v50  ;;  %3060 = vmatpush1.bf16.msra.mxu1 %v8175_v51  ;;  %v8222_v29 = vcombine.high %v199_v23, %v203_v24  ;;  %v207_v31 = vld [vmem:[#allocation2 + $0x300] sm:$0xff]  ;;  %v212_v34 = vld [vmem:[#allocation2 + $0x328] sm:$0xff]  ;;  %v8221_v35 = vcombine.low %v199_v23, %v203_v24 }
  0x87   :  { %2889 = vmatprep.subr.bf16.mxu0 %v8182_v52  ;;  %3061 = vmatprep.subr.bf16.mxu1 %v8184_v53  ;;  %v211_v32 = vld [vmem:[#allocation2 + $0x320] sm:$0xff]  ;;  %v8232_v38 = vcombine.high %v208_v33, %v212_v34  ;;  %v216_v41 = vld [vmem:[#allocation2 + $0x348] sm:$0xff]  ;;  %v8231_v44 = vcombine.low %v208_v33, %v212_v34 }
  0x88   :  { %v8230_v37 = vcombine.high %v207_v31, %v211_v32  ;;  %v215_v39 = vld [vmem:[#allocation2 + $0x340] sm:$0xff]  ;;  %v220_v42 = vld [vmem:[#allocation2 + $0x368] sm:$0xff]  ;;  %v8229_v43 = vcombine.low %v207_v31, %v211_v32 }
  0x89   :  { %v219_v40 = vld [vmem:[#allocation2 + $0x360] sm:$0xff]  ;;  %v8240_v46 = vcombine.high %v216_v41, %v220_v42  ;;  %v224_v49 = vld [vmem:[#allocation2 + $0x388] sm:$0xff]  ;;  %v8239_v52 = vcombine.low %v216_v41, %v220_v42 }
  0x8a   :  { %2890 = vmatpush1.bf16.msra.mxu0 %v8181_v59  ;;  %3062 = vmatpush1.bf16.msra.mxu1 %v8183_v60  ;;  %v8238_v45 = vcombine.high %v215_v39, %v219_v40  ;;  %v223_v47 = vld [vmem:[#allocation2 + $0x380] sm:$0xff]  ;;  %v228_v50 = vld [vmem:[#allocation2 + $0x3a8] sm:$0xff]  ;;  %v8237_v51 = vcombine.low %v215_v39, %v219_v40 }
  0x8b   :  { %2891 = vmatprep.subr.bf16.mxu0 %v8190_v61  ;;  %3063 = vmatprep.subr.bf16.mxu1 %v8192_v62  ;;  %v227_v48 = vld [vmem:[#allocation2 + $0x3a0] sm:$0xff]  ;;  %v8248_v54 = vcombine.high %v224_v49, %v228_v50  ;;  %v232_v57 = vld [vmem:[#allocation2 + $0x3c8] sm:$0xff]  ;;  %v8247_v60 = vcombine.low %v224_v49, %v228_v50 }
  0x8c   :  { %v8246_v53 = vcombine.high %v223_v47, %v227_v48  ;;  %v231_v55 = vld [vmem:[#allocation2 + $0x3c0] sm:$0xff]  ;;  %v236_v58 = vld [vmem:[#allocation2 + $0x3e8] sm:$0xff]  ;;  %v8245_v59 = vcombine.low %v223_v47, %v227_v48 }
  0x8d   :  { %v235_v56 = vld [vmem:[#allocation2 + $0x3e0] sm:$0xff]  ;;  %v8256_v62 = vcombine.high %v232_v57, %v236_v58  ;;  %v240_v1 = vld [vmem:[#allocation2 + $0x408] sm:$0xff] }
  0x8e   :  { %2892 = vmatpush1.bf16.msra.mxu0 %v8189_v3  ;;  %3064 = vmatpush1.bf16.msra.mxu1 %v8191_v4  ;;  %v8254_v61 = vcombine.high %v231_v55, %v235_v56  ;;  %v239_v63 = vld [vmem:[#allocation2 + $0x400] sm:$0xff]  ;;  %v244_v2 = vld [vmem:[#allocation2 + $0x428] sm:$0xff]  ;;  %v8253_v3 = vcombine.low %v231_v55, %v235_v56  ;;  %v8255_v4 = vcombine.low %v232_v57, %v236_v58 }
  0x8f   :  { %2893 = vmatprep.subr.bf16.mxu0 %v8198_v5  ;;  %3065 = vmatprep.subr.bf16.mxu1 %v8200_v6  ;;  %v243_v0 = vld [vmem:[#allocation2 + $0x420] sm:$0xff]  ;;  %v8264_v6 = vcombine.high %v240_v1, %v244_v2  ;;  %v248_v10 = vld [vmem:[#allocation2 + $0x448] sm:$0xff] }
  0x90   :  { %v8262_v5 = vcombine.high %v239_v63, %v243_v0  ;;  %v247_v7 = vld [vmem:[#allocation2 + $0x440] sm:$0xff]  ;;  %v9388_v18 = vld [vmem:[%s9918_s0 + $0xc] ss:$28 sps:$4 sm:$0xff]  }
  0x91   :  { %v251_v8 = vld [vmem:[#allocation2 + $0x460] sm:$0xff]  ;;  %v272_v34 = vld [vmem:[#allocation2 + $0x508] sm:$0xff] }
  0x92   :  { %2894 = vmatpush1.bf16.msra.mxu0 %v8197_v11  ;;  %3066 = vmatpush1.bf16.msra.mxu1 %v8199_v12  ;;  %v9387_v9 = vld [vmem:[%s9918_s0] ss:$28 sps:$4 sm:$0xff]   ;;  %v252_v11 = vld [vmem:[#allocation2 + $0x468] sm:$0xff]  ;;  %v8261_v12 = vcombine.low %v239_v63, %v243_v0 }
  0x93   :  { %2895 = vmatprep.subr.bf16.mxu0 %v8206_v13  ;;  %3067 = vmatprep.subr.bf16.mxu1 %v8208_v14  ;;  %v8263_v13 = vcombine.low %v240_v1, %v244_v2  ;;  %v8270_v14 = vcombine.high %v247_v7, %v251_v8  ;;  %v255_v15 = vld [vmem:[#allocation2 + $0x480] sm:$0xff]  ;;  %v8272_v16 = vcombine.high %v248_v10, %v252_v11  ;;  %v280_v42 = vld [vmem:[#allocation2 + $0x548] sm:$0xff] }
  0x94   :  { %v259_v17 = vld [vmem:[#allocation2 + $0x4a0] sm:$0xff]  ;;  %v288_v50 = vld [vmem:[#allocation2 + $0x588] sm:$0xff] }
  0x95   :  { %v8278_v23 = vcombine.high %v255_v15, %v259_v17  ;;  %v263_v24 = vld [vmem:[#allocation2 + $0x4c0] sm:$0xff]  ;;  %v296_v58 = vld [vmem:[#allocation2 + $0x5c8] sm:$0xff] }
  0x96   :  { %2896 = vmatpush1.bf16.msra.mxu0 %v8205_v19  ;;  %3068 = vmatpush1.bf16.msra.mxu1 %v8207_v20  ;;  %v256_v19 = vld [vmem:[#allocation2 + $0x488] sm:$0xff]  ;;  %v267_v25 = vld [vmem:[#allocation2 + $0x4e0] sm:$0xff] }
  0x97   :  { %2897 = vmatprep.subr.bf16.mxu0 %v8214_v21  ;;  %3069 = vmatprep.subr.bf16.mxu1 %v8216_v22  ;;  %v260_v20 = vld [vmem:[#allocation2 + $0x4a8] sm:$0xff]  ;;  %v8269_v21 = vcombine.low %v247_v7, %v251_v8  ;;  %v8271_v22 = vcombine.low %v248_v10, %v252_v11  ;;  %v8286_v31 = vcombine.high %v263_v24, %v267_v25  ;;  %v271_v32 = vld [vmem:[#allocation2 + $0x500] sm:$0xff] }
  0x98   :  { %v8280_v26 = vcombine.high %v256_v19, %v260_v20  ;;  %v275_v33 = vld [vmem:[#allocation2 + $0x520] sm:$0xff]  ;;  %v304_v2 = vld [vmem:[#allocation2 + $0x608] sm:$0xff] }
  0x99   :  { %v8294_v39 = vcombine.high %v271_v32, %v275_v33  ;;  %v279_v40 = vld [vmem:[#allocation2 + $0x540] sm:$0xff]  ;;  %v312_v10 = vld [vmem:[#allocation2 + $0x648] sm:$0xff] }
  0x9a   :  { %2898 = vmatpush1.bf16.msra.mxu0 %v8213_v27  ;;  %3070 = vmatpush1.bf16.msra.mxu1 %v8215_v28  ;;  %v264_v27 = vld [vmem:[#allocation2 + $0x4c8] sm:$0xff]  ;;  %v283_v41 = vld [vmem:[#allocation2 + $0x560] sm:$0xff] }
  0x9b   :  { %2899 = vmatprep.subr.bf16.mxu0 %v8222_v29  ;;  %3071 = vmatprep.subr.bf16.mxu1 %v8224_v30  ;;  %v268_v28 = vld [vmem:[#allocation2 + $0x4e8] sm:$0xff]  ;;  %v8277_v29 = vcombine.low %v255_v15, %v259_v17  ;;  %v8279_v30 = vcombine.low %v256_v19, %v260_v20  ;;  %v8302_v47 = vcombine.high %v279_v40, %v283_v41  ;;  %v287_v48 = vld [vmem:[#allocation2 + $0x580] sm:$0xff] }
  0x9c   :  { %v291_v49 = vld [vmem:[#allocation2 + $0x5a0] sm:$0xff]  ;;  %v320_v19 = vld [vmem:[#allocation2 + $0x688] sm:$0xff] }
  0x9d   :  { %v8310_v55 = vcombine.high %v287_v48, %v291_v49  ;;  %v295_v56 = vld [vmem:[#allocation2 + $0x5c0] sm:$0xff]  ;;  %v324_v20 = vld [vmem:[#allocation2 + $0x6a8] sm:$0xff] }
  0x9e   :  { %2900 = vmatpush1.bf16.msra.mxu0 %v8221_v35  ;;  %3072 = vmatpush1.bf16.msra.mxu1 %v8223_v36  ;;  %v8288_v35 = vcombine.high %v264_v27, %v268_v28  ;;  %v276_v36 = vld [vmem:[#allocation2 + $0x528] sm:$0xff]  ;;  %v299_v57 = vld [vmem:[#allocation2 + $0x5e0] sm:$0xff] }
  0x9f   :  { %2901 = vmatprep.subr.bf16.mxu0 %v8230_v37  ;;  %3073 = vmatprep.subr.bf16.mxu1 %v8232_v38  ;;  %v8285_v37 = vcombine.low %v263_v24, %v267_v25  ;;  %v8287_v38 = vcombine.low %v264_v27, %v268_v28  ;;  %v8318_v63 = vcombine.high %v295_v56, %v299_v57  ;;  %v303_v0 = vld [vmem:[#allocation2 + $0x600] sm:$0xff]  ;;  %v332_v28 = vld [vmem:[#allocation2 + $0x6e8] sm:$0xff] }
  0xa0   :  { %v307_v1 = vld [vmem:[#allocation2 + $0x620] sm:$0xff]  ;;  %v8344_v27 = vcombine.high %v320_v19, %v324_v20 }
  0xa1   :  { %v8326_v7 = vcombine.high %v303_v0, %v307_v1  ;;  %v311_v8 = vld [vmem:[#allocation2 + $0x640] sm:$0xff] }
  0xa2   :  { %2902 = vmatpush1.bf16.msra.mxu0 %v8229_v43  ;;  %3074 = vmatpush1.bf16.msra.mxu1 %v8231_v44  ;;  %v8296_v43 = vcombine.high %v272_v34, %v276_v36  ;;  %v284_v44 = vld [vmem:[#allocation2 + $0x568] sm:$0xff]  ;;  %v323_v17 = vld [vmem:[#allocation2 + $0x6a0] sm:$0xff] }
  0xa3   :  { %2903 = vmatprep.subr.bf16.mxu0 %v8238_v45  ;;  %3075 = vmatprep.subr.bf16.mxu1 %v8240_v46  ;;  %v8293_v45 = vcombine.low %v271_v32, %v275_v33  ;;  %v8295_v46 = vcombine.low %v272_v34, %v276_v36  ;;  %v327_v24 = vld [vmem:[#allocation2 + $0x6c0] sm:$0xff]  ;;  %v336_v34 = vld [vmem:[#allocation2 + $0x708] sm:$0xff] }
  0xa4   :  { %v331_v25 = vld [vmem:[#allocation2 + $0x6e0] sm:$0xff]  ;;  %v340_v36 = vld [vmem:[#allocation2 + $0x728] sm:$0xff] }
  0xa5   :  { %v335_v32 = vld [vmem:[#allocation2 + $0x700] sm:$0xff] }
  0xa6   :  { %2904 = vmatpush1.bf16.msra.mxu0 %v8237_v51  ;;  %3076 = vmatpush1.bf16.msra.mxu1 %v8239_v52  ;;  %v8304_v51 = vcombine.high %v280_v42, %v284_v44  ;;  %v292_v52 = vld [vmem:[#allocation2 + $0x5a8] sm:$0xff]  ;;  %v339_v33 = vld [vmem:[#allocation2 + $0x720] sm:$0xff] }
  0xa7   :  { %2905 = vmatprep.subr.bf16.mxu0 %v8246_v53  ;;  %3077 = vmatprep.subr.bf16.mxu1 %v8248_v54  ;;  %v8301_v53 = vcombine.low %v279_v40, %v283_v41  ;;  %v8303_v54 = vcombine.low %v280_v42, %v284_v44  ;;  %v343_v40 = vld [vmem:[#allocation2 + $0x740] sm:$0xff]  ;;  %v344_v42 = vld [vmem:[#allocation2 + $0x748] sm:$0xff] }
  0xa8   :  { %v347_v41 = vld [vmem:[#allocation2 + $0x760] sm:$0xff]  ;;  %v348_v44 = vld [vmem:[#allocation2 + $0x768] sm:$0xff] }
  0xaa   :  { %2906 = vmatpush1.bf16.msra.mxu0 %v8245_v59  ;;  %3078 = vmatpush1.bf16.msra.mxu1 %v8247_v60  ;;  %v8312_v59 = vcombine.high %v288_v50, %v292_v52  ;;  %v300_v60 = vld [vmem:[#allocation2 + $0x5e8] sm:$0xff] }
  0xab   :  { %2907 = vmatprep.subr.bf16.mxu0 %v8254_v61  ;;  %3079 = vmatprep.subr.bf16.mxu1 %v8256_v62  ;;  %v8309_v61 = vcombine.low %v287_v48, %v291_v49  ;;  %v8311_v62 = vcombine.low %v288_v50, %v292_v52  ;;  %v351_v48 = vld [vmem:[#allocation2 + $0x780] sm:$0xff]  ;;  %v352_v50 = vld [vmem:[#allocation2 + $0x788] sm:$0xff] }
  0xac   :  { %v355_v49 = vld [vmem:[#allocation2 + $0x7a0] sm:$0xff]  ;;  %v356_v52 = vld [vmem:[#allocation2 + $0x7a8] sm:$0xff] }
  0xae   :  { %2908 = vmatpush1.bf16.msra.mxu0 %v8253_v3  ;;  %3080 = vmatpush1.bf16.msra.mxu1 %v8255_v4  ;;  %v8320_v3 = vcombine.high %v296_v58, %v300_v60  ;;  %v308_v4 = vld [vmem:[#allocation2 + $0x628] sm:$0xff] }
  0xaf   :  { %2920 = vmatprep.subr.bf16.mxu0 %v8262_v5  ;;  %3092 = vmatprep.subr.bf16.mxu1 %v8264_v6  ;;  %v8317_v5 = vcombine.low %v295_v56, %v299_v57  ;;  %v8319_v6 = vcombine.low %v296_v58, %v300_v60  ;;  %v8328_v11 = vcombine.high %v304_v2, %v308_v4  ;;  %v359_v56 = vld [vmem:[#allocation2 + $0x7c0] sm:$0xff]  ;;  %v360_v58 = vld [vmem:[#allocation2 + $0x7c8] sm:$0xff] }
  0xb0   :  { %v363_v57 = vld [vmem:[#allocation2 + $0x7e0] sm:$0xff]  ;;  %v364_v60 = vld [vmem:[#allocation2 + $0x7e8] sm:$0xff] }
  0xb1   :  { %2910 = vmatmul.mubr.bf16.vlgmr.msra.gmra.mrb[0].mxu0 %v9387_v9  ;;  %3082 = vmatmul.mubr.bf16.vlgmr.msra.gmra.mrb[0].mxu1 %v9387_v9  ;;  %v315_v9 = vld [vmem:[#allocation2 + $0x660] sm:$0xff] }
  0xb2   :  { %2921 = vmatpush1.bf16.msra.mxu0 %v8261_v12  ;;  %3093 = vmatpush1.bf16.msra.mxu1 %v8263_v13  ;;  %v316_v12 = vld [vmem:[#allocation2 + $0x668] sm:$0xff]  ;;  %v8325_v13 = vcombine.low %v303_v0, %v307_v1  ;;  %v8334_v15 = vcombine.high %v311_v8, %v315_v9  ;;  %v367_v0 = vld [vmem:[#allocation2 + $0x800] sm:$0xff] }
  0xb3   :  { %2922 = vmatprep.subr.bf16.mxu0 %v8270_v14  ;;  %3094 = vmatprep.subr.bf16.mxu1 %v8272_v16  ;;  %v8327_v14 = vcombine.low %v304_v2, %v308_v4  ;;  %v319_v16 = vld [vmem:[#allocation2 + $0x680] sm:$0xff]  ;;  %v368_v2 = vld [vmem:[#allocation2 + $0x808] sm:$0xff] }
  0xb4   :  { %2952 = vmatprep.mubr.bf16.mxu0 %v9388_v18  ;;  %3124 = vmatprep.mubr.bf16.mxu1 %v9388_v18  ;;  %v8336_v18 = vcombine.high %v312_v10, %v316_v12  ;;  %v371_v1 = vld [vmem:[#allocation2 + $0x820] sm:$0xff]  ;;  %v372_v4 = vld [vmem:[#allocation2 + $0x828] sm:$0xff] }
  0xb6   :  { %2923 = vmatpush1.bf16.msra.mxu0 %v8269_v21  ;;  %3095 = vmatpush1.bf16.msra.mxu1 %v8271_v22  ;;  %v8333_v21 = vcombine.low %v311_v8, %v315_v9  ;;  %v8335_v22 = vcombine.low %v312_v10, %v316_v12  ;;  %v9390_v8 = vld [vmem:[%s9918_s0 + $0x8] ss:$28 sps:$4 sm:$0xff]   ;;  %v8392_v12 = vcombine.high %v368_v2, %v372_v4 }
  0xb7   :  { %2924 = vmatprep.subr.bf16.mxu0 %v8278_v23  ;;  %3096 = vmatprep.subr.bf16.mxu1 %v8280_v26  ;;  %v8342_v23 = vcombine.high %v319_v16, %v323_v17  ;;  %v328_v26 = vld [vmem:[#allocation2 + $0x6c8] sm:$0xff]  ;;  %v375_v9 = vld [vmem:[#allocation2 + $0x840] sm:$0xff] }
  0xb8   :  { %v379_v10 = vld [vmem:[#allocation2 + $0x860] sm:$0xff] }
  0xba   :  { %2925 = vmatpush1.bf16.msra.mxu0 %v8277_v29  ;;  %3097 = vmatpush1.bf16.msra.mxu1 %v8279_v30  ;;  %v8341_v29 = vcombine.low %v319_v16, %v323_v17  ;;  %v8343_v30 = vcombine.low %v320_v19, %v324_v20  ;;  %v8391_v16 = vcombine.low %v368_v2, %v372_v4  ;;  %v384_v19 = vld [vmem:[#allocation2 + $0x888] sm:$0xff]  ;;  %v435_v4 = vld [vmem:[#allocation2 + $0xa20] sm:$0xff] }
  0xbb   :  { %2926 = vmatprep.subr.bf16.mxu0 %v8286_v31  ;;  %3098 = vmatprep.subr.bf16.mxu1 %v8288_v35  ;;  %v8350_v31 = vcombine.high %v327_v24, %v331_v25  ;;  %v8352_v35 = vcombine.high %v328_v26, %v332_v28  ;;  %v8398_v17 = vcombine.high %v375_v9, %v379_v10  ;;  %v388_v20 = vld [vmem:[#allocation2 + $0x8a8] sm:$0xff] }
  0xbe   :  { %2927 = vmatpush1.bf16.msra.mxu0 %v8285_v37  ;;  %3099 = vmatpush1.bf16.msra.mxu1 %v8287_v38  ;;  %v8349_v37 = vcombine.low %v327_v24, %v331_v25  ;;  %v8351_v38 = vcombine.low %v328_v26, %v332_v28  ;;  %v391_v26 = vld [vmem:[#allocation2 + $0x8c0] sm:$0xff]  ;;  %v8408_v28 = vcombine.high %v384_v19, %v388_v20 }
  0xbf   :  { %2928 = vmatprep.subr.bf16.mxu0 %v8294_v39  ;;  %3100 = vmatprep.subr.bf16.mxu1 %v8296_v43  ;;  %v8358_v39 = vcombine.high %v335_v32, %v339_v33  ;;  %v8360_v43 = vcombine.high %v336_v34, %v340_v36 }
  0xc2   :  { %2929 = vmatpush1.bf16.msra.mxu0 %v8293_v45  ;;  %3101 = vmatpush1.bf16.msra.mxu1 %v8295_v46  ;;  %v8357_v45 = vcombine.low %v335_v32, %v339_v33  ;;  %v8359_v46 = vcombine.low %v336_v34, %v340_v36  ;;  %v8407_v32 = vcombine.low %v384_v19, %v388_v20  ;;  %v403_v36 = vld [vmem:[#allocation2 + $0x920] sm:$0xff] }
  0xc3   :  { %2930 = vmatprep.subr.bf16.mxu0 %v8302_v47  ;;  %3102 = vmatprep.subr.bf16.mxu1 %v8304_v51  ;;  %v8366_v47 = vcombine.high %v343_v40, %v347_v41  ;;  %v8368_v51 = vcombine.high %v344_v42, %v348_v44  ;;  %v447_v19 = vld [vmem:[#allocation2 + $0xa80] sm:$0xff] }
  0xc4   :  { %v451_v20 = vld [vmem:[#allocation2 + $0xaa0] sm:$0xff] }
  0xc6   :  { %2931 = vmatpush1.bf16.msra.mxu0 %v8301_v53  ;;  %3103 = vmatpush1.bf16.msra.mxu1 %v8303_v54  ;;  %v8365_v53 = vcombine.low %v343_v40, %v347_v41  ;;  %v8367_v54 = vcombine.low %v344_v42, %v348_v44  ;;  %v411_v44 = vld [vmem:[#allocation2 + $0x960] sm:$0xff] }
  0xc7   :  { %2932 = vmatprep.subr.bf16.mxu0 %v8310_v55  ;;  %3104 = vmatprep.subr.bf16.mxu1 %v8312_v59  ;;  %v8374_v55 = vcombine.high %v351_v48, %v355_v49  ;;  %v8376_v59 = vcombine.high %v352_v50, %v356_v52 }
  0xca   :  { %2933 = vmatpush1.bf16.msra.mxu0 %v8309_v61  ;;  %3105 = vmatpush1.bf16.msra.mxu1 %v8311_v62  ;;  %v8373_v61 = vcombine.low %v351_v48, %v355_v49  ;;  %v8375_v62 = vcombine.low %v352_v50, %v356_v52  ;;  %v419_v52 = vld [vmem:[#allocation2 + $0x9a0] sm:$0xff] }
  0xcb   :  { %2934 = vmatprep.subr.bf16.mxu0 %v8318_v63  ;;  %3106 = vmatprep.subr.bf16.mxu1 %v8320_v3  ;;  %v8382_v63 = vcombine.high %v359_v56, %v363_v57  ;;  %v8384_v3 = vcombine.high %v360_v58, %v364_v60 }
  0xce   :  { %2935 = vmatpush1.bf16.msra.mxu0 %v8317_v5  ;;  %3107 = vmatpush1.bf16.msra.mxu1 %v8319_v6  ;;  %v8381_v5 = vcombine.low %v359_v56, %v363_v57  ;;  %v8383_v6 = vcombine.low %v360_v58, %v364_v60  ;;  %v427_v60 = vld [vmem:[#allocation2 + $0x9e0] sm:$0xff] }
  0xcf   :  { %2936 = vmatprep.subr.bf16.mxu0 %v8326_v7  ;;  %3108 = vmatprep.subr.bf16.mxu1 %v8328_v11  ;;  %v8390_v7 = vcombine.high %v367_v0, %v371_v1  ;;  %v376_v11 = vld [vmem:[#allocation2 + $0x848] sm:$0xff] }
  0xd2   :  { %2937 = vmatpush1.bf16.msra.mxu0 %v8325_v13  ;;  %3109 = vmatpush1.bf16.msra.mxu1 %v8327_v14  ;;  %v380_v13 = vld [vmem:[#allocation2 + $0x868] sm:$0xff]  ;;  %v8389_v14 = vcombine.low %v367_v0, %v371_v1 }
  0xd3   :  { %2938 = vmatprep.subr.bf16.mxu0 %v8334_v15  ;;  %3110 = vmatprep.subr.bf16.mxu1 %v8336_v18  ;;  %v383_v15 = vld [vmem:[#allocation2 + $0x880] sm:$0xff]  ;;  %v8399_v24 = vcombine.low %v376_v11, %v380_v13 }
  0xd4   :  { %v387_v18 = vld [vmem:[#allocation2 + $0x8a0] sm:$0xff] }
  0xd5   :  { %v8406_v25 = vcombine.high %v383_v15, %v387_v18 }
  0xd6   :  { %2939 = vmatpush1.bf16.msra.mxu0 %v8333_v21  ;;  %3111 = vmatpush1.bf16.msra.mxu1 %v8335_v22  ;;  %v8400_v21 = vcombine.high %v376_v11, %v380_v13  ;;  %v9391_v22 = vld [vmem:[%s9918_s0 + $0x14] ss:$28 sps:$4 sm:$0xff]   ;;  %v439_v11 = vld [vmem:[#allocation2 + $0xa40] sm:$0xff]  ;;  %v440_v13 = vld [vmem:[#allocation2 + $0xa48] sm:$0xff] }
  0xd7   :  { %2940 = vmatprep.subr.bf16.mxu0 %v8342_v23  ;;  %3112 = vmatprep.subr.bf16.mxu1 %v8344_v27  ;;  %v8397_v23 = vcombine.low %v375_v9, %v379_v10  ;;  %v395_v27 = vld [vmem:[#allocation2 + $0x8e0] sm:$0xff] }
  0xd8   :  { %v8414_v33 = vcombine.high %v391_v26, %v395_v27 }
  0xda   :  { %2941 = vmatpush1.bf16.msra.mxu0 %v8341_v29  ;;  %3113 = vmatpush1.bf16.msra.mxu1 %v8343_v30  ;;  %v392_v29 = vld [vmem:[#allocation2 + $0x8c8] sm:$0xff] }
  0xdb   :  { %2942 = vmatprep.subr.bf16.mxu0 %v8350_v31  ;;  %3114 = vmatprep.subr.bf16.mxu1 %v8352_v35  ;;  %v396_v30 = vld [vmem:[#allocation2 + $0x8e8] sm:$0xff]  ;;  %v8405_v31 = vcombine.low %v383_v15, %v387_v18  ;;  %v399_v35 = vld [vmem:[#allocation2 + $0x900] sm:$0xff] }
  0xdc   :  { %v8416_v34 = vcombine.high %v392_v29, %v396_v30  ;;  %v8415_v40 = vcombine.low %v392_v29, %v396_v30  ;;  %v8422_v41 = vcombine.high %v399_v35, %v403_v36  ;;  %v456_v29 = vld [vmem:[#allocation2 + $0xac8] sm:$0xff] }
  0xdd   :  { %v460_v30 = vld [vmem:[#allocation2 + $0xae8] sm:$0xff] }
  0xde   :  { %2943 = vmatpush1.bf16.msra.mxu0 %v8349_v37  ;;  %3115 = vmatpush1.bf16.msra.mxu1 %v8351_v38  ;;  %v400_v37 = vld [vmem:[#allocation2 + $0x908] sm:$0xff] }
  0xdf   :  { %2944 = vmatprep.subr.bf16.mxu0 %v8358_v39  ;;  %3116 = vmatprep.subr.bf16.mxu1 %v8360_v43  ;;  %v404_v38 = vld [vmem:[#allocation2 + $0x928] sm:$0xff]  ;;  %v8413_v39 = vcombine.low %v391_v26, %v395_v27  ;;  %v407_v43 = vld [vmem:[#allocation2 + $0x940] sm:$0xff] }
  0xe0   :  { %v8424_v42 = vcombine.high %v400_v37, %v404_v38  ;;  %v8423_v48 = vcombine.low %v400_v37, %v404_v38  ;;  %v8430_v49 = vcombine.high %v407_v43, %v411_v44  ;;  %v455_v27 = vld [vmem:[#allocation2 + $0xac0] sm:$0xff]  ;;  %v464_v37 = vld [vmem:[#allocation2 + $0xb08] sm:$0xff] }
  0xe1   :  { %v468_v38 = vld [vmem:[#allocation2 + $0xb28] sm:$0xff] }
  0xe2   :  { %2945 = vmatpush1.bf16.msra.mxu0 %v8357_v45  ;;  %3117 = vmatpush1.bf16.msra.mxu1 %v8359_v46  ;;  %v408_v45 = vld [vmem:[#allocation2 + $0x948] sm:$0xff] }
  0xe3   :  { %2946 = vmatprep.subr.bf16.mxu0 %v8366_v47  ;;  %3118 = vmatprep.subr.bf16.mxu1 %v8368_v51  ;;  %v412_v46 = vld [vmem:[#allocation2 + $0x968] sm:$0xff]  ;;  %v8421_v47 = vcombine.low %v399_v35, %v403_v36  ;;  %v415_v51 = vld [vmem:[#allocation2 + $0x980] sm:$0xff] }
  0xe4   :  { %v8432_v50 = vcombine.high %v408_v45, %v412_v46  ;;  %v8431_v56 = vcombine.low %v408_v45, %v412_v46  ;;  %v8438_v57 = vcombine.high %v415_v51, %v419_v52  ;;  %v463_v35 = vld [vmem:[#allocation2 + $0xb00] sm:$0xff]  ;;  %v472_v45 = vld [vmem:[#allocation2 + $0xb48] sm:$0xff] }
  0xe5   :  { %v467_v36 = vld [vmem:[#allocation2 + $0xb20] sm:$0xff]  ;;  %v476_v46 = vld [vmem:[#allocation2 + $0xb68] sm:$0xff] }
  0xe6   :  { %2947 = vmatpush1.bf16.msra.mxu0 %v8365_v53  ;;  %3119 = vmatpush1.bf16.msra.mxu1 %v8367_v54  ;;  %v416_v53 = vld [vmem:[#allocation2 + $0x988] sm:$0xff] }
  0xe7   :  { %2948 = vmatprep.subr.bf16.mxu0 %v8374_v55  ;;  %3120 = vmatprep.subr.bf16.mxu1 %v8376_v59  ;;  %v420_v54 = vld [vmem:[#allocation2 + $0x9a8] sm:$0xff]  ;;  %v8429_v55 = vcombine.low %v407_v43, %v411_v44  ;;  %v423_v59 = vld [vmem:[#allocation2 + $0x9c0] sm:$0xff] }
  0xe8   :  { %v8440_v58 = vcombine.high %v416_v53, %v420_v54  ;;  %v8439_v0 = vcombine.low %v416_v53, %v420_v54  ;;  %v8446_v1 = vcombine.high %v423_v59, %v427_v60  ;;  %v471_v43 = vld [vmem:[#allocation2 + $0xb40] sm:$0xff]  ;;  %v480_v53 = vld [vmem:[#allocation2 + $0xb88] sm:$0xff] }
  0xe9   :  { %v475_v44 = vld [vmem:[#allocation2 + $0xb60] sm:$0xff]  ;;  %v484_v54 = vld [vmem:[#allocation2 + $0xba8] sm:$0xff] }
  0xea   :  { %2949 = vmatpush1.bf16.msra.mxu0 %v8373_v61  ;;  %3121 = vmatpush1.bf16.msra.mxu1 %v8375_v62  ;;  %v424_v61 = vld [vmem:[#allocation2 + $0x9c8] sm:$0xff] }
  0xeb   :  { %2950 = vmatprep.subr.bf16.mxu0 %v8382_v63  ;;  %3122 = vmatprep.subr.bf16.mxu1 %v8384_v3  ;;  %v428_v62 = vld [vmem:[#allocation2 + $0x9e8] sm:$0xff]  ;;  %v8437_v63 = vcombine.low %v415_v51, %v419_v52  ;;  %v431_v3 = vld [vmem:[#allocation2 + $0xa00] sm:$0xff] }
  0xec   :  { %v8448_v2 = vcombine.high %v424_v61, %v428_v62  ;;  %v8454_v9 = vcombine.high %v431_v3, %v435_v4  ;;  %v8453_v15 = vcombine.low %v431_v3, %v435_v4  ;;  %v479_v51 = vld [vmem:[#allocation2 + $0xb80] sm:$0xff] }
  0xed   :  { %v483_v52 = vld [vmem:[#allocation2 + $0xba0] sm:$0xff] }
  0xee   :  { %2951 = vmatpush1.bf16.msra.mxu0 %v8381_v5  ;;  %3123 = vmatpush1.bf16.msra.mxu1 %v8383_v6  ;;  %v432_v5 = vld [vmem:[#allocation2 + $0xa08] sm:$0xff]  ;;  %v495_v3 = vld [vmem:[#allocation2 + $0xc00] sm:$0xff] }
  0xef   :  { %2963 = vmatprep.subr.bf16.mxu0 %v8390_v7  ;;  %3135 = vmatprep.subr.bf16.mxu1 %v8392_v12  ;;  %v436_v6 = vld [vmem:[#allocation2 + $0xa28] sm:$0xff]  ;;  %v8445_v7 = vcombine.low %v423_v59, %v427_v60  ;;  %v443_v12 = vld [vmem:[#allocation2 + $0xa60] sm:$0xff] }
  0xf0   :  { %v8456_v10 = vcombine.high %v432_v5, %v436_v6  ;;  %v487_v59 = vld [vmem:[#allocation2 + $0xbc0] sm:$0xff] }
  0xf1   :  { %2953 = vmatmul.mubr.bf16.vlgmr.msra.gmra.mrb[0].mxu0 %v9390_v8  ;;  %3125 = vmatmul.mubr.bf16.vlgmr.msra.gmra.mrb[0].mxu1 %v9390_v8  ;;  %v8447_v8 = vcombine.low %v424_v61, %v428_v62  ;;  %v491_v60 = vld [vmem:[#allocation2 + $0xbe0] sm:$0xff]  ;;  %v488_v61 = vld [vmem:[#allocation2 + $0xbc8] sm:$0xff] }
  0xf2   :  { %2964 = vmatpush1.bf16.msra.mxu0 %v8389_v14  ;;  %3136 = vmatpush1.bf16.msra.mxu1 %v8391_v16  ;;  %v444_v14 = vld [vmem:[#allocation2 + $0xa68] sm:$0xff]  ;;  %v8455_v16 = vcombine.low %v432_v5, %v436_v6  ;;  %v499_v4 = vld [vmem:[#allocation2 + $0xc20] sm:$0xff] }
  0xf3   :  { %2965 = vmatprep.subr.bf16.mxu0 %v8398_v17  ;;  %3137 = vmatprep.subr.bf16.mxu1 %v8400_v21  ;;  %v8462_v17 = vcombine.high %v439_v11, %v443_v12  ;;  %v8464_v18 = vcombine.high %v440_v13, %v444_v14  ;;  %v448_v21 = vld [vmem:[#allocation2 + $0xa88] sm:$0xff] }
  0xf4   :  { %2995 = vmatprep.mubr.bf16.mxu0 %v9391_v22  ;;  %3167 = vmatprep.mubr.bf16.mxu1 %v9391_v22  ;;  %v452_v22 = vld [vmem:[#allocation2 + $0xaa8] sm:$0xff] }
  0xf5   :  { %v8472_v26 = vcombine.high %v448_v21, %v452_v22  ;;  %v492_v62 = vld [vmem:[#allocation2 + $0xbe8] sm:$0xff] }
  0xf6   :  { %2966 = vmatpush1.bf16.msra.mxu0 %v8397_v23  ;;  %3138 = vmatpush1.bf16.msra.mxu1 %v8399_v24  ;;  %v8461_v23 = vcombine.low %v439_v11, %v443_v12  ;;  %v8463_v24 = vcombine.low %v440_v13, %v444_v14  ;;  %v496_v5 = vld [vmem:[#allocation2 + $0xc08] sm:$0xff]  ;;  %v503_v11 = vld [vmem:[#allocation2 + $0xc40] sm:$0xff] }
  0xf7   :  { %2967 = vmatprep.subr.bf16.mxu0 %v8406_v25  ;;  %3139 = vmatprep.subr.bf16.mxu1 %v8408_v28  ;;  %v8470_v25 = vcombine.high %v447_v19, %v451_v20  ;;  %v459_v28 = vld [vmem:[#allocation2 + $0xae0] sm:$0xff]  ;;  %v500_v6 = vld [vmem:[#allocation2 + $0xc28] sm:$0xff] }
  0xf8   :  { %v507_v12 = vld [vmem:[#allocation2 + $0xc60] sm:$0xff]  ;;  %v9393_v13 = vld [vmem:[%s9918_s0 + $0x10] ss:$28 sps:$4 sm:$0xff]  }
  0xf9   :  { %v504_v14 = vld [vmem:[#allocation2 + $0xc48] sm:$0xff] }
  0xfa   :  { %2968 = vmatpush1.bf16.msra.mxu0 %v8405_v31  ;;  %3140 = vmatpush1.bf16.msra.mxu1 %v8407_v32  ;;  %v8469_v31 = vcombine.low %v447_v19, %v451_v20  ;;  %v8471_v32 = vcombine.low %v448_v21, %v452_v22  ;;  %v511_v20 = vld [vmem:[#allocation2 + $0xc80] sm:$0xff]  ;;  %v512_v22 = vld [vmem:[#allocation2 + $0xc88] sm:$0xff] }
  0xfb   :  { %2969 = vmatprep.subr.bf16.mxu0 %v8414_v33  ;;  %3141 = vmatprep.subr.bf16.mxu1 %v8416_v34  ;;  %v8478_v33 = vcombine.high %v455_v27, %v459_v28  ;;  %v8480_v34 = vcombine.high %v456_v29, %v460_v30  ;;  %v515_v21 = vld [vmem:[#allocation2 + $0xca0] sm:$0xff] }
  0xfe   :  { %2970 = vmatpush1.bf16.msra.mxu0 %v8413_v39  ;;  %3142 = vmatpush1.bf16.msra.mxu1 %v8415_v40  ;;  %v8477_v39 = vcombine.low %v455_v27, %v459_v28  ;;  %v8479_v40 = vcombine.low %v456_v29, %v460_v30  ;;  %v519_v28 = vld [vmem:[#allocation2 + $0xcc0] sm:$0xff]  ;;  %v9625_v30 = vmov 0  }
  0xff   :  { %2971 = vmatprep.subr.bf16.mxu0 %v8422_v41  ;;  %3143 = vmatprep.subr.bf16.mxu1 %v8424_v42  ;;  %v8486_v41 = vcombine.high %v463_v35, %v467_v36  ;;  %v8488_v42 = vcombine.high %v464_v37, %v468_v38  ;;  %v523_v29 = vld [vmem:[#allocation2 + $0xce0] sm:$0xff] }
 0x102   :  { %2972 = vmatpush1.bf16.msra.mxu0 %v8421_v47  ;;  %3144 = vmatpush1.bf16.msra.mxu1 %v8423_v48  ;;  %v8485_v47 = vcombine.low %v463_v35, %v467_v36  ;;  %v8487_v48 = vcombine.low %v464_v37, %v468_v38  ;;  %v8542_v35 = vcombine.high %v519_v28, %v523_v29  ;;  %v527_v37 = vld [vmem:[#allocation2 + $0xd00] sm:$0xff] }
 0x103   :  { %2973 = vmatprep.subr.bf16.mxu0 %v8430_v49  ;;  %3145 = vmatprep.subr.bf16.mxu1 %v8432_v50  ;;  %v8494_v49 = vcombine.high %v471_v43, %v475_v44  ;;  %v8496_v50 = vcombine.high %v472_v45, %v476_v46  ;;  %v531_v38 = vld [vmem:[#allocation2 + $0xd20] sm:$0xff] }
 0x106   :  { %2974 = vmatpush1.bf16.msra.mxu0 %v8429_v55  ;;  %3146 = vmatpush1.bf16.msra.mxu1 %v8431_v56  ;;  %v8493_v55 = vcombine.low %v471_v43, %v475_v44  ;;  %v8495_v56 = vcombine.low %v472_v45, %v476_v46  ;;  %v8550_v43 = vcombine.high %v527_v37, %v531_v38  ;;  %v535_v45 = vld [vmem:[#allocation2 + $0xd40] sm:$0xff] }
 0x107   :  { %2975 = vmatprep.subr.bf16.mxu0 %v8438_v57  ;;  %3147 = vmatprep.subr.bf16.mxu1 %v8440_v58  ;;  %v8502_v57 = vcombine.high %v479_v51, %v483_v52  ;;  %v8504_v58 = vcombine.high %v480_v53, %v484_v54  ;;  %v539_v46 = vld [vmem:[#allocation2 + $0xd60] sm:$0xff] }
 0x10a   :  { %2976 = vmatpush1.bf16.msra.mxu0 %v8437_v63  ;;  %3148 = vmatpush1.bf16.msra.mxu1 %v8439_v0  ;;  %v8501_v63 = vcombine.low %v479_v51, %v483_v52  ;;  %v8503_v0 = vcombine.low %v480_v53, %v484_v54  ;;  %v8558_v51 = vcombine.high %v535_v45, %v539_v46  ;;  %v543_v53 = vld [vmem:[#allocation2 + $0xd80] sm:$0xff] }
 0x10b   :  { %2977 = vmatprep.subr.bf16.mxu0 %v8446_v1  ;;  %3149 = vmatprep.subr.bf16.mxu1 %v8448_v2  ;;  %v8510_v1 = vcombine.high %v487_v59, %v491_v60  ;;  %v8512_v2 = vcombine.high %v488_v61, %v492_v62  ;;  %v547_v54 = vld [vmem:[#allocation2 + $0xda0] sm:$0xff] }
 0x10e   :  { %2978 = vmatpush1.bf16.msra.mxu0 %v8445_v7  ;;  %3150 = vmatpush1.bf16.msra.mxu1 %v8447_v8  ;;  %v8509_v7 = vcombine.low %v487_v59, %v491_v60  ;;  %v8511_v8 = vcombine.low %v488_v61, %v492_v62  ;;  %v8566_v59 = vcombine.high %v543_v53, %v547_v54  ;;  %v551_v61 = vld [vmem:[#allocation2 + $0xdc0] sm:$0xff] }
 0x10f   :  { %2979 = vmatprep.subr.bf16.mxu0 %v8454_v9  ;;  %3151 = vmatprep.subr.bf16.mxu1 %v8456_v10  ;;  %v8518_v9 = vcombine.high %v495_v3, %v499_v4  ;;  %v8520_v10 = vcombine.high %v496_v5, %v500_v6  ;;  %v555_v62 = vld [vmem:[#allocation2 + $0xde0] sm:$0xff] }
 0x112   :  { %2980 = vmatpush1.bf16.msra.mxu0 %v8453_v15  ;;  %3152 = vmatpush1.bf16.msra.mxu1 %v8455_v16  ;;  %v508_v15 = vld [vmem:[#allocation2 + $0xc68] sm:$0xff]  ;;  %v8517_v16 = vcombine.low %v495_v3, %v499_v4  ;;  %v8574_v3 = vcombine.high %v551_v61, %v555_v62 }
 0x113   :  { %2981 = vmatprep.subr.bf16.mxu0 %v8462_v17  ;;  %3153 = vmatprep.subr.bf16.mxu1 %v8464_v18  ;;  %v8519_v17 = vcombine.low %v496_v5, %v500_v6  ;;  %v8526_v18 = vcombine.high %v503_v11, %v507_v12  ;;  %v8528_v19 = vcombine.high %v504_v14, %v508_v15  ;;  %v113_v5 = vld [vmem:[#allocation2 + $0x10] sm:$0xff] }
 0x114   :  { %v117_v6 = vld [vmem:[#allocation2 + $0x30] sm:$0xff] }
 0x116   :  { %2982 = vmatpush1.bf16.msra.mxu0 %v8461_v23  ;;  %3154 = vmatpush1.bf16.msra.mxu1 %v8463_v24  ;;  %v516_v23 = vld [vmem:[#allocation2 + $0xca8] sm:$0xff]  ;;  %v8525_v24 = vcombine.low %v503_v11, %v507_v12  ;;  %v8138_v11 = vcombine.high %v113_v5, %v117_v6 }
 0x117   :  { %2983 = vmatprep.subr.bf16.mxu0 %v8470_v25  ;;  %3155 = vmatprep.subr.bf16.mxu1 %v8472_v26  ;;  %v8527_v25 = vcombine.low %v504_v14, %v508_v15  ;;  %v8534_v26 = vcombine.high %v511_v20, %v515_v21  ;;  %v8536_v27 = vcombine.high %v512_v22, %v516_v23  ;;  %v125_v14 = vld [vmem:[#allocation2 + $0x70] sm:$0xff] }
 0x118   :  { %v9394_v15 = vld [vmem:[%s9918_s0 + $0x18] ss:$28 sps:$4 sm:$0xff]  }
 0x11a   :  { %2984 = vmatpush1.bf16.msra.mxu0 %v8469_v31  ;;  %3156 = vmatpush1.bf16.msra.mxu1 %v8471_v32  ;;  %v520_v31 = vld [vmem:[#allocation2 + $0xcc8] sm:$0xff] }
 0x11b   :  { %2985 = vmatprep.subr.bf16.mxu0 %v8478_v33  ;;  %3157 = vmatprep.subr.bf16.mxu1 %v8480_v34  ;;  %v524_v32 = vld [vmem:[#allocation2 + $0xce8] sm:$0xff]  ;;  %v8533_v33 = vcombine.low %v511_v20, %v515_v21  ;;  %v8535_v34 = vcombine.low %v512_v22, %v516_v23  ;;  %v129_v22 = vld [vmem:[#allocation2 + $0x90] sm:$0xff] }
 0x11c   :  { %v8544_v36 = vcombine.high %v520_v31, %v524_v32  ;;  %v133_v23 = vld [vmem:[#allocation2 + $0xb0] sm:$0xff] }
 0x11e   :  { %2986 = vmatpush1.bf16.msra.mxu0 %v8477_v39  ;;  %3158 = vmatpush1.bf16.msra.mxu1 %v8479_v40  ;;  %v528_v39 = vld [vmem:[#allocation2 + $0xd08] sm:$0xff] }
 0x11f   :  { %2987 = vmatprep.subr.bf16.mxu0 %v8486_v41  ;;  %3159 = vmatprep.subr.bf16.mxu1 %v8488_v42  ;;  %v532_v40 = vld [vmem:[#allocation2 + $0xd28] sm:$0xff]  ;;  %v8541_v41 = vcombine.low %v519_v28, %v523_v29  ;;  %v8543_v42 = vcombine.low %v520_v31, %v524_v32  ;;  %v8154_v28 = vcombine.high %v129_v22, %v133_v23  ;;  %v137_v31 = vld [vmem:[#allocation2 + $0xd0] sm:$0xff] }
 0x120   :  { %v8552_v44 = vcombine.high %v528_v39, %v532_v40  ;;  %v141_v32 = vld [vmem:[#allocation2 + $0xf0] sm:$0xff] }
 0x122   :  { %2988 = vmatpush1.bf16.msra.mxu0 %v8485_v47  ;;  %3160 = vmatpush1.bf16.msra.mxu1 %v8487_v48  ;;  %v536_v47 = vld [vmem:[#allocation2 + $0xd48] sm:$0xff] }
 0x123   :  { %2989 = vmatprep.subr.bf16.mxu0 %v8494_v49  ;;  %3161 = vmatprep.subr.bf16.mxu1 %v8496_v50  ;;  %v540_v48 = vld [vmem:[#allocation2 + $0xd68] sm:$0xff]  ;;  %v8549_v49 = vcombine.low %v527_v37, %v531_v38  ;;  %v8551_v50 = vcombine.low %v528_v39, %v532_v40  ;;  %v8162_v38 = vcombine.high %v137_v31, %v141_v32  ;;  %v145_v40 = vld [vmem:[#allocation2 + $0x110] sm:$0xff] }
 0x124   :  { %v8560_v52 = vcombine.high %v536_v47, %v540_v48 }
 0x126   :  { %2990 = vmatpush1.bf16.msra.mxu0 %v8493_v55  ;;  %3162 = vmatpush1.bf16.msra.mxu1 %v8495_v56  ;;  %v544_v55 = vld [vmem:[#allocation2 + $0xd88] sm:$0xff] }
 0x127   :  { %2991 = vmatprep.subr.bf16.mxu0 %v8502_v57  ;;  %3163 = vmatprep.subr.bf16.mxu1 %v8504_v58  ;;  %v548_v56 = vld [vmem:[#allocation2 + $0xda8] sm:$0xff]  ;;  %v8557_v57 = vcombine.low %v535_v45, %v539_v46  ;;  %v8559_v58 = vcombine.low %v536_v47, %v540_v48  ;;  %v153_v48 = vld [vmem:[#allocation2 + $0x150] sm:$0xff] }
 0x128   :  { %v8568_v60 = vcombine.high %v544_v55, %v548_v56 }
 0x12a   :  { %2992 = vmatpush1.bf16.msra.mxu0 %v8501_v63  ;;  %3164 = vmatpush1.bf16.msra.mxu1 %v8503_v0  ;;  %v552_v63 = vld [vmem:[#allocation2 + $0xdc8] sm:$0xff] }
 0x12b   :  { %2993 = vmatprep.subr.bf16.mxu0 %v8510_v1  ;;  %3165 = vmatprep.subr.bf16.mxu1 %v8512_v2  ;;  %v556_v0 = vld [vmem:[#allocation2 + $0xde8] sm:$0xff]  ;;  %v8565_v1 = vcombine.low %v543_v53, %v547_v54  ;;  %v8567_v2 = vcombine.low %v544_v55, %v548_v56  ;;  %v161_v56 = vld [vmem:[#allocation2 + $0x190] sm:$0xff] }
 0x12c   :  { %v8576_v4 = vcombine.high %v552_v63, %v556_v0 }
 0x12e   :  { %2994 = vmatpush1.bf16.msra.mxu0 %v8509_v7  ;;  %3166 = vmatpush1.bf16.msra.mxu1 %v8511_v8  ;;  %v114_v7 = vld [vmem:[#allocation2 + $0x18] sm:$0xff] }
 0x12f   :  { %3006 = vmatprep.subr.bf16.mxu0 %v8518_v9  ;;  %3178 = vmatprep.subr.bf16.mxu1 %v8520_v10  ;;  %v118_v8 = vld [vmem:[#allocation2 + $0x38] sm:$0xff]  ;;  %v8573_v9 = vcombine.low %v551_v61, %v555_v62  ;;  %v8575_v10 = vcombine.low %v552_v63, %v556_v0  ;;  %v169_v0 = vld [vmem:[#allocation2 + $0x1d0] sm:$0xff] }
 0x130   :  { %v8140_v12 = vcombine.high %v114_v7, %v118_v8 }
 0x131   :  { %2996 = vmatmul.mubr.bf16.vlgmr.msra.gmra.mrb[0].mxu0 %v9393_v13  ;;  %3168 = vmatmul.mubr.bf16.vlgmr.msra.gmra.mrb[0].mxu1 %v9393_v13  ;;  %v121_v13 = vld [vmem:[#allocation2 + $0x50] sm:$0xff] }
 0x132   :  { %3007 = vmatpush1.bf16.msra.mxu0 %v8517_v16  ;;  %3179 = vmatpush1.bf16.msra.mxu1 %v8519_v17  ;;  %v122_v16 = vld [vmem:[#allocation2 + $0x58] sm:$0xff]  ;;  %v8146_v20 = vcombine.high %v121_v13, %v125_v14 }
 0x133   :  { %3008 = vmatprep.subr.bf16.mxu0 %v8526_v18  ;;  %3180 = vmatprep.subr.bf16.mxu1 %v8528_v19  ;;  %v126_v17 = vld [vmem:[#allocation2 + $0x78] sm:$0xff]  ;;  %v8137_v18 = vcombine.low %v113_v5, %v117_v6  ;;  %v8139_v19 = vcombine.low %v114_v7, %v118_v8  ;;  %v177_v8 = vld [vmem:[#allocation2 + $0x210] sm:$0xff] }
 0x134   :  { %3038 = vmatprep.mubr.bf16.mxu0 %v9625_v30  ;;  %3210 = vmatprep.mubr.bf16.mxu1 %v9625_v30  ;;  %v8148_v21 = vcombine.high %v122_v16, %v126_v17 }
 0x136   :  { %3009 = vmatpush1.bf16.msra.mxu0 %v8525_v24  ;;  %3181 = vmatpush1.bf16.msra.mxu1 %v8527_v25  ;;  %v130_v24 = vld [vmem:[#allocation2 + $0x98] sm:$0xff] }
 0x137   :  { %3010 = vmatprep.subr.bf16.mxu0 %v8534_v26  ;;  %3182 = vmatprep.subr.bf16.mxu1 %v8536_v27  ;;  %v134_v25 = vld [vmem:[#allocation2 + $0xb8] sm:$0xff]  ;;  %v8145_v26 = vcombine.low %v121_v13, %v125_v14  ;;  %v8147_v27 = vcombine.low %v122_v16, %v126_v17  ;;  %v185_v16 = vld [vmem:[#allocation2 + $0x250] sm:$0xff] }
 0x138   :  { %v8156_v29 = vcombine.high %v130_v24, %v134_v25  ;;  %v8155_v37 = vcombine.low %v130_v24, %v134_v25  ;;  %v189_v17 = vld [vmem:[#allocation2 + $0x270] sm:$0xff] }
 0x139   :  { %v193_v24 = vld [vmem:[#allocation2 + $0x290] sm:$0xff] }
 0x13a   :  { %3011 = vmatpush1.bf16.msra.mxu0 %v8533_v33  ;;  %3183 = vmatpush1.bf16.msra.mxu1 %v8535_v34  ;;  %v9467_v33 = vld [vmem:[%s9918_s0 + $0x4] ss:$28 sps:$4 sm:$0xff]   ;;  %v138_v34 = vld [vmem:[#allocation2 + $0xd8] sm:$0xff]  ;;  %v197_v25 = vld [vmem:[#allocation2 + $0x2b0] sm:$0xff] }
 0x13b   :  { %3012 = vmatprep.subr.bf16.mxu0 %v8542_v35  ;;  %3184 = vmatprep.subr.bf16.mxu1 %v8544_v36  ;;  %v142_v35 = vld [vmem:[#allocation2 + $0xf8] sm:$0xff]  ;;  %v8153_v36 = vcombine.low %v129_v22, %v133_v23  ;;  %v8210_v22 = vcombine.high %v185_v16, %v189_v17 }
 0x13c   :  { %v8164_v39 = vcombine.high %v138_v34, %v142_v35  ;;  %v8163_v45 = vcombine.low %v138_v34, %v142_v35  ;;  %v205_v34 = vld [vmem:[#allocation2 + $0x2f0] sm:$0xff]  ;;  %v202_v35 = vld [vmem:[#allocation2 + $0x2d8] sm:$0xff] }
 0x13e   :  { %3013 = vmatpush1.bf16.msra.mxu0 %v8541_v41  ;;  %3185 = vmatpush1.bf16.msra.mxu1 %v8543_v42  ;;  %v149_v41 = vld [vmem:[#allocation2 + $0x130] sm:$0xff]  ;;  %v146_v42 = vld [vmem:[#allocation2 + $0x118] sm:$0xff] }
 0x13f   :  { %3014 = vmatprep.subr.bf16.mxu0 %v8550_v43  ;;  %3186 = vmatprep.subr.bf16.mxu1 %v8552_v44  ;;  %v150_v43 = vld [vmem:[#allocation2 + $0x138] sm:$0xff]  ;;  %v8161_v44 = vcombine.low %v137_v31, %v141_v32  ;;  %v8170_v46 = vcombine.high %v145_v40, %v149_v41  ;;  %v8218_v31 = vcombine.high %v193_v24, %v197_v25 }
 0x140   :  { %v8172_v47 = vcombine.high %v146_v42, %v150_v43  ;;  %v8171_v53 = vcombine.low %v146_v42, %v150_v43  ;;  %v213_v42 = vld [vmem:[#allocation2 + $0x330] sm:$0xff]  ;;  %v210_v43 = vld [vmem:[#allocation2 + $0x318] sm:$0xff] }
 0x142   :  { %3015 = vmatpush1.bf16.msra.mxu0 %v8549_v49  ;;  %3187 = vmatpush1.bf16.msra.mxu1 %v8551_v50  ;;  %v157_v49 = vld [vmem:[#allocation2 + $0x170] sm:$0xff]  ;;  %v154_v50 = vld [vmem:[#allocation2 + $0x158] sm:$0xff] }
 0x143   :  { %3016 = vmatprep.subr.bf16.mxu0 %v8558_v51  ;;  %3188 = vmatprep.subr.bf16.mxu1 %v8560_v52  ;;  %v158_v51 = vld [vmem:[#allocation2 + $0x178] sm:$0xff]  ;;  %v8169_v52 = vcombine.low %v145_v40, %v149_v41  ;;  %v8178_v54 = vcombine.high %v153_v48, %v157_v49  ;;  %v209_v41 = vld [vmem:[#allocation2 + $0x310] sm:$0xff] }
 0x144   :  { %v8180_v55 = vcombine.high %v154_v50, %v158_v51  ;;  %v8179_v61 = vcombine.low %v154_v50, %v158_v51  ;;  %v221_v50 = vld [vmem:[#allocation2 + $0x370] sm:$0xff]  ;;  %v218_v51 = vld [vmem:[#allocation2 + $0x358] sm:$0xff] }
 0x146   :  { %3017 = vmatpush1.bf16.msra.mxu0 %v8557_v57  ;;  %3189 = vmatpush1.bf16.msra.mxu1 %v8559_v58  ;;  %v165_v57 = vld [vmem:[#allocation2 + $0x1b0] sm:$0xff]  ;;  %v162_v58 = vld [vmem:[#allocation2 + $0x198] sm:$0xff] }
 0x147   :  { %3018 = vmatprep.subr.bf16.mxu0 %v8566_v59  ;;  %3190 = vmatprep.subr.bf16.mxu1 %v8568_v60  ;;  %v166_v59 = vld [vmem:[#allocation2 + $0x1b8] sm:$0xff]  ;;  %v8177_v60 = vcombine.low %v153_v48, %v157_v49  ;;  %v8186_v62 = vcombine.high %v161_v56, %v165_v57  ;;  %v217_v49 = vld [vmem:[#allocation2 + $0x350] sm:$0xff] }
 0x148   :  { %v8188_v63 = vcombine.high %v162_v58, %v166_v59  ;;  %v8187_v5 = vcombine.low %v162_v58, %v166_v59  ;;  %v229_v58 = vld [vmem:[#allocation2 + $0x3b0] sm:$0xff]  ;;  %v226_v59 = vld [vmem:[#allocation2 + $0x398] sm:$0xff] }
 0x14a   :  { %3019 = vmatpush1.bf16.msra.mxu0 %v8565_v1  ;;  %3191 = vmatpush1.bf16.msra.mxu1 %v8567_v2  ;;  %v173_v1 = vld [vmem:[#allocation2 + $0x1f0] sm:$0xff]  ;;  %v170_v2 = vld [vmem:[#allocation2 + $0x1d8] sm:$0xff] }
 0x14b   :  { %3020 = vmatprep.subr.bf16.mxu0 %v8574_v3  ;;  %3192 = vmatprep.subr.bf16.mxu1 %v8576_v4  ;;  %v174_v3 = vld [vmem:[#allocation2 + $0x1f8] sm:$0xff]  ;;  %v8185_v4 = vcombine.low %v161_v56, %v165_v57  ;;  %v8194_v6 = vcombine.high %v169_v0, %v173_v1  ;;  %v225_v57 = vld [vmem:[#allocation2 + $0x390] sm:$0xff] }
 0x14c   :  { %v8196_v7 = vcombine.high %v170_v2, %v174_v3  ;;  %v8195_v13 = vcombine.low %v170_v2, %v174_v3  ;;  %v237_v2 = vld [vmem:[#allocation2 + $0x3f0] sm:$0xff]  ;;  %v234_v3 = vld [vmem:[#allocation2 + $0x3d8] sm:$0xff] }
 0x14e   :  { %3021 = vmatpush1.bf16.msra.mxu0 %v8573_v9  ;;  %3193 = vmatpush1.bf16.msra.mxu1 %v8575_v10  ;;  %v181_v9 = vld [vmem:[#allocation2 + $0x230] sm:$0xff]  ;;  %v178_v10 = vld [vmem:[#allocation2 + $0x218] sm:$0xff] }
 0x14f   :  { %3221 = vmatprep.subr.bf16.mxu0 %v8138_v11  ;;  %3393 = vmatprep.subr.bf16.mxu1 %v8140_v12  ;;  %v182_v11 = vld [vmem:[#allocation2 + $0x238] sm:$0xff]  ;;  %v8193_v12 = vcombine.low %v169_v0, %v173_v1  ;;  %v8202_v14 = vcombine.high %v177_v8, %v181_v9  ;;  %v233_v1 = vld [vmem:[#allocation2 + $0x3d0] sm:$0xff] }
 0x151   :  { %3039 = vmatmul.mubr.bf16.vlgmr.msra.gmra.mrb[0].mxu0 %v9394_v15  ;;  %3211 = vmatmul.mubr.bf16.vlgmr.msra.gmra.mrb[0].mxu1 %v9394_v15  ;;  %v8204_v15 = vcombine.high %v178_v10, %v182_v11 }
 0x152   :  { %3222 = vmatpush1.bf16.msra.mxu0 %v8137_v18  ;;  %3394 = vmatpush1.bf16.msra.mxu1 %v8139_v19  ;;  %v186_v18 = vld [vmem:[#allocation2 + $0x258] sm:$0xff] }
 0x153   :  { %3223 = vmatprep.subr.bf16.mxu0 %v8146_v20  ;;  %3395 = vmatprep.subr.bf16.mxu1 %v8148_v21  ;;  %v190_v19 = vld [vmem:[#allocation2 + $0x278] sm:$0xff]  ;;  %v8201_v20 = vcombine.low %v177_v8, %v181_v9  ;;  %v8203_v21 = vcombine.low %v178_v10, %v182_v11  ;;  %v241_v9 = vld [vmem:[#allocation2 + $0x410] sm:$0xff] }
 0x154   :  { %3253 = vmatprep.mubr.bf16.mxu0 %v9467_v33  ;;  %3425 = vmatprep.mubr.bf16.mxu1 %v9467_v33  ;;  %v8212_v23 = vcombine.high %v186_v18, %v190_v19  ;;  %v201_v33 = vld [vmem:[#allocation2 + $0x2d0] sm:$0xff]  ;;  %v242_v11 = vld [vmem:[#allocation2 + $0x418] sm:$0xff] }
 0x155   :  { %v245_v10 = vld [vmem:[#allocation2 + $0x430] sm:$0xff] }
 0x156   :  { %3224 = vmatpush1.bf16.msra.mxu0 %v8145_v26  ;;  %3396 = vmatpush1.bf16.msra.mxu1 %v8147_v27  ;;  %v194_v26 = vld [vmem:[#allocation2 + $0x298] sm:$0xff] }
 0x157   :  { %3225 = vmatprep.subr.bf16.mxu0 %v8154_v28  ;;  %3397 = vmatprep.subr.bf16.mxu1 %v8156_v29  ;;  %v198_v27 = vld [vmem:[#allocation2 + $0x2b8] sm:$0xff]  ;;  %v8209_v28 = vcombine.low %v185_v16, %v189_v17  ;;  %v8211_v29 = vcombine.low %v186_v18, %v190_v19  ;;  %v249_v17 = vld [vmem:[#allocation2 + $0x450] sm:$0xff] }
 0x158   :  { %v8220_v32 = vcombine.high %v194_v26, %v198_v27  ;;  %v253_v18 = vld [vmem:[#allocation2 + $0x470] sm:$0xff]  ;;  %v250_v19 = vld [vmem:[#allocation2 + $0x458] sm:$0xff] }
 0x15a   :  { %3226 = vmatpush1.bf16.msra.mxu0 %v8153_v36  ;;  %3398 = vmatpush1.bf16.msra.mxu1 %v8155_v37  ;;  %v206_v36 = vld [vmem:[#allocation2 + $0x2f8] sm:$0xff]  ;;  %v8217_v37 = vcombine.low %v193_v24, %v197_v25  ;;  %v257_v25 = vld [vmem:[#allocation2 + $0x490] sm:$0xff] }
 0x15b   :  { %3227 = vmatprep.subr.bf16.mxu0 %v8162_v38  ;;  %3399 = vmatprep.subr.bf16.mxu1 %v8164_v39  ;;  %v8219_v38 = vcombine.low %v194_v26, %v198_v27  ;;  %v8226_v39 = vcombine.high %v201_v33, %v205_v34  ;;  %v8228_v40 = vcombine.high %v202_v35, %v206_v36  ;;  %v261_v26 = vld [vmem:[#allocation2 + $0x4b0] sm:$0xff]  ;;  %v9468_v27 = vld [vmem:[%s9918_s0] ss:$28 sps:$4 sm:$0xff]  }
 0x15e   :  { %3228 = vmatpush1.bf16.msra.mxu0 %v8161_v44  ;;  %3400 = vmatpush1.bf16.msra.mxu1 %v8163_v45  ;;  %v214_v44 = vld [vmem:[#allocation2 + $0x338] sm:$0xff]  ;;  %v8225_v45 = vcombine.low %v201_v33, %v205_v34  ;;  %v8282_v33 = vcombine.high %v257_v25, %v261_v26 }
 0x15f   :  { %3229 = vmatprep.subr.bf16.mxu0 %v8170_v46  ;;  %3401 = vmatprep.subr.bf16.mxu1 %v8172_v47  ;;  %v8227_v46 = vcombine.low %v202_v35, %v206_v36  ;;  %v8234_v47 = vcombine.high %v209_v41, %v213_v42  ;;  %v8236_v48 = vcombine.high %v210_v43, %v214_v44  ;;  %v265_v35 = vld [vmem:[#allocation2 + $0x4d0] sm:$0xff] }
 0x160   :  { %v269_v36 = vld [vmem:[#allocation2 + $0x4f0] sm:$0xff] }
 0x162   :  { %3230 = vmatpush1.bf16.msra.mxu0 %v8169_v52  ;;  %3402 = vmatpush1.bf16.msra.mxu1 %v8171_v53  ;;  %v222_v52 = vld [vmem:[#allocation2 + $0x378] sm:$0xff]  ;;  %v8233_v53 = vcombine.low %v209_v41, %v213_v42  ;;  %v8290_v42 = vcombine.high %v265_v35, %v269_v36 }
 0x163   :  { %3231 = vmatprep.subr.bf16.mxu0 %v8178_v54  ;;  %3403 = vmatprep.subr.bf16.mxu1 %v8180_v55  ;;  %v8235_v54 = vcombine.low %v210_v43, %v214_v44  ;;  %v8242_v55 = vcombine.high %v217_v49, %v221_v50  ;;  %v8244_v56 = vcombine.high %v218_v51, %v222_v52  ;;  %v273_v44 = vld [vmem:[#allocation2 + $0x510] sm:$0xff] }
 0x166   :  { %3232 = vmatpush1.bf16.msra.mxu0 %v8177_v60  ;;  %3404 = vmatpush1.bf16.msra.mxu1 %v8179_v61  ;;  %v230_v60 = vld [vmem:[#allocation2 + $0x3b8] sm:$0xff]  ;;  %v8241_v61 = vcombine.low %v217_v49, %v221_v50 }
 0x167   :  { %3233 = vmatprep.subr.bf16.mxu0 %v8186_v62  ;;  %3405 = vmatprep.subr.bf16.mxu1 %v8188_v63  ;;  %v8243_v62 = vcombine.low %v218_v51, %v222_v52  ;;  %v8250_v63 = vcombine.high %v225_v57, %v229_v58  ;;  %v8252_v0 = vcombine.high %v226_v59, %v230_v60  ;;  %v281_v52 = vld [vmem:[#allocation2 + $0x550] sm:$0xff] }
 0x16a   :  { %3234 = vmatpush1.bf16.msra.mxu0 %v8185_v4  ;;  %3406 = vmatpush1.bf16.msra.mxu1 %v8187_v5  ;;  %v238_v4 = vld [vmem:[#allocation2 + $0x3f8] sm:$0xff]  ;;  %v8249_v5 = vcombine.low %v225_v57, %v229_v58 }
 0x16b   :  { %3235 = vmatprep.subr.bf16.mxu0 %v8194_v6  ;;  %3407 = vmatprep.subr.bf16.mxu1 %v8196_v7  ;;  %v8251_v6 = vcombine.low %v226_v59, %v230_v60  ;;  %v8258_v7 = vcombine.high %v233_v1, %v237_v2  ;;  %v8260_v8 = vcombine.high %v234_v3, %v238_v4  ;;  %v289_v60 = vld [vmem:[#allocation2 + $0x590] sm:$0xff] }
 0x16e   :  { %3236 = vmatpush1.bf16.msra.mxu0 %v8193_v12  ;;  %3408 = vmatpush1.bf16.msra.mxu1 %v8195_v13  ;;  %v246_v12 = vld [vmem:[#allocation2 + $0x438] sm:$0xff]  ;;  %v8257_v13 = vcombine.low %v233_v1, %v237_v2 }
 0x16f   :  { %3237 = vmatprep.subr.bf16.mxu0 %v8202_v14  ;;  %3409 = vmatprep.subr.bf16.mxu1 %v8204_v15  ;;  %v8259_v14 = vcombine.low %v234_v3, %v238_v4  ;;  %v8266_v15 = vcombine.high %v241_v9, %v245_v10  ;;  %v8268_v16 = vcombine.high %v242_v11, %v246_v12  ;;  %v297_v4 = vld [vmem:[#allocation2 + $0x5d0] sm:$0xff] }
 0x172   :  { %3238 = vmatpush1.bf16.msra.mxu0 %v8201_v20  ;;  %3410 = vmatpush1.bf16.msra.mxu1 %v8203_v21  ;;  %v254_v20 = vld [vmem:[#allocation2 + $0x478] sm:$0xff]  ;;  %v8265_v21 = vcombine.low %v241_v9, %v245_v10 }
 0x173   :  { %3239 = vmatprep.subr.bf16.mxu0 %v8210_v22  ;;  %3411 = vmatprep.subr.bf16.mxu1 %v8212_v23  ;;  %v8267_v22 = vcombine.low %v242_v11, %v246_v12  ;;  %v8274_v23 = vcombine.high %v249_v17, %v253_v18  ;;  %v8276_v24 = vcombine.high %v250_v19, %v254_v20  ;;  %v305_v12 = vld [vmem:[#allocation2 + $0x610] sm:$0xff] }
 0x176   :  { %3240 = vmatpush1.bf16.msra.mxu0 %v8209_v28  ;;  %3412 = vmatpush1.bf16.msra.mxu1 %v8211_v29  ;;  %v258_v28 = vld [vmem:[#allocation2 + $0x498] sm:$0xff] }
 0x177   :  { %3241 = vmatprep.subr.bf16.mxu0 %v8218_v31  ;;  %3413 = vmatprep.subr.bf16.mxu1 %v8220_v32  ;;  %v262_v29 = vld [vmem:[#allocation2 + $0x4b8] sm:$0xff]  ;;  %v8273_v31 = vcombine.low %v249_v17, %v253_v18  ;;  %v8275_v32 = vcombine.low %v250_v19, %v254_v20  ;;  %v313_v20 = vld [vmem:[#allocation2 + $0x650] sm:$0xff] }
 0x178   :  { %v8284_v34 = vcombine.high %v258_v28, %v262_v29  ;;  %v8283_v41 = vcombine.low %v258_v28, %v262_v29  ;;  %v321_v28 = vld [vmem:[#allocation2 + $0x690] sm:$0xff] }
 0x179   :  { %v325_v29 = vld [vmem:[#allocation2 + $0x6b0] sm:$0xff] }
 0x17a   :  { %3242 = vmatpush1.bf16.msra.mxu0 %v8217_v37  ;;  %3414 = vmatpush1.bf16.msra.mxu1 %v8219_v38  ;;  %v9469_v37 = vld [vmem:[%s9918_s0 + $0xc] ss:$28 sps:$4 sm:$0xff]   ;;  %v266_v38 = vld [vmem:[#allocation2 + $0x4d8] sm:$0xff] }
 0x17b   :  { %3243 = vmatprep.subr.bf16.mxu0 %v8226_v39  ;;  %3415 = vmatprep.subr.bf16.mxu1 %v8228_v40  ;;  %v270_v39 = vld [vmem:[#allocation2 + $0x4f8] sm:$0xff]  ;;  %v8281_v40 = vcombine.low %v257_v25, %v261_v26 }
 0x17c   :  { %v8292_v43 = vcombine.high %v266_v38, %v270_v39  ;;  %v8291_v49 = vcombine.low %v266_v38, %v270_v39  ;;  %v333_v38 = vld [vmem:[#allocation2 + $0x6f0] sm:$0xff]  ;;  %v330_v39 = vld [vmem:[#allocation2 + $0x6d8] sm:$0xff] }
 0x17e   :  { %3244 = vmatpush1.bf16.msra.mxu0 %v8225_v45  ;;  %3416 = vmatpush1.bf16.msra.mxu1 %v8227_v46  ;;  %v277_v45 = vld [vmem:[#allocation2 + $0x530] sm:$0xff]  ;;  %v274_v46 = vld [vmem:[#allocation2 + $0x518] sm:$0xff] }
 0x17f   :  { %3245 = vmatprep.subr.bf16.mxu0 %v8234_v47  ;;  %3417 = vmatprep.subr.bf16.mxu1 %v8236_v48  ;;  %v278_v47 = vld [vmem:[#allocation2 + $0x538] sm:$0xff]  ;;  %v8289_v48 = vcombine.low %v265_v35, %v269_v36  ;;  %v8298_v50 = vcombine.high %v273_v44, %v277_v45  ;;  %v8346_v35 = vcombine.high %v321_v28, %v325_v29 }
 0x180   :  { %v8300_v51 = vcombine.high %v274_v46, %v278_v47  ;;  %v8299_v57 = vcombine.low %v274_v46, %v278_v47  ;;  %v341_v46 = vld [vmem:[#allocation2 + $0x730] sm:$0xff]  ;;  %v338_v47 = vld [vmem:[#allocation2 + $0x718] sm:$0xff] }
 0x182   :  { %3246 = vmatpush1.bf16.msra.mxu0 %v8233_v53  ;;  %3418 = vmatpush1.bf16.msra.mxu1 %v8235_v54  ;;  %v285_v53 = vld [vmem:[#allocation2 + $0x570] sm:$0xff]  ;;  %v282_v54 = vld [vmem:[#allocation2 + $0x558] sm:$0xff] }
 0x183   :  { %3247 = vmatprep.subr.bf16.mxu0 %v8242_v55  ;;  %3419 = vmatprep.subr.bf16.mxu1 %v8244_v56  ;;  %v286_v55 = vld [vmem:[#allocation2 + $0x578] sm:$0xff]  ;;  %v8297_v56 = vcombine.low %v273_v44, %v277_v45  ;;  %v8306_v58 = vcombine.high %v281_v52, %v285_v53  ;;  %v337_v45 = vld [vmem:[#allocation2 + $0x710] sm:$0xff] }
 0x184   :  { %v8308_v59 = vcombine.high %v282_v54, %v286_v55  ;;  %v8307_v1 = vcombine.low %v282_v54, %v286_v55  ;;  %v349_v54 = vld [vmem:[#allocation2 + $0x770] sm:$0xff]  ;;  %v346_v55 = vld [vmem:[#allocation2 + $0x758] sm:$0xff] }
 0x186   :  { %3248 = vmatpush1.bf16.msra.mxu0 %v8241_v61  ;;  %3420 = vmatpush1.bf16.msra.mxu1 %v8243_v62  ;;  %v293_v61 = vld [vmem:[#allocation2 + $0x5b0] sm:$0xff]  ;;  %v290_v62 = vld [vmem:[#allocation2 + $0x598] sm:$0xff] }
 0x187   :  { %3249 = vmatprep.subr.bf16.mxu0 %v8250_v63  ;;  %3421 = vmatprep.subr.bf16.mxu1 %v8252_v0  ;;  %v294_v63 = vld [vmem:[#allocation2 + $0x5b8] sm:$0xff]  ;;  %v8305_v0 = vcombine.low %v281_v52, %v285_v53  ;;  %v8314_v2 = vcombine.high %v289_v60, %v293_v61  ;;  %v345_v53 = vld [vmem:[#allocation2 + $0x750] sm:$0xff] }
 0x188   :  { %v8316_v3 = vcombine.high %v290_v62, %v294_v63  ;;  %v8315_v9 = vcombine.low %v290_v62, %v294_v63  ;;  %v357_v62 = vld [vmem:[#allocation2 + $0x7b0] sm:$0xff]  ;;  %v354_v63 = vld [vmem:[#allocation2 + $0x798] sm:$0xff] }
 0x18a   :  { %3250 = vmatpush1.bf16.msra.mxu0 %v8249_v5  ;;  %3422 = vmatpush1.bf16.msra.mxu1 %v8251_v6  ;;  %v301_v5 = vld [vmem:[#allocation2 + $0x5f0] sm:$0xff]  ;;  %v298_v6 = vld [vmem:[#allocation2 + $0x5d8] sm:$0xff] }
 0x18b   :  { %3251 = vmatprep.subr.bf16.mxu0 %v8258_v7  ;;  %3423 = vmatprep.subr.bf16.mxu1 %v8260_v8  ;;  %v302_v7 = vld [vmem:[#allocation2 + $0x5f8] sm:$0xff]  ;;  %v8313_v8 = vcombine.low %v289_v60, %v293_v61  ;;  %v8322_v10 = vcombine.high %v297_v4, %v301_v5  ;;  %v353_v61 = vld [vmem:[#allocation2 + $0x790] sm:$0xff] }
 0x18c   :  { %v8324_v11 = vcombine.high %v298_v6, %v302_v7  ;;  %v8323_v17 = vcombine.low %v298_v6, %v302_v7  ;;  %v365_v6 = vld [vmem:[#allocation2 + $0x7f0] sm:$0xff]  ;;  %v362_v7 = vld [vmem:[#allocation2 + $0x7d8] sm:$0xff] }
 0x18e   :  { %3252 = vmatpush1.bf16.msra.mxu0 %v8257_v13  ;;  %3424 = vmatpush1.bf16.msra.mxu1 %v8259_v14  ;;  %v309_v13 = vld [vmem:[#allocation2 + $0x630] sm:$0xff]  ;;  %v306_v14 = vld [vmem:[#allocation2 + $0x618] sm:$0xff] }
 0x18f   :  { %3264 = vmatprep.subr.bf16.mxu0 %v8266_v15  ;;  %3436 = vmatprep.subr.bf16.mxu1 %v8268_v16  ;;  %v310_v15 = vld [vmem:[#allocation2 + $0x638] sm:$0xff]  ;;  %v8321_v16 = vcombine.low %v297_v4, %v301_v5  ;;  %v8330_v18 = vcombine.high %v305_v12, %v309_v13  ;;  %v361_v5 = vld [vmem:[#allocation2 + $0x7d0] sm:$0xff] }
 0x190   :  { %v8332_v19 = vcombine.high %v306_v14, %v310_v15  ;;  %v8331_v25 = vcombine.low %v306_v14, %v310_v15  ;;  %v373_v14 = vld [vmem:[#allocation2 + $0x830] sm:$0xff]  ;;  %v370_v15 = vld [vmem:[#allocation2 + $0x818] sm:$0xff] }
 0x191   :  { %3254 = vmatmul.mubr.bf16.vlgmr.msra.gmra.mrb[4].mxu0 %v9468_v27  ;;  %3426 = vmatmul.mubr.bf16.vlgmr.msra.gmra.mrb[4].mxu1 %v9468_v27 }
 0x192   :  { %3265 = vmatpush1.bf16.msra.mxu0 %v8265_v21  ;;  %3437 = vmatpush1.bf16.msra.mxu1 %v8267_v22  ;;  %v317_v21 = vld [vmem:[#allocation2 + $0x670] sm:$0xff]  ;;  %v314_v22 = vld [vmem:[#allocation2 + $0x658] sm:$0xff] }
 0x193   :  { %3266 = vmatprep.subr.bf16.mxu0 %v8274_v23  ;;  %3438 = vmatprep.subr.bf16.mxu1 %v8276_v24  ;;  %v318_v23 = vld [vmem:[#allocation2 + $0x678] sm:$0xff]  ;;  %v8329_v24 = vcombine.low %v305_v12, %v309_v13  ;;  %v8338_v26 = vcombine.high %v313_v20, %v317_v21  ;;  %v369_v13 = vld [vmem:[#allocation2 + $0x810] sm:$0xff] }
 0x194   :  { %3296 = vmatprep.mubr.bf16.mxu0 %v9469_v37  ;;  %3468 = vmatprep.mubr.bf16.mxu1 %v9469_v37  ;;  %v8340_v27 = vcombine.high %v314_v22, %v318_v23  ;;  %v329_v37 = vld [vmem:[#allocation2 + $0x6d0] sm:$0xff] }
 0x196   :  { %3267 = vmatpush1.bf16.msra.mxu0 %v8273_v31  ;;  %3439 = vmatpush1.bf16.msra.mxu1 %v8275_v32  ;;  %v322_v31 = vld [vmem:[#allocation2 + $0x698] sm:$0xff] }
 0x197   :  { %3268 = vmatprep.subr.bf16.mxu0 %v8282_v33  ;;  %3440 = vmatprep.subr.bf16.mxu1 %v8284_v34  ;;  %v326_v32 = vld [vmem:[#allocation2 + $0x6b8] sm:$0xff]  ;;  %v8337_v33 = vcombine.low %v313_v20, %v317_v21  ;;  %v8339_v34 = vcombine.low %v314_v22, %v318_v23  ;;  %v377_v21 = vld [vmem:[#allocation2 + $0x850] sm:$0xff] }
 0x198   :  { %v8348_v36 = vcombine.high %v322_v31, %v326_v32  ;;  %v381_v22 = vld [vmem:[#allocation2 + $0x870] sm:$0xff]  ;;  %v378_v23 = vld [vmem:[#allocation2 + $0x858] sm:$0xff] }
 0x19a   :  { %3269 = vmatpush1.bf16.msra.mxu0 %v8281_v40  ;;  %3441 = vmatpush1.bf16.msra.mxu1 %v8283_v41  ;;  %v334_v40 = vld [vmem:[#allocation2 + $0x6f8] sm:$0xff]  ;;  %v8345_v41 = vcombine.low %v321_v28, %v325_v29  ;;  %v385_v29 = vld [vmem:[#allocation2 + $0x890] sm:$0xff] }
 0x19b   :  { %3270 = vmatprep.subr.bf16.mxu0 %v8290_v42  ;;  %3442 = vmatprep.subr.bf16.mxu1 %v8292_v43  ;;  %v8347_v42 = vcombine.low %v322_v31, %v326_v32  ;;  %v8354_v43 = vcombine.high %v329_v37, %v333_v38  ;;  %v8356_v44 = vcombine.high %v330_v39, %v334_v40  ;;  %v389_v31 = vld [vmem:[#allocation2 + $0x8b0] sm:$0xff]  ;;  %v9470_v32 = vld [vmem:[%s9918_s0 + $0x8] ss:$28 sps:$4 sm:$0xff]  }
 0x19e   :  { %3271 = vmatpush1.bf16.msra.mxu0 %v8289_v48  ;;  %3443 = vmatpush1.bf16.msra.mxu1 %v8291_v49  ;;  %v342_v48 = vld [vmem:[#allocation2 + $0x738] sm:$0xff]  ;;  %v8353_v49 = vcombine.low %v329_v37, %v333_v38  ;;  %v8410_v37 = vcombine.high %v385_v29, %v389_v31 }
 0x19f   :  { %3272 = vmatprep.subr.bf16.mxu0 %v8298_v50  ;;  %3444 = vmatprep.subr.bf16.mxu1 %v8300_v51  ;;  %v8355_v50 = vcombine.low %v330_v39, %v334_v40  ;;  %v8362_v51 = vcombine.high %v337_v45, %v341_v46  ;;  %v8364_v52 = vcombine.high %v338_v47, %v342_v48  ;;  %v393_v39 = vld [vmem:[#allocation2 + $0x8d0] sm:$0xff] }
 0x1a0   :  { %v397_v40 = vld [vmem:[#allocation2 + $0x8f0] sm:$0xff] }
 0x1a2   :  { %3273 = vmatpush1.bf16.msra.mxu0 %v8297_v56  ;;  %3445 = vmatpush1.bf16.msra.mxu1 %v8299_v57  ;;  %v350_v56 = vld [vmem:[#allocation2 + $0x778] sm:$0xff]  ;;  %v8361_v57 = vcombine.low %v337_v45, %v341_v46  ;;  %v8418_v46 = vcombine.high %v393_v39, %v397_v40 }
 0x1a3   :  { %3274 = vmatprep.subr.bf16.mxu0 %v8306_v58  ;;  %3446 = vmatprep.subr.bf16.mxu1 %v8308_v59  ;;  %v8363_v58 = vcombine.low %v338_v47, %v342_v48  ;;  %v8370_v59 = vcombine.high %v345_v53, %v349_v54  ;;  %v8372_v60 = vcombine.high %v346_v55, %v350_v56  ;;  %v401_v48 = vld [vmem:[#allocation2 + $0x910] sm:$0xff] }
 0x1a6   :  { %3275 = vmatpush1.bf16.msra.mxu0 %v8305_v0  ;;  %3447 = vmatpush1.bf16.msra.mxu1 %v8307_v1  ;;  %v358_v0 = vld [vmem:[#allocation2 + $0x7b8] sm:$0xff]  ;;  %v8369_v1 = vcombine.low %v345_v53, %v349_v54 }
 0x1a7   :  { %3276 = vmatprep.subr.bf16.mxu0 %v8314_v2  ;;  %3448 = vmatprep.subr.bf16.mxu1 %v8316_v3  ;;  %v8371_v2 = vcombine.low %v346_v55, %v350_v56  ;;  %v8378_v3 = vcombine.high %v353_v61, %v357_v62  ;;  %v8380_v4 = vcombine.high %v354_v63, %v358_v0  ;;  %v409_v56 = vld [vmem:[#allocation2 + $0x950] sm:$0xff] }
 0x1aa   :  { %3277 = vmatpush1.bf16.msra.mxu0 %v8313_v8  ;;  %3449 = vmatpush1.bf16.msra.mxu1 %v8315_v9  ;;  %v366_v8 = vld [vmem:[#allocation2 + $0x7f8] sm:$0xff]  ;;  %v8377_v9 = vcombine.low %v353_v61, %v357_v62 }
 0x1ab   :  { %3278 = vmatprep.subr.bf16.mxu0 %v8322_v10  ;;  %3450 = vmatprep.subr.bf16.mxu1 %v8324_v11  ;;  %v8379_v10 = vcombine.low %v354_v63, %v358_v0  ;;  %v8386_v11 = vcombine.high %v361_v5, %v365_v6  ;;  %v8388_v12 = vcombine.high %v362_v7, %v366_v8  ;;  %v417_v0 = vld [vmem:[#allocation2 + $0x990] sm:$0xff] }
 0x1ae   :  { %3279 = vmatpush1.bf16.msra.mxu0 %v8321_v16  ;;  %3451 = vmatpush1.bf16.msra.mxu1 %v8323_v17  ;;  %v374_v16 = vld [vmem:[#allocation2 + $0x838] sm:$0xff]  ;;  %v8385_v17 = vcombine.low %v361_v5, %v365_v6 }
 0x1af   :  { %3280 = vmatprep.subr.bf16.mxu0 %v8330_v18  ;;  %3452 = vmatprep.subr.bf16.mxu1 %v8332_v19  ;;  %v8387_v18 = vcombine.low %v362_v7, %v366_v8  ;;  %v8394_v19 = vcombine.high %v369_v13, %v373_v14  ;;  %v8396_v20 = vcombine.high %v370_v15, %v374_v16  ;;  %v425_v8 = vld [vmem:[#allocation2 + $0x9d0] sm:$0xff] }
 0x1b2   :  { %3281 = vmatpush1.bf16.msra.mxu0 %v8329_v24  ;;  %3453 = vmatpush1.bf16.msra.mxu1 %v8331_v25  ;;  %v382_v24 = vld [vmem:[#allocation2 + $0x878] sm:$0xff]  ;;  %v8393_v25 = vcombine.low %v369_v13, %v373_v14 }
 0x1b3   :  { %3282 = vmatprep.subr.bf16.mxu0 %v8338_v26  ;;  %3454 = vmatprep.subr.bf16.mxu1 %v8340_v27  ;;  %v8395_v26 = vcombine.low %v370_v15, %v374_v16  ;;  %v8402_v27 = vcombine.high %v377_v21, %v381_v22  ;;  %v8404_v28 = vcombine.high %v378_v23, %v382_v24  ;;  %v433_v16 = vld [vmem:[#allocation2 + $0xa10] sm:$0xff] }
 0x1b6   :  { %3283 = vmatpush1.bf16.msra.mxu0 %v8337_v33  ;;  %3455 = vmatpush1.bf16.msra.mxu1 %v8339_v34  ;;  %v386_v33 = vld [vmem:[#allocation2 + $0x898] sm:$0xff] }
 0x1b7   :  { %3284 = vmatprep.subr.bf16.mxu0 %v8346_v35  ;;  %3456 = vmatprep.subr.bf16.mxu1 %v8348_v36  ;;  %v390_v34 = vld [vmem:[#allocation2 + $0x8b8] sm:$0xff]  ;;  %v8401_v35 = vcombine.low %v377_v21, %v381_v22  ;;  %v8403_v36 = vcombine.low %v378_v23, %v382_v24  ;;  %v441_v24 = vld [vmem:[#allocation2 + $0xa50] sm:$0xff] }
 0x1b8   :  { %v8412_v38 = vcombine.high %v386_v33, %v390_v34  ;;  %v8411_v45 = vcombine.low %v386_v33, %v390_v34  ;;  %v449_v33 = vld [vmem:[#allocation2 + $0xa90] sm:$0xff] }
 0x1b9   :  { %v453_v34 = vld [vmem:[#allocation2 + $0xab0] sm:$0xff] }
 0x1ba   :  { %3285 = vmatpush1.bf16.msra.mxu0 %v8345_v41  ;;  %3457 = vmatpush1.bf16.msra.mxu1 %v8347_v42  ;;  %v9471_v41 = vld [vmem:[%s9918_s0 + $0x14] ss:$28 sps:$4 sm:$0xff]   ;;  %v394_v42 = vld [vmem:[#allocation2 + $0x8d8] sm:$0xff] }
 0x1bb   :  { %3286 = vmatprep.subr.bf16.mxu0 %v8354_v43  ;;  %3458 = vmatprep.subr.bf16.mxu1 %v8356_v44  ;;  %v398_v43 = vld [vmem:[#allocation2 + $0x8f8] sm:$0xff]  ;;  %v8409_v44 = vcombine.low %v385_v29, %v389_v31 }
 0x1bc   :  { %v8420_v47 = vcombine.high %v394_v42, %v398_v43  ;;  %v8419_v53 = vcombine.low %v394_v42, %v398_v43  ;;  %v461_v42 = vld [vmem:[#allocation2 + $0xaf0] sm:$0xff]  ;;  %v458_v43 = vld [vmem:[#allocation2 + $0xad8] sm:$0xff] }
 0x1be   :  { %3287 = vmatpush1.bf16.msra.mxu0 %v8353_v49  ;;  %3459 = vmatpush1.bf16.msra.mxu1 %v8355_v50  ;;  %v405_v49 = vld [vmem:[#allocation2 + $0x930] sm:$0xff]  ;;  %v402_v50 = vld [vmem:[#allocation2 + $0x918] sm:$0xff] }
 0x1bf   :  { %3288 = vmatprep.subr.bf16.mxu0 %v8362_v51  ;;  %3460 = vmatprep.subr.bf16.mxu1 %v8364_v52  ;;  %v406_v51 = vld [vmem:[#allocation2 + $0x938] sm:$0xff]  ;;  %v8417_v52 = vcombine.low %v393_v39, %v397_v40  ;;  %v8426_v54 = vcombine.high %v401_v48, %v405_v49  ;;  %v8474_v39 = vcombine.high %v449_v33, %v453_v34 }
 0x1c0   :  { %v8428_v55 = vcombine.high %v402_v50, %v406_v51  ;;  %v8427_v61 = vcombine.low %v402_v50, %v406_v51  ;;  %v469_v50 = vld [vmem:[#allocation2 + $0xb30] sm:$0xff]  ;;  %v466_v51 = vld [vmem:[#allocation2 + $0xb18] sm:$0xff] }
 0x1c2   :  { %3289 = vmatpush1.bf16.msra.mxu0 %v8361_v57  ;;  %3461 = vmatpush1.bf16.msra.mxu1 %v8363_v58  ;;  %v413_v57 = vld [vmem:[#allocation2 + $0x970] sm:$0xff]  ;;  %v410_v58 = vld [vmem:[#allocation2 + $0x958] sm:$0xff] }
 0x1c3   :  { %3290 = vmatprep.subr.bf16.mxu0 %v8370_v59  ;;  %3462 = vmatprep.subr.bf16.mxu1 %v8372_v60  ;;  %v414_v59 = vld [vmem:[#allocation2 + $0x978] sm:$0xff]  ;;  %v8425_v60 = vcombine.low %v401_v48, %v405_v49  ;;  %v8434_v62 = vcombine.high %v409_v56, %v413_v57  ;;  %v465_v49 = vld [vmem:[#allocation2 + $0xb10] sm:$0xff] }
 0x1c4   :  { %v8436_v63 = vcombine.high %v410_v58, %v414_v59  ;;  %v8435_v5 = vcombine.low %v410_v58, %v414_v59  ;;  %v477_v58 = vld [vmem:[#allocation2 + $0xb70] sm:$0xff]  ;;  %v474_v59 = vld [vmem:[#allocation2 + $0xb58] sm:$0xff] }
 0x1c6   :  { %3291 = vmatpush1.bf16.msra.mxu0 %v8369_v1  ;;  %3463 = vmatpush1.bf16.msra.mxu1 %v8371_v2  ;;  %v421_v1 = vld [vmem:[#allocation2 + $0x9b0] sm:$0xff]  ;;  %v418_v2 = vld [vmem:[#allocation2 + $0x998] sm:$0xff] }
 0x1c7   :  { %3292 = vmatprep.subr.bf16.mxu0 %v8378_v3  ;;  %3464 = vmatprep.subr.bf16.mxu1 %v8380_v4  ;;  %v422_v3 = vld [vmem:[#allocation2 + $0x9b8] sm:$0xff]  ;;  %v8433_v4 = vcombine.low %v409_v56, %v413_v57  ;;  %v8442_v6 = vcombine.high %v417_v0, %v421_v1  ;;  %v473_v57 = vld [vmem:[#allocation2 + $0xb50] sm:$0xff] }
 0x1c8   :  { %v8444_v7 = vcombine.high %v418_v2, %v422_v3  ;;  %v8443_v13 = vcombine.low %v418_v2, %v422_v3  ;;  %v485_v2 = vld [vmem:[#allocation2 + $0xbb0] sm:$0xff]  ;;  %v482_v3 = vld [vmem:[#allocation2 + $0xb98] sm:$0xff] }
 0x1ca   :  { %3293 = vmatpush1.bf16.msra.mxu0 %v8377_v9  ;;  %3465 = vmatpush1.bf16.msra.mxu1 %v8379_v10  ;;  %v429_v9 = vld [vmem:[#allocation2 + $0x9f0] sm:$0xff]  ;;  %v426_v10 = vld [vmem:[#allocation2 + $0x9d8] sm:$0xff] }
 0x1cb   :  { %3294 = vmatprep.subr.bf16.mxu0 %v8386_v11  ;;  %3466 = vmatprep.subr.bf16.mxu1 %v8388_v12  ;;  %v430_v11 = vld [vmem:[#allocation2 + $0x9f8] sm:$0xff]  ;;  %v8441_v12 = vcombine.low %v417_v0, %v421_v1  ;;  %v8450_v14 = vcombine.high %v425_v8, %v429_v9  ;;  %v481_v1 = vld [vmem:[#allocation2 + $0xb90] sm:$0xff] }
 0x1cc   :  { %v8452_v15 = vcombine.high %v426_v10, %v430_v11  ;;  %v8451_v21 = vcombine.low %v426_v10, %v430_v11  ;;  %v493_v10 = vld [vmem:[#allocation2 + $0xbf0] sm:$0xff]  ;;  %v490_v11 = vld [vmem:[#allocation2 + $0xbd8] sm:$0xff] }
 0x1ce   :  { %3295 = vmatpush1.bf16.msra.mxu0 %v8385_v17  ;;  %3467 = vmatpush1.bf16.msra.mxu1 %v8387_v18  ;;  %v437_v17 = vld [vmem:[#allocation2 + $0xa30] sm:$0xff]  ;;  %v434_v18 = vld [vmem:[#allocation2 + $0xa18] sm:$0xff] }
 0x1cf   :  { %3307 = vmatprep.subr.bf16.mxu0 %v8394_v19  ;;  %3479 = vmatprep.subr.bf16.mxu1 %v8396_v20  ;;  %v438_v19 = vld [vmem:[#allocation2 + $0xa38] sm:$0xff]  ;;  %v8449_v20 = vcombine.low %v425_v8, %v429_v9  ;;  %v8458_v22 = vcombine.high %v433_v16, %v437_v17  ;;  %v489_v9 = vld [vmem:[#allocation2 + $0xbd0] sm:$0xff] }
 0x1d0   :  { %v8460_v23 = vcombine.high %v434_v18, %v438_v19  ;;  %v8459_v29 = vcombine.low %v434_v18, %v438_v19  ;;  %v501_v18 = vld [vmem:[#allocation2 + $0xc30] sm:$0xff]  ;;  %v498_v19 = vld [vmem:[#allocation2 + $0xc18] sm:$0xff] }
 0x1d1   :  { %3297 = vmatmul.mubr.bf16.vlgmr.msra.gmra.mrb[4].mxu0 %v9470_v32  ;;  %3469 = vmatmul.mubr.bf16.vlgmr.msra.gmra.mrb[4].mxu1 %v9470_v32 }
 0x1d2   :  { %3308 = vmatpush1.bf16.msra.mxu0 %v8393_v25  ;;  %3480 = vmatpush1.bf16.msra.mxu1 %v8395_v26  ;;  %v445_v25 = vld [vmem:[#allocation2 + $0xa70] sm:$0xff]  ;;  %v442_v26 = vld [vmem:[#allocation2 + $0xa58] sm:$0xff] }
 0x1d3   :  { %3309 = vmatprep.subr.bf16.mxu0 %v8402_v27  ;;  %3481 = vmatprep.subr.bf16.mxu1 %v8404_v28  ;;  %v446_v27 = vld [vmem:[#allocation2 + $0xa78] sm:$0xff]  ;;  %v8457_v28 = vcombine.low %v433_v16, %v437_v17  ;;  %v8466_v31 = vcombine.high %v441_v24, %v445_v25  ;;  %v497_v17 = vld [vmem:[#allocation2 + $0xc10] sm:$0xff] }
 0x1d4   :  { %3339 = vmatprep.mubr.bf16.mxu0 %v9471_v41  ;;  %3511 = vmatprep.mubr.bf16.mxu1 %v9471_v41  ;;  %v8468_v32 = vcombine.high %v442_v26, %v446_v27  ;;  %v457_v41 = vld [vmem:[#allocation2 + $0xad0] sm:$0xff] }
 0x1d6   :  { %3310 = vmatpush1.bf16.msra.mxu0 %v8401_v35  ;;  %3482 = vmatpush1.bf16.msra.mxu1 %v8403_v36  ;;  %v450_v35 = vld [vmem:[#allocation2 + $0xa98] sm:$0xff] }
 0x1d7   :  { %3311 = vmatprep.subr.bf16.mxu0 %v8410_v37  ;;  %3483 = vmatprep.subr.bf16.mxu1 %v8412_v38  ;;  %v454_v36 = vld [vmem:[#allocation2 + $0xab8] sm:$0xff]  ;;  %v8465_v37 = vcombine.low %v441_v24, %v445_v25  ;;  %v8467_v38 = vcombine.low %v442_v26, %v446_v27  ;;  %v505_v25 = vld [vmem:[#allocation2 + $0xc50] sm:$0xff] }
 0x1d8   :  { %v8476_v40 = vcombine.high %v450_v35, %v454_v36  ;;  %v509_v26 = vld [vmem:[#allocation2 + $0xc70] sm:$0xff]  ;;  %v506_v27 = vld [vmem:[#allocation2 + $0xc58] sm:$0xff] }
 0x1da   :  { %3312 = vmatpush1.bf16.msra.mxu0 %v8409_v44  ;;  %3484 = vmatpush1.bf16.msra.mxu1 %v8411_v45  ;;  %v462_v44 = vld [vmem:[#allocation2 + $0xaf8] sm:$0xff]  ;;  %v8473_v45 = vcombine.low %v449_v33, %v453_v34  ;;  %v513_v34 = vld [vmem:[#allocation2 + $0xc90] sm:$0xff] }
 0x1db   :  { %3313 = vmatprep.subr.bf16.mxu0 %v8418_v46  ;;  %3485 = vmatprep.subr.bf16.mxu1 %v8420_v47  ;;  %v8475_v46 = vcombine.low %v450_v35, %v454_v36  ;;  %v8482_v47 = vcombine.high %v457_v41, %v461_v42  ;;  %v8484_v48 = vcombine.high %v458_v43, %v462_v44  ;;  %v517_v35 = vld [vmem:[#allocation2 + $0xcb0] sm:$0xff] }
 0x1dc   :  { %v9472_v36 = vld [vmem:[%s9918_s0 + $0x10] ss:$28 sps:$4 sm:$0xff]  }
 0x1de   :  { %3314 = vmatpush1.bf16.msra.mxu0 %v8417_v52  ;;  %3486 = vmatpush1.bf16.msra.mxu1 %v8419_v53  ;;  %v470_v52 = vld [vmem:[#allocation2 + $0xb38] sm:$0xff]  ;;  %v8481_v53 = vcombine.low %v457_v41, %v461_v42  ;;  %v8538_v41 = vcombine.high %v513_v34, %v517_v35 }
 0x1df   :  { %3315 = vmatprep.subr.bf16.mxu0 %v8426_v54  ;;  %3487 = vmatprep.subr.bf16.mxu1 %v8428_v55  ;;  %v8483_v54 = vcombine.low %v458_v43, %v462_v44  ;;  %v8490_v55 = vcombine.high %v465_v49, %v469_v50  ;;  %v8492_v56 = vcombine.high %v466_v51, %v470_v52  ;;  %v521_v43 = vld [vmem:[#allocation2 + $0xcd0] sm:$0xff] }
 0x1e0   :  { %v525_v44 = vld [vmem:[#allocation2 + $0xcf0] sm:$0xff] }
 0x1e2   :  { %3316 = vmatpush1.bf16.msra.mxu0 %v8425_v60  ;;  %3488 = vmatpush1.bf16.msra.mxu1 %v8427_v61  ;;  %v478_v60 = vld [vmem:[#allocation2 + $0xb78] sm:$0xff]  ;;  %v8489_v61 = vcombine.low %v465_v49, %v469_v50  ;;  %v8546_v50 = vcombine.high %v521_v43, %v525_v44 }
 0x1e3   :  { %3317 = vmatprep.subr.bf16.mxu0 %v8434_v62  ;;  %3489 = vmatprep.subr.bf16.mxu1 %v8436_v63  ;;  %v8491_v62 = vcombine.low %v466_v51, %v470_v52  ;;  %v8498_v63 = vcombine.high %v473_v57, %v477_v58  ;;  %v8500_v0 = vcombine.high %v474_v59, %v478_v60  ;;  %v529_v52 = vld [vmem:[#allocation2 + $0xd10] sm:$0xff] }
 0x1e6   :  { %3318 = vmatpush1.bf16.msra.mxu0 %v8433_v4  ;;  %3490 = vmatpush1.bf16.msra.mxu1 %v8435_v5  ;;  %v486_v4 = vld [vmem:[#allocation2 + $0xbb8] sm:$0xff]  ;;  %v8497_v5 = vcombine.low %v473_v57, %v477_v58  ;;  %v8545_v57 = vcombine.low %v521_v43, %v525_v44 }
 0x1e7   :  { %3319 = vmatprep.subr.bf16.mxu0 %v8442_v6  ;;  %3491 = vmatprep.subr.bf16.mxu1 %v8444_v7  ;;  %v8499_v6 = vcombine.low %v474_v59, %v478_v60  ;;  %v8506_v7 = vcombine.high %v481_v1, %v485_v2  ;;  %v8508_v8 = vcombine.high %v482_v3, %v486_v4  ;;  %v537_v60 = vld [vmem:[#allocation2 + $0xd50] sm:$0xff] }
 0x1ea   :  { %3320 = vmatpush1.bf16.msra.mxu0 %v8441_v12  ;;  %3492 = vmatpush1.bf16.msra.mxu1 %v8443_v13  ;;  %v494_v12 = vld [vmem:[#allocation2 + $0xbf8] sm:$0xff]  ;;  %v8505_v13 = vcombine.low %v481_v1, %v485_v2  ;;  %v559_v2 = vld [vmem:[#allocation4] sm:$0xff] }
 0x1eb   :  { %3321 = vmatprep.subr.bf16.mxu0 %v8450_v14  ;;  %3493 = vmatprep.subr.bf16.mxu1 %v8452_v15  ;;  %v8507_v14 = vcombine.low %v482_v3, %v486_v4  ;;  %v8514_v15 = vcombine.high %v489_v9, %v493_v10  ;;  %v8516_v16 = vcombine.high %v490_v11, %v494_v12 }
 0x1ee   :  { %3322 = vmatpush1.bf16.msra.mxu0 %v8449_v20  ;;  %3494 = vmatpush1.bf16.msra.mxu1 %v8451_v21  ;;  %v502_v20 = vld [vmem:[#allocation2 + $0xc38] sm:$0xff]  ;;  %v8513_v21 = vcombine.low %v489_v9, %v493_v10  ;;  %v545_v9 = vld [vmem:[#allocation2 + $0xd90] sm:$0xff] }
 0x1ef   :  { %3323 = vmatprep.subr.bf16.mxu0 %v8458_v22  ;;  %3495 = vmatprep.subr.bf16.mxu1 %v8460_v23  ;;  %v8515_v22 = vcombine.low %v490_v11, %v494_v12  ;;  %v8522_v23 = vcombine.high %v497_v17, %v501_v18  ;;  %v8524_v24 = vcombine.high %v498_v19, %v502_v20  ;;  %v549_v10 = vld [vmem:[#allocation2 + $0xdb0] sm:$0xff]  ;;  %v546_v12 = vld [vmem:[#allocation2 + $0xd98] sm:$0xff] }
 0x1f2   :  { %3324 = vmatpush1.bf16.msra.mxu0 %v8457_v28  ;;  %3496 = vmatpush1.bf16.msra.mxu1 %v8459_v29  ;;  %v510_v28 = vld [vmem:[#allocation2 + $0xc78] sm:$0xff]  ;;  %v8521_v29 = vcombine.low %v497_v17, %v501_v18 }
 0x1f3   :  { %3325 = vmatprep.subr.bf16.mxu0 %v8466_v31  ;;  %3497 = vmatprep.subr.bf16.mxu1 %v8468_v32  ;;  %v8523_v31 = vcombine.low %v498_v19, %v502_v20  ;;  %v8530_v32 = vcombine.high %v505_v25, %v509_v26  ;;  %v8532_v33 = vcombine.high %v506_v27, %v510_v28 }
 0x1f4   :  { %v8570_v19 = vcombine.high %v545_v9, %v549_v10 }
 0x1f6   :  { %3326 = vmatpush1.bf16.msra.mxu0 %v8465_v37  ;;  %3498 = vmatpush1.bf16.msra.mxu1 %v8467_v38  ;;  %v514_v37 = vld [vmem:[#allocation2 + $0xc98] sm:$0xff] }
 0x1f7   :  { %3327 = vmatprep.subr.bf16.mxu0 %v8474_v39  ;;  %3499 = vmatprep.subr.bf16.mxu1 %v8476_v40  ;;  %v518_v38 = vld [vmem:[#allocation2 + $0xcb8] sm:$0xff]  ;;  %v8529_v39 = vcombine.low %v505_v25, %v509_v26  ;;  %v8531_v40 = vcombine.low %v506_v27, %v510_v28 }
 0x1f8   :  { %v8540_v42 = vcombine.high %v514_v37, %v518_v38  ;;  %v8539_v49 = vcombine.low %v514_v37, %v518_v38  ;;  %v554_v27 = vld [vmem:[#allocation2 + $0xdd8] sm:$0xff] }
 0x1f9   :  { %v558_v28 = vld [vmem:[#allocation2 + $0xdf8] sm:$0xff] }
 0x1fa   :  { %3328 = vmatpush1.bf16.msra.mxu0 %v8473_v45  ;;  %3500 = vmatpush1.bf16.msra.mxu1 %v8475_v46  ;;  %v522_v45 = vld [vmem:[#allocation2 + $0xcd8] sm:$0xff] }
 0x1fb   :  { %3329 = vmatprep.subr.bf16.mxu0 %v8482_v47  ;;  %3501 = vmatprep.subr.bf16.mxu1 %v8484_v48  ;;  %v526_v46 = vld [vmem:[#allocation2 + $0xcf8] sm:$0xff]  ;;  %v561_v47 = vlaneseq  ;;  %v8537_v48 = vcombine.low %v513_v34, %v517_v35  ;;  %v8569_v34 = vcombine.low %v545_v9, %v549_v10  ;;  %v3598_v9 = vld [vmem:[#allocation6 + $0x48] sm:$0xff] }
 0x1fc   :  { %v8548_v51 = vcombine.high %v522_v45, %v526_v46  ;;  %v8547_v58 = vcombine.low %v522_v45, %v526_v46  ;;  %v8580_v45 = vcombine.high %v554_v27, %v558_v28  ;;  %v3589_v46 = vld [vmem:[#allocation6] sm:$0xff]  ;;  %v3602_v10 = vld [vmem:[#allocation6 + $0x68] sm:$0xff] }
 0x1fe   :  { %3330 = vmatpush1.bf16.msra.mxu0 %v8481_v53  ;;  %3502 = vmatpush1.bf16.msra.mxu1 %v8483_v54  ;;  %v533_v53 = vld [vmem:[#allocation2 + $0xd30] sm:$0xff]  ;;  %v530_v54 = vld [vmem:[#allocation2 + $0xd18] sm:$0xff] }
 0x1ff   :  { %3331 = vmatprep.subr.bf16.mxu0 %v8490_v55  ;;  %3503 = vmatprep.subr.bf16.mxu1 %v8492_v56  ;;  %v534_v55 = vld [vmem:[#allocation2 + $0xd38] sm:$0xff]  ;;  %v9781_v56 = vshrl.u32 %v561_v47, 7  ;;  %v8553_v1 = vcombine.low %v529_v52, %v533_v53  ;;  %v3593_v47 = vld [vmem:[#allocation6 + $0x20] sm:$0xff] }
 0x200   :  { %v8556_v59 = vcombine.high %v530_v54, %v534_v55 }
 0x201   :  { %v571_v3 = vsub.s32 2, %v9781_v56  ;;  %v567_v4 = vsub.s32 1, %v9781_v56 }
 0x202   :  { %3332 = vmatpush1.bf16.msra.mxu0 %v8489_v61  ;;  %3504 = vmatpush1.bf16.msra.mxu1 %v8491_v62  ;;  %v541_v61 = vld [vmem:[#allocation2 + $0xd70] sm:$0xff]  ;;  %v563_v62 = vsub.s32 0, %v9781_v56 }
 0x203   :  { %3333 = vmatprep.subr.bf16.mxu0 %v8498_v63  ;;  %3505 = vmatprep.subr.bf16.mxu1 %v8500_v0  ;;  %v538_v63 = vld [vmem:[#allocation2 + $0xd58] sm:$0xff] }
 0x204   :  { %v542_v0 = vld [vmem:[#allocation2 + $0xd78] sm:$0xff]  ;;  %v564_v11 = vrot.slane %v559_v2, %v563_v62 }
 0x205   :  { %v8563_v18 = vcombine.low %v538_v63, %v542_v0 }
 0x206   :  { %3334 = vmatpush1.bf16.msra.mxu0 %v8497_v5  ;;  %3506 = vmatpush1.bf16.msra.mxu1 %v8499_v6  ;;  %v8555_v5 = vcombine.low %v530_v54, %v534_v55  ;;  %v575_v6 = vsub.s32 3, %v9781_v56 }
 0x207   :  { %3335 = vmatprep.subr.bf16.mxu0 %v8506_v7  ;;  %3507 = vmatprep.subr.bf16.mxu1 %v8508_v8  ;;  %v8562_v7 = vcombine.high %v537_v60, %v541_v61  ;;  %v8564_v8 = vcombine.high %v538_v63, %v542_v0 }
 0x208   :  { %v576_v17 = vrot.slane %v559_v2, %v575_v6 }
 0x20a   :  { %3336 = vmatpush1.bf16.msra.mxu0 %v8505_v13  ;;  %3508 = vmatpush1.bf16.msra.mxu1 %v8507_v14  ;;  %v550_v13 = vld [vmem:[#allocation2 + $0xdb8] sm:$0xff]  ;;  %v572_v14 = vrot.slane %v559_v2, %v571_v3 }
 0x20b   :  { %3337 = vmatprep.subr.bf16.mxu0 %v8514_v15  ;;  %3509 = vmatprep.subr.bf16.mxu1 %v8516_v16  ;;  %v568_v15 = vrot.slane %v559_v2, %v567_v4  ;;  %v8561_v16 = vcombine.low %v537_v60, %v541_v61  ;;  %v8571_v35 = vcombine.low %v546_v12, %v550_v13 }
 0x20c   :  { %v8582_v61 = vcombine.high %v3589_v46, %v3593_v47 }
 0x20e   :  { %3338 = vmatpush1.bf16.msra.mxu0 %v8513_v21  ;;  %3510 = vmatpush1.bf16.msra.mxu1 %v8515_v22  ;;  %v8572_v21 = vcombine.high %v546_v12, %v550_v13  ;;  %v553_v22 = vld [vmem:[#allocation2 + $0xdd0] sm:$0xff]  ;;  %v3605_v13 = vld [vmem:[#allocation6 + $0x80] sm:$0xff] }
 0x20f   :  { %3350 = vmatprep.subr.bf16.mxu0 %v8522_v23  ;;  %3522 = vmatprep.subr.bf16.mxu1 %v8524_v24  ;;  %v557_v23 = vld [vmem:[#allocation2 + $0xdf0] sm:$0xff] }
 0x210   :  { %v8577_v44 = vcombine.low %v553_v22, %v557_v23 }
 0x211   :  { %3340 = vmatmul.mubr.bf16.vlgmr.msra.gmra.mrb[4].mxu0 %v9472_v36  ;;  %3512 = vmatmul.mubr.bf16.vlgmr.msra.gmra.mrb[4].mxu1 %v9472_v36 }
 0x212   :  { %3351 = vmatpush1.bf16.msra.mxu0 %v8521_v29  ;;  %3523 = vmatpush1.bf16.msra.mxu1 %v8523_v31 }
 0x213   :  { %3352 = vmatprep.subr.bf16.mxu0 %v8530_v32  ;;  %3524 = vmatprep.subr.bf16.mxu1 %v8532_v33 }
 0x214   :  { %3382 = vmatprep.mubr.bf16.mxu0 %v9625_v30  ;;  %3554 = vmatprep.mubr.bf16.mxu1 %v9625_v30  ;;  %v8554_v30 = vcombine.high %v529_v52, %v533_v53  ;;  %v3590_v52 = vld [vmem:[#allocation6 + $0x8] sm:$0xff] }
 0x215   :  { %v3594_v53 = vld [vmem:[#allocation6 + $0x28] sm:$0xff] }
 0x216   :  { %3353 = vmatpush1.bf16.msra.mxu0 %v8529_v39  ;;  %3525 = vmatpush1.bf16.msra.mxu1 %v8531_v40  ;;  %v8578_v40 = vcombine.high %v553_v22, %v557_v23  ;;  %v3613_v23 = vld [vmem:[#allocation6 + $0xc0] sm:$0xff] }
 0x217   :  { %3354 = vmatprep.subr.bf16.mxu0 %v8538_v41  ;;  %3526 = vmatprep.subr.bf16.mxu1 %v8540_v42 }
 0x21a   :  { %3355 = vmatpush1.bf16.msra.mxu0 %v8537_v48  ;;  %3527 = vmatpush1.bf16.msra.mxu1 %v8539_v49 }
 0x21b   :  { %3356 = vmatprep.subr.bf16.mxu0 %v8546_v50  ;;  %3528 = vmatprep.subr.bf16.mxu1 %v8548_v51  ;;  %v8579_v51 = vcombine.low %v554_v27, %v558_v28 }
 0x21e   :  { %3357 = vmatpush1.bf16.msra.mxu0 %v8545_v57  ;;  %3529 = vmatpush1.bf16.msra.mxu1 %v8547_v58 }
 0x21f   :  { %3358 = vmatprep.subr.bf16.mxu0 %v8554_v30  ;;  %3530 = vmatprep.subr.bf16.mxu1 %v8556_v59 }
 0x222   :  { %3359 = vmatpush1.bf16.msra.mxu0 %v8553_v1  ;;  %3531 = vmatpush1.bf16.msra.mxu1 %v8555_v5  ;;  %v8584_v1 = vcombine.high %v3590_v52, %v3594_v53  ;;  %v3597_v5 = vld [vmem:[#allocation6 + $0x40] sm:$0xff] }
 0x223   :  { %3360 = vmatprep.subr.bf16.mxu0 %v8562_v7  ;;  %3532 = vmatprep.subr.bf16.mxu1 %v8564_v8  ;;  %v3601_v7 = vld [vmem:[#allocation6 + $0x60] sm:$0xff]  ;;  %v8581_v8 = vcombine.low %v3589_v46, %v3593_v47 }
 0x224   :  { %v3040_v20 = vpop.f32.mrb[0].mxu0  ;;  %v3212_v25 = vpop.f32.mrb[0].mxu1  ;;  %v8590_v12 = vcombine.high %v3597_v5, %v3601_v7 }
 0x225   :  { %v9246_v24 = vadd.f32 %v3040_v20, %v564_v11  ;;  %v3042_v26 = vpop.f32.mrb[1].mxu0  ;;  %v9250_v29 = vadd.f32 %v3212_v25, %v572_v14  ;;  %v3214_v32 = vpop.f32.mrb[1].mxu1  ;;  %v8591_v20 = vcombine.low %v3598_v9, %v3602_v10  ;;  %v3614_v25 = vld [vmem:[#allocation6 + $0xc8] sm:$0xff] }
 0x226   :  { %v9247_v31 = vadd.f32 %v3042_v26, %v568_v15  ;;  %v3044_v33 = vpop.f32.mrb[2].mxu0  ;;  %3361 = vmatpush1.bf16.msra.mxu0 %v8561_v16  ;;  %v9251_v36 = vadd.f32 %v3214_v32, %v576_v17  ;;  %v3216_v38 = vpop.f32.mrb[2].mxu1  ;;  %3533 = vmatpush1.bf16.msra.mxu1 %v8563_v18  ;;  %v8592_v16 = vcombine.high %v3598_v9, %v3602_v10  ;;  %v3610_v18 = vld [vmem:[#allocation6 + $0xa8] sm:$0xff]  ;;  %v3621_v32 = vld [vmem:[#allocation6 + $0x100] sm:$0xff] }
 0x227   :  { %v9248_v37 = vadd.f32 %v3044_v33, %v564_v11  ;;  %v3046_v39 = vpop.f32.mrb[3].mxu0  ;;  %3362 = vmatprep.subr.bf16.mxu0 %v8570_v19  ;;  %v9252_v41 = vadd.f32 %v3216_v38, %v572_v14  ;;  %v3218_v43 = vpop.f32.mrb[3].mxu1  ;;  %3534 = vmatprep.subr.bf16.mxu1 %v8572_v21  ;;  %v3565_v48 = vmax.f32 %v9246_v24, 0.0  ;;  %v3567_v54 = vmax.f32 %v9250_v29, 0.0  ;;  %v3609_v14 = vld [vmem:[#allocation6 + $0xa0] sm:$0xff]  ;;  %v3618_v26 = vld [vmem:[#allocation6 + $0xe8] sm:$0xff] }
 0x228   :  { %v9249_v42 = vadd.f32 %v3046_v39, %v568_v15  ;;  %v9253_v50 = vadd.f32 %v3218_v43, %v576_v17  ;;  %v3566_v55 = vmax.f32 %v9247_v31, 0.0  ;;  %v3568_v30 = vmax.f32 %v9251_v36, 0.0  ;;  %v9473_v15 = vld [vmem:[%s9918_s0 + $0x18] ss:$28 sps:$4 sm:$0xff]   ;;  %v3617_v24 = vld [vmem:[#allocation6 + $0xe0] sm:$0xff] }
 0x229   :  { %v3573_v49 = vmax.f32 %v9248_v37, 0.0  ;;  %v3575_v57 = vmax.f32 %v9252_v41, 0.0  ;;  %v8583_v11 = vcombine.low %v3590_v52, %v3594_v53  ;;  %v3606_v17 = vld [vmem:[#allocation6 + $0x88] sm:$0xff]  ;;  %v8589_v19 = vcombine.low %v3597_v5, %v3601_v7  ;;  %v3625_v33 = vld [vmem:[#allocation6 + $0x120] sm:$0xff] }
 0x22a   :  { %v3574_v58 = vmax.f32 %v9249_v42, 0.0  ;;  %3363 = vmatpush1.bf16.msra.mxu0 %v8569_v34  ;;  %v3576_v60 = vmax.f32 %v9253_v50, 0.0  ;;  %3535 = vmatpush1.bf16.msra.mxu1 %v8571_v35  ;;  %v8598_v21 = vcombine.high %v3605_v13, %v3609_v14  ;;  %v8600_v22 = vcombine.high %v3606_v17, %v3610_v18  ;;  %v3622_v34 = vld [vmem:[#allocation6 + $0x108] sm:$0xff]  ;;  %v3633_v41 = vld [vmem:[#allocation6 + $0x160] sm:$0xff] }
 0x22b   :  { %v9795_v59 = vpack.c.bf16 %v3573_v49, %v3565_v48  ;;  %3364 = vmatprep.subr.bf16.mxu0 %v8578_v40  ;;  %v9797_v63 = vpack.c.bf16 %v3575_v57, %v3567_v54  ;;  %3536 = vmatprep.subr.bf16.mxu1 %v8580_v45  ;;  %v8597_v27 = vcombine.low %v3605_v13, %v3609_v14  ;;  %v3626_v35 = vld [vmem:[#allocation6 + $0x128] sm:$0xff]  ;;  %v3629_v40 = vld [vmem:[#allocation6 + $0x140] sm:$0xff] }
 0x22c   :  { %v9799_v0 = vpack.c.bf16 %v3574_v58, %v3566_v55  ;;  %v9801_v2 = vpack.c.bf16 %v3576_v60, %v3568_v30  ;;  %v8599_v28 = vcombine.low %v3606_v17, %v3610_v18  ;;  %v8606_v29 = vcombine.high %v3613_v23, %v3617_v24  ;;  %v3630_v42 = vld [vmem:[#allocation6 + $0x148] sm:$0xff]  ;;  %v3637_v48 = vld [vmem:[#allocation6 + $0x180] sm:$0xff] }
 0x22d   :  { %v8608_v31 = vcombine.high %v3614_v25, %v3618_v26  ;;  %v8605_v36 = vcombine.low %v3613_v23, %v3617_v24  ;;  %v8607_v37 = vcombine.low %v3614_v25, %v3618_v26  ;;  %v8614_v38 = vcombine.high %v3621_v32, %v3625_v33  ;;  %v3634_v43 = vld [vmem:[#allocation6 + $0x168] sm:$0xff]  ;;  %v3641_v49 = vld [vmem:[#allocation6 + $0x1a0] sm:$0xff] }
 0x22e   :  { %3365 = vmatpush1.bf16.msra.mxu0 %v8577_v44  ;;  %3537 = vmatpush1.bf16.msra.mxu1 %v8579_v51  ;;  %v8616_v39 = vcombine.high %v3622_v34, %v3626_v35  ;;  %v8613_v44 = vcombine.low %v3621_v32, %v3625_v33  ;;  %v8615_v45 = vcombine.low %v3622_v34, %v3626_v35  ;;  %v3638_v50 = vld [vmem:[#allocation6 + $0x188] sm:$0xff]  ;;  %v3645_v57 = vld [vmem:[#allocation6 + $0x1c0] sm:$0xff] }
 0x22f   :  { %6703 = vmatprep.subr.bf16.mxu0 %v8582_v61  ;;  %6875 = vmatprep.subr.bf16.mxu1 %v8584_v1  ;;  %v8622_v46 = vcombine.high %v3629_v40, %v3633_v41  ;;  %v8624_v47 = vcombine.high %v3630_v42, %v3634_v43  ;;  %v3642_v51 = vld [vmem:[#allocation6 + $0x1a8] sm:$0xff]  ;;  %v8621_v52 = vcombine.low %v3629_v40, %v3633_v41  ;;  %v3649_v58 = vld [vmem:[#allocation6 + $0x1e0] sm:$0xff] }
 0x230   :  { %v8623_v53 = vcombine.low %v3630_v42, %v3634_v43  ;;  %v8630_v54 = vcombine.high %v3637_v48, %v3641_v49  ;;  %v8632_v55 = vcombine.high %v3638_v50, %v3642_v51  ;;  %v3646_v30 = vld [vmem:[#allocation6 + $0x1c8] sm:$0xff]  ;;  %v8629_v61 = vcombine.low %v3637_v48, %v3641_v49  ;;  %v3657_v9 = vld [vmem:[#allocation6 + $0x220] sm:$0xff] }
 0x231   :  { %3383 = vmatmul.mubr.bf16.vlgmr.msra.gmra.mrb[4].mxu0 %v9473_v15  ;;  %3555 = vmatmul.mubr.bf16.vlgmr.msra.gmra.mrb[4].mxu1 %v9473_v15  ;;  %v3650_v60 = vld [vmem:[#allocation6 + $0x1e8] sm:$0xff]  ;;  %v8631_v1 = vcombine.low %v3638_v50, %v3642_v51  ;;  %v8638_v5 = vcombine.high %v3645_v57, %v3649_v58  ;;  %v3665_v17 = vld [vmem:[#allocation6 + $0x260] sm:$0xff] }
 0x232   :  { %6704 = vmatpush1.bf16.msra.mxu0 %v8581_v8  ;;  %6735 = vmatprep.mubr.bf16.mxu0 %v9799_v0  ;;  %v8640_v7 = vcombine.high %v3646_v30, %v3650_v60  ;;  %v3653_v8 = vld [vmem:[#allocation6 + $0x200] sm:$0xff]  ;;  %v3654_v10 = vld [vmem:[#allocation6 + $0x208] sm:$0xff]  ;;  %v8639_v13 = vcombine.low %v3646_v30, %v3650_v60 }
 0x233   :  { %6876 = vmatpush1.bf16.msra.mxu1 %v8583_v11  ;;  %6907 = vmatprep.mubr.bf16.mxu1 %v9799_v0  ;;  %v3658_v11 = vld [vmem:[#allocation6 + $0x228] sm:$0xff]  ;;  %v8646_v14 = vcombine.high %v3653_v8, %v3657_v9  ;;  %v3669_v24 = vld [vmem:[#allocation6 + $0x280] sm:$0xff] }
 0x234   :  { %6705 = vmatprep.subr.bf16.mxu0 %v8590_v12  ;;  %6877 = vmatprep.subr.bf16.mxu1 %v8592_v16  ;;  %v8637_v12 = vcombine.low %v3645_v57, %v3649_v58  ;;  %v8648_v15 = vcombine.high %v3654_v10, %v3658_v11  ;;  %v3661_v16 = vld [vmem:[#allocation6 + $0x240] sm:$0xff]  ;;  %v3662_v18 = vld [vmem:[#allocation6 + $0x248] sm:$0xff] }
 0x235   :  { %v3673_v25 = vld [vmem:[#allocation6 + $0x2a0] sm:$0xff]  ;;  %v3670_v26 = vld [vmem:[#allocation6 + $0x288] sm:$0xff] }
 0x236   :  { %6706 = vmatpush1.bf16.msra.mxu0 %v8589_v19  ;;  %v3666_v19 = vld [vmem:[#allocation6 + $0x268] sm:$0xff]  ;;  %v3677_v33 = vld [vmem:[#allocation6 + $0x2c0] sm:$0xff] }
 0x237   :  { %6878 = vmatpush1.bf16.msra.mxu1 %v8591_v20  ;;  %6707 = vmatprep.subr.bf16.mxu0 %v8598_v21  ;;  %v8645_v20 = vcombine.low %v3653_v8, %v3657_v9  ;;  %v8647_v21 = vcombine.low %v3654_v10, %v3658_v11  ;;  %v8656_v23 = vcombine.high %v3662_v18, %v3666_v19  ;;  %v3681_v34 = vld [vmem:[#allocation6 + $0x2e0] sm:$0xff]  ;;  %v3678_v35 = vld [vmem:[#allocation6 + $0x2c8] sm:$0xff] }
 0x238   :  { %6879 = vmatprep.subr.bf16.mxu1 %v8600_v22  ;;  %v8654_v22 = vcombine.high %v3661_v16, %v3665_v17  ;;  %v3685_v41 = vld [vmem:[#allocation6 + $0x300] sm:$0xff]  ;;  %v3686_v43 = vld [vmem:[#allocation6 + $0x308] sm:$0xff] }
 0x239   :  { %v3689_v42 = vld [vmem:[#allocation6 + $0x320] sm:$0xff]  ;;  %v3694_v51 = vld [vmem:[#allocation6 + $0x348] sm:$0xff] }
 0x23a   :  { %6708 = vmatpush1.bf16.msra.mxu0 %v8597_v27  ;;  %v3674_v27 = vld [vmem:[#allocation6 + $0x2a8] sm:$0xff]  ;;  %v3693_v49 = vld [vmem:[#allocation6 + $0x340] sm:$0xff] }
 0x23b   :  { %6880 = vmatpush1.bf16.msra.mxu1 %v8599_v28  ;;  %6709 = vmatprep.subr.bf16.mxu0 %v8606_v29  ;;  %v8653_v28 = vcombine.low %v3661_v16, %v3665_v17  ;;  %v8655_v29 = vcombine.low %v3662_v18, %v3666_v19  ;;  %v8664_v32 = vcombine.high %v3670_v26, %v3674_v27  ;;  %v3697_v50 = vld [vmem:[#allocation6 + $0x360] sm:$0xff]  ;;  %v3702_v60 = vld [vmem:[#allocation6 + $0x388] sm:$0xff] }
 0x23c   :  { %6881 = vmatprep.subr.bf16.mxu1 %v8608_v31  ;;  %v8662_v31 = vcombine.high %v3669_v24, %v3673_v25  ;;  %v3701_v58 = vld [vmem:[#allocation6 + $0x380] sm:$0xff]  ;;  %v3710_v11 = vld [vmem:[#allocation6 + $0x3c8] sm:$0xff] }
 0x23d   :  { %v3705_v30 = vld [vmem:[#allocation6 + $0x3a0] sm:$0xff]  ;;  %v3718_v19 = vld [vmem:[#allocation6 + $0x408] sm:$0xff] }
 0x23e   :  { %6710 = vmatpush1.bf16.msra.mxu0 %v8605_v36  ;;  %v3682_v36 = vld [vmem:[#allocation6 + $0x2e8] sm:$0xff]  ;;  %v3709_v9 = vld [vmem:[#allocation6 + $0x3c0] sm:$0xff] }
 0x23f   :  { %6882 = vmatpush1.bf16.msra.mxu1 %v8607_v37  ;;  %6711 = vmatprep.subr.bf16.mxu0 %v8614_v38  ;;  %v8661_v37 = vcombine.low %v3669_v24, %v3673_v25  ;;  %v8663_v38 = vcombine.low %v3670_v26, %v3674_v27  ;;  %v8672_v40 = vcombine.high %v3678_v35, %v3682_v36  ;;  %v3713_v10 = vld [vmem:[#allocation6 + $0x3e0] sm:$0xff] }
 0x240   :  { %6883 = vmatprep.subr.bf16.mxu1 %v8616_v39  ;;  %v8670_v39 = vcombine.high %v3677_v33, %v3681_v34  ;;  %v3717_v17 = vld [vmem:[#allocation6 + $0x400] sm:$0xff] }
 0x241   :  { %v3721_v18 = vld [vmem:[#allocation6 + $0x420] sm:$0xff] }
 0x242   :  { %6712 = vmatpush1.bf16.msra.mxu0 %v8613_v44  ;;  %v3690_v44 = vld [vmem:[#allocation6 + $0x328] sm:$0xff]  ;;  %v3725_v25 = vld [vmem:[#allocation6 + $0x440] sm:$0xff]  ;;  %v8709_v27 = vcombine.low %v3717_v17, %v3721_v18 }
 0x243   :  { %6884 = vmatpush1.bf16.msra.mxu1 %v8615_v45  ;;  %6713 = vmatprep.subr.bf16.mxu0 %v8622_v46  ;;  %v8669_v45 = vcombine.low %v3677_v33, %v3681_v34  ;;  %v8671_v46 = vcombine.low %v3678_v35, %v3682_v36  ;;  %v8680_v48 = vcombine.high %v3686_v43, %v3690_v44  ;;  %v3729_v26 = vld [vmem:[#allocation6 + $0x460] sm:$0xff]  ;;  %v3734_v36 = vld [vmem:[#allocation6 + $0x488] sm:$0xff] }
 0x244   :  { %6885 = vmatprep.subr.bf16.mxu1 %v8624_v47  ;;  %v8678_v47 = vcombine.high %v3685_v41, %v3689_v42  ;;  %v3733_v33 = vld [vmem:[#allocation6 + $0x480] sm:$0xff] }
 0x245   :  { %v3737_v34 = vld [vmem:[#allocation6 + $0x4a0] sm:$0xff] }
 0x246   :  { %6714 = vmatpush1.bf16.msra.mxu0 %v8621_v52  ;;  %v3698_v52 = vld [vmem:[#allocation6 + $0x368] sm:$0xff] }
 0x247   :  { %6886 = vmatpush1.bf16.msra.mxu1 %v8623_v53  ;;  %6715 = vmatprep.subr.bf16.mxu0 %v8630_v54  ;;  %v8677_v53 = vcombine.low %v3685_v41, %v3689_v42  ;;  %v8679_v54 = vcombine.low %v3686_v43, %v3690_v44  ;;  %v8688_v57 = vcombine.high %v3694_v51, %v3698_v52  ;;  %v3741_v42 = vld [vmem:[#allocation6 + $0x4c0] sm:$0xff]  ;;  %v3742_v44 = vld [vmem:[#allocation6 + $0x4c8] sm:$0xff] }
 0x248   :  { %6887 = vmatprep.subr.bf16.mxu1 %v8632_v55  ;;  %v8686_v55 = vcombine.high %v3693_v49, %v3697_v50  ;;  %v3745_v43 = vld [vmem:[#allocation6 + $0x4e0] sm:$0xff] }
 0x24a   :  { %6716 = vmatpush1.bf16.msra.mxu0 %v8629_v61  ;;  %v3706_v61 = vld [vmem:[#allocation6 + $0x3a8] sm:$0xff] }
 0x24b   :  { %6888 = vmatpush1.bf16.msra.mxu1 %v8631_v1  ;;  %6717 = vmatprep.subr.bf16.mxu0 %v8638_v5  ;;  %v8685_v1 = vcombine.low %v3693_v49, %v3697_v50  ;;  %v8687_v5 = vcombine.low %v3694_v51, %v3698_v52  ;;  %v8696_v8 = vcombine.high %v3702_v60, %v3706_v61  ;;  %v3749_v50 = vld [vmem:[#allocation6 + $0x500] sm:$0xff]  ;;  %v3750_v52 = vld [vmem:[#allocation6 + $0x508] sm:$0xff] }
 0x24c   :  { %6889 = vmatprep.subr.bf16.mxu1 %v8640_v7  ;;  %v8694_v7 = vcombine.high %v3701_v58, %v3705_v30  ;;  %v3753_v51 = vld [vmem:[#allocation6 + $0x520] sm:$0xff] }
 0x24e   :  { %6718 = vmatpush1.bf16.msra.mxu0 %v8637_v12  ;;  %v3714_v12 = vld [vmem:[#allocation6 + $0x3e8] sm:$0xff] }
 0x24f   :  { %6890 = vmatpush1.bf16.msra.mxu1 %v8639_v13  ;;  %6719 = vmatprep.subr.bf16.mxu0 %v8646_v14  ;;  %v8693_v13 = vcombine.low %v3701_v58, %v3705_v30  ;;  %v8695_v14 = vcombine.low %v3702_v60, %v3706_v61  ;;  %v8704_v16 = vcombine.high %v3710_v11, %v3714_v12  ;;  %v3757_v30 = vld [vmem:[#allocation6 + $0x540] sm:$0xff]  ;;  %v3758_v61 = vld [vmem:[#allocation6 + $0x548] sm:$0xff] }
 0x250   :  { %6891 = vmatprep.subr.bf16.mxu1 %v8648_v15  ;;  %v8702_v15 = vcombine.high %v3709_v9, %v3713_v10  ;;  %v3761_v60 = vld [vmem:[#allocation6 + $0x560] sm:$0xff] }
 0x252   :  { %6720 = vmatpush1.bf16.msra.mxu0 %v8645_v20  ;;  %v3722_v20 = vld [vmem:[#allocation6 + $0x428] sm:$0xff] }
 0x253   :  { %6892 = vmatpush1.bf16.msra.mxu1 %v8647_v21  ;;  %6721 = vmatprep.subr.bf16.mxu0 %v8654_v22  ;;  %v8701_v21 = vcombine.low %v3709_v9, %v3713_v10  ;;  %v8703_v22 = vcombine.low %v3710_v11, %v3714_v12  ;;  %v8712_v24 = vcombine.high %v3718_v19, %v3722_v20  ;;  %v3765_v10 = vld [vmem:[#allocation6 + $0x580] sm:$0xff]  ;;  %v3766_v12 = vld [vmem:[#allocation6 + $0x588] sm:$0xff] }
 0x254   :  { %6893 = vmatprep.subr.bf16.mxu1 %v8656_v23  ;;  %v8710_v23 = vcombine.high %v3717_v17, %v3721_v18  ;;  %v3769_v11 = vld [vmem:[#allocation6 + $0x5a0] sm:$0xff] }
 0x255   :  { %v3773_v18 = vld [vmem:[#allocation6 + $0x5c0] sm:$0xff] }
 0x256   :  { %6722 = vmatpush1.bf16.msra.mxu0 %v8653_v28  ;;  %v3726_v28 = vld [vmem:[#allocation6 + $0x448] sm:$0xff] }
 0x257   :  { %6894 = vmatpush1.bf16.msra.mxu1 %v8655_v29  ;;  %6723 = vmatprep.subr.bf16.mxu0 %v8662_v31  ;;  %v3730_v29 = vld [vmem:[#allocation6 + $0x468] sm:$0xff]  ;;  %v8711_v31 = vcombine.low %v3718_v19, %v3722_v20  ;;  %v3777_v19 = vld [vmem:[#allocation6 + $0x5e0] sm:$0xff] }
 0x258   :  { %6895 = vmatprep.subr.bf16.mxu1 %v8664_v32  ;;  %v8718_v32 = vcombine.high %v3725_v25, %v3729_v26  ;;  %v8720_v35 = vcombine.high %v3726_v28, %v3730_v29  ;;  %v3774_v20 = vld [vmem:[#allocation6 + $0x5c8] sm:$0xff] }
 0x25a   :  { %6724 = vmatpush1.bf16.msra.mxu0 %v8661_v37  ;;  %v3738_v37 = vld [vmem:[#allocation6 + $0x4a8] sm:$0xff] }
 0x25b   :  { %6896 = vmatpush1.bf16.msra.mxu1 %v8663_v38  ;;  %6725 = vmatprep.subr.bf16.mxu0 %v8670_v39  ;;  %v8717_v38 = vcombine.low %v3725_v25, %v3729_v26  ;;  %v8719_v39 = vcombine.low %v3726_v28, %v3730_v29  ;;  %v8728_v41 = vcombine.high %v3734_v36, %v3738_v37  ;;  %v3781_v26 = vld [vmem:[#allocation6 + $0x600] sm:$0xff]  ;;  %v3782_v28 = vld [vmem:[#allocation6 + $0x608] sm:$0xff] }
 0x25c   :  { %6897 = vmatprep.subr.bf16.mxu1 %v8672_v40  ;;  %v8726_v40 = vcombine.high %v3733_v33, %v3737_v34  ;;  %v3786_v29 = vld [vmem:[#allocation6 + $0x628] sm:$0xff] }
 0x25e   :  { %6726 = vmatpush1.bf16.msra.mxu0 %v8669_v45  ;;  %v3746_v45 = vld [vmem:[#allocation6 + $0x4e8] sm:$0xff] }
 0x25f   :  { %6898 = vmatpush1.bf16.msra.mxu1 %v8671_v46  ;;  %6727 = vmatprep.subr.bf16.mxu0 %v8678_v47  ;;  %v8725_v46 = vcombine.low %v3733_v33, %v3737_v34  ;;  %v8727_v47 = vcombine.low %v3734_v36, %v3738_v37  ;;  %v8736_v49 = vcombine.high %v3742_v44, %v3746_v45  ;;  %v3793_v36 = vld [vmem:[#allocation6 + $0x660] sm:$0xff]  ;;  %v3790_v37 = vld [vmem:[#allocation6 + $0x648] sm:$0xff] }
 0x260   :  { %6899 = vmatprep.subr.bf16.mxu1 %v8680_v48  ;;  %v8734_v48 = vcombine.high %v3741_v42, %v3745_v43  ;;  %v8776_v34 = vcombine.high %v3782_v28, %v3786_v29 }
 0x262   :  { %6728 = vmatpush1.bf16.msra.mxu0 %v8677_v53  ;;  %v3754_v53 = vld [vmem:[#allocation6 + $0x528] sm:$0xff] }
 0x263   :  { %6900 = vmatpush1.bf16.msra.mxu1 %v8679_v54  ;;  %6729 = vmatprep.subr.bf16.mxu0 %v8686_v55  ;;  %v8733_v54 = vcombine.low %v3741_v42, %v3745_v43  ;;  %v8735_v55 = vcombine.low %v3742_v44, %v3746_v45  ;;  %v8744_v58 = vcombine.high %v3750_v52, %v3754_v53  ;;  %v3797_v43 = vld [vmem:[#allocation6 + $0x680] sm:$0xff]  ;;  %v3798_v45 = vld [vmem:[#allocation6 + $0x688] sm:$0xff] }
 0x264   :  { %6901 = vmatprep.subr.bf16.mxu1 %v8688_v57  ;;  %v8742_v57 = vcombine.high %v3749_v50, %v3753_v51  ;;  %v3801_v44 = vld [vmem:[#allocation6 + $0x6a0] sm:$0xff] }
 0x266   :  { %6730 = vmatpush1.bf16.msra.mxu0 %v8685_v1  ;;  %v3762_v1 = vld [vmem:[#allocation6 + $0x568] sm:$0xff] }
 0x267   :  { %6902 = vmatpush1.bf16.msra.mxu1 %v8687_v5  ;;  %6731 = vmatprep.subr.bf16.mxu0 %v8694_v7  ;;  %v8741_v5 = vcombine.low %v3749_v50, %v3753_v51  ;;  %v8743_v7 = vcombine.low %v3750_v52, %v3754_v53  ;;  %v8752_v9 = vcombine.high %v3758_v61, %v3762_v1  ;;  %v3805_v51 = vld [vmem:[#allocation6 + $0x6c0] sm:$0xff]  ;;  %v3806_v53 = vld [vmem:[#allocation6 + $0x6c8] sm:$0xff] }
 0x268   :  { %6903 = vmatprep.subr.bf16.mxu1 %v8696_v8  ;;  %v8750_v8 = vcombine.high %v3757_v30, %v3761_v60  ;;  %v3809_v52 = vld [vmem:[#allocation6 + $0x6e0] sm:$0xff] }
 0x26a   :  { %6732 = vmatpush1.bf16.msra.mxu0 %v8693_v13  ;;  %v3770_v13 = vld [vmem:[#allocation6 + $0x5a8] sm:$0xff] }
 0x26b   :  { %6904 = vmatpush1.bf16.msra.mxu1 %v8695_v14  ;;  %6733 = vmatprep.subr.bf16.mxu0 %v8702_v15  ;;  %v8749_v14 = vcombine.low %v3757_v30, %v3761_v60  ;;  %v8751_v15 = vcombine.low %v3758_v61, %v3762_v1  ;;  %v8760_v17 = vcombine.high %v3766_v12, %v3770_v13  ;;  %v3813_v60 = vld [vmem:[#allocation6 + $0x700] sm:$0xff]  ;;  %v3814_v1 = vld [vmem:[#allocation6 + $0x708] sm:$0xff] }
 0x26c   :  { %6905 = vmatprep.subr.bf16.mxu1 %v8704_v16  ;;  %v8758_v16 = vcombine.high %v3765_v10, %v3769_v11  ;;  %v3817_v61 = vld [vmem:[#allocation6 + $0x720] sm:$0xff] }
 0x26e   :  { %6734 = vmatpush1.bf16.msra.mxu0 %v8701_v21  ;;  %v3778_v21 = vld [vmem:[#allocation6 + $0x5e8] sm:$0xff] }
 0x26f   :  { %6906 = vmatpush1.bf16.msra.mxu1 %v8703_v22  ;;  %6746 = vmatprep.subr.bf16.mxu0 %v8710_v23  ;;  %v8757_v22 = vcombine.low %v3765_v10, %v3769_v11  ;;  %v8759_v23 = vcombine.low %v3766_v12, %v3770_v13  ;;  %v8768_v25 = vcombine.high %v3774_v20, %v3778_v21  ;;  %v3821_v11 = vld [vmem:[#allocation6 + $0x740] sm:$0xff]  ;;  %v3822_v13 = vld [vmem:[#allocation6 + $0x748] sm:$0xff] }
 0x270   :  { %6918 = vmatprep.subr.bf16.mxu1 %v8712_v24  ;;  %v8766_v24 = vcombine.high %v3773_v18, %v3777_v19  ;;  %v3825_v12 = vld [vmem:[#allocation6 + $0x760] sm:$0xff] }
 0x271   :  { %6736 = vmatmul.mubr.bf16.vlgmr.msra.gmra.mrb[8].mxu0 %v9795_v59 }
 0x272   :  { %6908 = vmatmul.mubr.bf16.vlgmr.msra.gmra.mrb[8].mxu1 %v9795_v59  ;;  %6747 = vmatpush1.bf16.msra.mxu0 %v8709_v27  ;;  %v3785_v27 = vld [vmem:[#allocation6 + $0x620] sm:$0xff] }
 0x273   :  { %6778 = vmatprep.mubr.bf16.mxu0 %v9801_v2  ;;  %6919 = vmatpush1.bf16.msra.mxu1 %v8711_v31  ;;  %v8765_v31 = vcombine.low %v3773_v18, %v3777_v19  ;;  %v8774_v33 = vcombine.high %v3781_v26, %v3785_v27  ;;  %v3829_v19 = vld [vmem:[#allocation6 + $0x780] sm:$0xff] }
 0x274   :  { %6950 = vmatprep.mubr.bf16.mxu1 %v9801_v2  ;;  %6748 = vmatprep.subr.bf16.mxu0 %v8718_v32  ;;  %v8767_v32 = vcombine.low %v3774_v20, %v3778_v21  ;;  %v3833_v20 = vld [vmem:[#allocation6 + $0x7a0] sm:$0xff]  ;;  %v3830_v21 = vld [vmem:[#allocation6 + $0x788] sm:$0xff] }
 0x275   :  { %6920 = vmatprep.subr.bf16.mxu1 %v8720_v35  ;;  %v3789_v35 = vld [vmem:[#allocation6 + $0x640] sm:$0xff] }
 0x276   :  { %6749 = vmatpush1.bf16.msra.mxu0 %v8717_v38  ;;  %v3794_v38 = vld [vmem:[#allocation6 + $0x668] sm:$0xff] }
 0x277   :  { %6921 = vmatpush1.bf16.msra.mxu1 %v8719_v39  ;;  %6750 = vmatprep.subr.bf16.mxu0 %v8726_v40  ;;  %v8773_v39 = vcombine.low %v3781_v26, %v3785_v27  ;;  %v8775_v40 = vcombine.low %v3782_v28, %v3786_v29  ;;  %v8784_v42 = vcombine.high %v3790_v37, %v3794_v38  ;;  %v3837_v27 = vld [vmem:[#allocation6 + $0x7c0] sm:$0xff]  ;;  %v3838_v29 = vld [vmem:[#allocation6 + $0x7c8] sm:$0xff] }
 0x278   :  { %6922 = vmatprep.subr.bf16.mxu1 %v8728_v41  ;;  %v8782_v41 = vcombine.high %v3789_v35, %v3793_v36  ;;  %v3841_v28 = vld [vmem:[#allocation6 + $0x7e0] sm:$0xff] }
 0x27a   :  { %6751 = vmatpush1.bf16.msra.mxu0 %v8725_v46  ;;  %v3802_v46 = vld [vmem:[#allocation6 + $0x6a8] sm:$0xff] }
 0x27b   :  { %6923 = vmatpush1.bf16.msra.mxu1 %v8727_v47  ;;  %6752 = vmatprep.subr.bf16.mxu0 %v8734_v48  ;;  %v8781_v47 = vcombine.low %v3789_v35, %v3793_v36  ;;  %v8783_v48 = vcombine.low %v3790_v37, %v3794_v38  ;;  %v8792_v50 = vcombine.high %v3798_v45, %v3802_v46  ;;  %v3845_v36 = vld [vmem:[#allocation6 + $0x800] sm:$0xff]  ;;  %v3846_v38 = vld [vmem:[#allocation6 + $0x808] sm:$0xff] }
 0x27c   :  { %6924 = vmatprep.subr.bf16.mxu1 %v8736_v49  ;;  %v8790_v49 = vcombine.high %v3797_v43, %v3801_v44  ;;  %v3849_v37 = vld [vmem:[#allocation6 + $0x820] sm:$0xff] }
 0x27e   :  { %6753 = vmatpush1.bf16.msra.mxu0 %v8733_v54  ;;  %v3810_v54 = vld [vmem:[#allocation6 + $0x6e8] sm:$0xff] }
 0x27f   :  { %6925 = vmatpush1.bf16.msra.mxu1 %v8735_v55  ;;  %6754 = vmatprep.subr.bf16.mxu0 %v8742_v57  ;;  %v8789_v55 = vcombine.low %v3797_v43, %v3801_v44  ;;  %v8791_v57 = vcombine.low %v3798_v45, %v3802_v46  ;;  %v8800_v30 = vcombine.high %v3806_v53, %v3810_v54  ;;  %v3853_v44 = vld [vmem:[#allocation6 + $0x840] sm:$0xff]  ;;  %v3854_v46 = vld [vmem:[#allocation6 + $0x848] sm:$0xff] }
 0x280   :  { %6926 = vmatprep.subr.bf16.mxu1 %v8744_v58  ;;  %v8798_v58 = vcombine.high %v3805_v51, %v3809_v52  ;;  %v3857_v45 = vld [vmem:[#allocation6 + $0x860] sm:$0xff] }
 0x282   :  { %6755 = vmatpush1.bf16.msra.mxu0 %v8741_v5  ;;  %v3818_v5 = vld [vmem:[#allocation6 + $0x728] sm:$0xff] }
 0x283   :  { %6927 = vmatpush1.bf16.msra.mxu1 %v8743_v7  ;;  %6756 = vmatprep.subr.bf16.mxu0 %v8750_v8  ;;  %v8797_v7 = vcombine.low %v3805_v51, %v3809_v52  ;;  %v8799_v8 = vcombine.low %v3806_v53, %v3810_v54  ;;  %v8808_v10 = vcombine.high %v3814_v1, %v3818_v5  ;;  %v3861_v52 = vld [vmem:[#allocation6 + $0x880] sm:$0xff]  ;;  %v3862_v54 = vld [vmem:[#allocation6 + $0x888] sm:$0xff] }
 0x284   :  { %6928 = vmatprep.subr.bf16.mxu1 %v8752_v9  ;;  %v8806_v9 = vcombine.high %v3813_v60, %v3817_v61  ;;  %v3865_v53 = vld [vmem:[#allocation6 + $0x8a0] sm:$0xff] }
 0x286   :  { %6757 = vmatpush1.bf16.msra.mxu0 %v8749_v14  ;;  %v3826_v14 = vld [vmem:[#allocation6 + $0x768] sm:$0xff] }
 0x287   :  { %6929 = vmatpush1.bf16.msra.mxu1 %v8751_v15  ;;  %6758 = vmatprep.subr.bf16.mxu0 %v8758_v16  ;;  %v8805_v15 = vcombine.low %v3813_v60, %v3817_v61  ;;  %v8807_v16 = vcombine.low %v3814_v1, %v3818_v5  ;;  %v8816_v18 = vcombine.high %v3822_v13, %v3826_v14  ;;  %v3869_v61 = vld [vmem:[#allocation6 + $0x8c0] sm:$0xff]  ;;  %v3870_v5 = vld [vmem:[#allocation6 + $0x8c8] sm:$0xff] }
 0x288   :  { %6930 = vmatprep.subr.bf16.mxu1 %v8760_v17  ;;  %v8814_v17 = vcombine.high %v3821_v11, %v3825_v12  ;;  %v3873_v1 = vld [vmem:[#allocation6 + $0x8e0] sm:$0xff] }
 0x28a   :  { %6759 = vmatpush1.bf16.msra.mxu0 %v8757_v22  ;;  %v3834_v22 = vld [vmem:[#allocation6 + $0x7a8] sm:$0xff] }
 0x28b   :  { %6931 = vmatpush1.bf16.msra.mxu1 %v8759_v23  ;;  %6760 = vmatprep.subr.bf16.mxu0 %v8766_v24  ;;  %v8813_v23 = vcombine.low %v3821_v11, %v3825_v12  ;;  %v8815_v24 = vcombine.low %v3822_v13, %v3826_v14  ;;  %v8824_v26 = vcombine.high %v3830_v21, %v3834_v22  ;;  %v3877_v12 = vld [vmem:[#allocation6 + $0x900] sm:$0xff]  ;;  %v3878_v14 = vld [vmem:[#allocation6 + $0x908] sm:$0xff] }
 0x28c   :  { %6932 = vmatprep.subr.bf16.mxu1 %v8768_v25  ;;  %v8822_v25 = vcombine.high %v3829_v19, %v3833_v20  ;;  %v3881_v13 = vld [vmem:[#allocation6 + $0x920] sm:$0xff] }
 0x28e   :  { %6761 = vmatpush1.bf16.msra.mxu0 %v8765_v31  ;;  %v3842_v31 = vld [vmem:[#allocation6 + $0x7e8] sm:$0xff] }
 0x28f   :  { %6933 = vmatpush1.bf16.msra.mxu1 %v8767_v32  ;;  %6762 = vmatprep.subr.bf16.mxu0 %v8774_v33  ;;  %v8821_v32 = vcombine.low %v3829_v19, %v3833_v20  ;;  %v8823_v33 = vcombine.low %v3830_v21, %v3834_v22  ;;  %v8832_v35 = vcombine.high %v3838_v29, %v3842_v31  ;;  %v3885_v20 = vld [vmem:[#allocation6 + $0x940] sm:$0xff]  ;;  %v3886_v22 = vld [vmem:[#allocation6 + $0x948] sm:$0xff] }
 0x290   :  { %6934 = vmatprep.subr.bf16.mxu1 %v8776_v34  ;;  %v8830_v34 = vcombine.high %v3837_v27, %v3841_v28  ;;  %v3889_v21 = vld [vmem:[#allocation6 + $0x960] sm:$0xff] }
 0x292   :  { %6763 = vmatpush1.bf16.msra.mxu0 %v8773_v39  ;;  %v3850_v39 = vld [vmem:[#allocation6 + $0x828] sm:$0xff] }
 0x293   :  { %6935 = vmatpush1.bf16.msra.mxu1 %v8775_v40  ;;  %6764 = vmatprep.subr.bf16.mxu0 %v8782_v41  ;;  %v8829_v40 = vcombine.low %v3837_v27, %v3841_v28  ;;  %v8831_v41 = vcombine.low %v3838_v29, %v3842_v31  ;;  %v8840_v43 = vcombine.high %v3846_v38, %v3850_v39  ;;  %v3893_v28 = vld [vmem:[#allocation6 + $0x980] sm:$0xff]  ;;  %v3894_v31 = vld [vmem:[#allocation6 + $0x988] sm:$0xff] }
 0x294   :  { %6936 = vmatprep.subr.bf16.mxu1 %v8784_v42  ;;  %v8838_v42 = vcombine.high %v3845_v36, %v3849_v37  ;;  %v3897_v29 = vld [vmem:[#allocation6 + $0x9a0] sm:$0xff] }
 0x296   :  { %6765 = vmatpush1.bf16.msra.mxu0 %v8781_v47  ;;  %v3858_v47 = vld [vmem:[#allocation6 + $0x868] sm:$0xff] }
 0x297   :  { %6937 = vmatpush1.bf16.msra.mxu1 %v8783_v48  ;;  %6766 = vmatprep.subr.bf16.mxu0 %v8790_v49  ;;  %v8837_v48 = vcombine.low %v3845_v36, %v3849_v37  ;;  %v8839_v49 = vcombine.low %v3846_v38, %v3850_v39  ;;  %v8848_v51 = vcombine.high %v3854_v46, %v3858_v47  ;;  %v3901_v37 = vld [vmem:[#allocation6 + $0x9c0] sm:$0xff]  ;;  %v3902_v39 = vld [vmem:[#allocation6 + $0x9c8] sm:$0xff] }
 0x298   :  { %6938 = vmatprep.subr.bf16.mxu1 %v8792_v50  ;;  %v8846_v50 = vcombine.high %v3853_v44, %v3857_v45  ;;  %v3905_v38 = vld [vmem:[#allocation6 + $0x9e0] sm:$0xff] }
 0x29a   :  { %6767 = vmatpush1.bf16.msra.mxu0 %v8789_v55  ;;  %v3866_v55 = vld [vmem:[#allocation6 + $0x8a8] sm:$0xff] }
 0x29b   :  { %6939 = vmatpush1.bf16.msra.mxu1 %v8791_v57  ;;  %6768 = vmatprep.subr.bf16.mxu0 %v8798_v58  ;;  %v8845_v57 = vcombine.low %v3853_v44, %v3857_v45  ;;  %v8847_v58 = vcombine.low %v3854_v46, %v3858_v47  ;;  %v8856_v60 = vcombine.high %v3862_v54, %v3866_v55  ;;  %v3909_v45 = vld [vmem:[#allocation6 + $0xa00] sm:$0xff]  ;;  %v3910_v47 = vld [vmem:[#allocation6 + $0xa08] sm:$0xff] }
 0x29c   :  { %6940 = vmatprep.subr.bf16.mxu1 %v8800_v30  ;;  %v8854_v30 = vcombine.high %v3861_v52, %v3865_v53  ;;  %v3913_v46 = vld [vmem:[#allocation6 + $0xa20] sm:$0xff] }
 0x29e   :  { %6769 = vmatpush1.bf16.msra.mxu0 %v8797_v7  ;;  %v3874_v7 = vld [vmem:[#allocation6 + $0x8e8] sm:$0xff] }
 0x29f   :  { %6941 = vmatpush1.bf16.msra.mxu1 %v8799_v8  ;;  %6770 = vmatprep.subr.bf16.mxu0 %v8806_v9  ;;  %v8853_v8 = vcombine.low %v3861_v52, %v3865_v53  ;;  %v8855_v9 = vcombine.low %v3862_v54, %v3866_v55  ;;  %v8864_v11 = vcombine.high %v3870_v5, %v3874_v7  ;;  %v3917_v53 = vld [vmem:[#allocation6 + $0xa40] sm:$0xff]  ;;  %v3918_v55 = vld [vmem:[#allocation6 + $0xa48] sm:$0xff] }
 0x2a0   :  { %6942 = vmatprep.subr.bf16.mxu1 %v8808_v10  ;;  %v8862_v10 = vcombine.high %v3869_v61, %v3873_v1  ;;  %v3921_v54 = vld [vmem:[#allocation6 + $0xa60] sm:$0xff] }
 0x2a2   :  { %6771 = vmatpush1.bf16.msra.mxu0 %v8805_v15  ;;  %v3882_v15 = vld [vmem:[#allocation6 + $0x928] sm:$0xff] }
 0x2a3   :  { %6943 = vmatpush1.bf16.msra.mxu1 %v8807_v16  ;;  %6772 = vmatprep.subr.bf16.mxu0 %v8814_v17  ;;  %v8861_v16 = vcombine.low %v3869_v61, %v3873_v1  ;;  %v8863_v17 = vcombine.low %v3870_v5, %v3874_v7  ;;  %v8872_v19 = vcombine.high %v3878_v14, %v3882_v15  ;;  %v3925_v1 = vld [vmem:[#allocation6 + $0xa80] sm:$0xff]  ;;  %v3926_v7 = vld [vmem:[#allocation6 + $0xa88] sm:$0xff] }
 0x2a4   :  { %6944 = vmatprep.subr.bf16.mxu1 %v8816_v18  ;;  %v8870_v18 = vcombine.high %v3877_v12, %v3881_v13  ;;  %v3929_v5 = vld [vmem:[#allocation6 + $0xaa0] sm:$0xff] }
 0x2a6   :  { %6773 = vmatpush1.bf16.msra.mxu0 %v8813_v23  ;;  %v3890_v23 = vld [vmem:[#allocation6 + $0x968] sm:$0xff] }
 0x2a7   :  { %6945 = vmatpush1.bf16.msra.mxu1 %v8815_v24  ;;  %6774 = vmatprep.subr.bf16.mxu0 %v8822_v25  ;;  %v8869_v24 = vcombine.low %v3877_v12, %v3881_v13  ;;  %v8871_v25 = vcombine.low %v3878_v14, %v3882_v15  ;;  %v8880_v27 = vcombine.high %v3886_v22, %v3890_v23  ;;  %v3933_v13 = vld [vmem:[#allocation6 + $0xac0] sm:$0xff]  ;;  %v3934_v15 = vld [vmem:[#allocation6 + $0xac8] sm:$0xff] }
 0x2a8   :  { %6946 = vmatprep.subr.bf16.mxu1 %v8824_v26  ;;  %v8878_v26 = vcombine.high %v3885_v20, %v3889_v21  ;;  %v3937_v14 = vld [vmem:[#allocation6 + $0xae0] sm:$0xff] }
 0x2aa   :  { %6775 = vmatpush1.bf16.msra.mxu0 %v8821_v32  ;;  %v3898_v32 = vld [vmem:[#allocation6 + $0x9a8] sm:$0xff] }
 0x2ab   :  { %6947 = vmatpush1.bf16.msra.mxu1 %v8823_v33  ;;  %6776 = vmatprep.subr.bf16.mxu0 %v8830_v34  ;;  %v8877_v33 = vcombine.low %v3885_v20, %v3889_v21  ;;  %v8879_v34 = vcombine.low %v3886_v22, %v3890_v23  ;;  %v8888_v36 = vcombine.high %v3894_v31, %v3898_v32  ;;  %v3941_v21 = vld [vmem:[#allocation6 + $0xb00] sm:$0xff]  ;;  %v3942_v23 = vld [vmem:[#allocation6 + $0xb08] sm:$0xff] }
 0x2ac   :  { %6948 = vmatprep.subr.bf16.mxu1 %v8832_v35  ;;  %v8886_v35 = vcombine.high %v3893_v28, %v3897_v29  ;;  %v3945_v22 = vld [vmem:[#allocation6 + $0xb20] sm:$0xff] }
 0x2ae   :  { %6777 = vmatpush1.bf16.msra.mxu0 %v8829_v40  ;;  %v3906_v40 = vld [vmem:[#allocation6 + $0x9e8] sm:$0xff] }
 0x2af   :  { %6949 = vmatpush1.bf16.msra.mxu1 %v8831_v41  ;;  %6789 = vmatprep.subr.bf16.mxu0 %v8838_v42  ;;  %v8885_v41 = vcombine.low %v3893_v28, %v3897_v29  ;;  %v8887_v42 = vcombine.low %v3894_v31, %v3898_v32  ;;  %v8896_v44 = vcombine.high %v3902_v39, %v3906_v40  ;;  %v3949_v29 = vld [vmem:[#allocation6 + $0xb40] sm:$0xff]  ;;  %v3950_v32 = vld [vmem:[#allocation6 + $0xb48] sm:$0xff] }
 0x2b0   :  { %6961 = vmatprep.subr.bf16.mxu1 %v8840_v43  ;;  %v8894_v43 = vcombine.high %v3901_v37, %v3905_v38  ;;  %v3953_v31 = vld [vmem:[#allocation6 + $0xb60] sm:$0xff] }
 0x2b1   :  { %6779 = vmatmul.mubr.bf16.vlgmr.msra.gmra.mrb[8].mxu0 %v9797_v63 }
 0x2b2   :  { %6951 = vmatmul.mubr.bf16.vlgmr.msra.gmra.mrb[8].mxu1 %v9797_v63  ;;  %6790 = vmatpush1.bf16.msra.mxu0 %v8837_v48  ;;  %v3914_v48 = vld [vmem:[#allocation6 + $0xa28] sm:$0xff] }
 0x2b3   :  { %6962 = vmatpush1.bf16.msra.mxu1 %v8839_v49  ;;  %6791 = vmatprep.subr.bf16.mxu0 %v8846_v50  ;;  %v8893_v49 = vcombine.low %v3901_v37, %v3905_v38  ;;  %v8895_v50 = vcombine.low %v3902_v39, %v3906_v40  ;;  %v8904_v52 = vcombine.high %v3910_v47, %v3914_v48  ;;  %v3957_v38 = vld [vmem:[#allocation6 + $0xb80] sm:$0xff]  ;;  %v3958_v40 = vld [vmem:[#allocation6 + $0xb88] sm:$0xff] }
 0x2b4   :  { %6963 = vmatprep.subr.bf16.mxu1 %v8848_v51  ;;  %v8902_v51 = vcombine.high %v3909_v45, %v3913_v46  ;;  %v3961_v39 = vld [vmem:[#allocation6 + $0xba0] sm:$0xff] }
 0x2b6   :  { %6792 = vmatpush1.bf16.msra.mxu0 %v8845_v57  ;;  %v3922_v57 = vld [vmem:[#allocation6 + $0xa68] sm:$0xff] }
 0x2b7   :  { %6964 = vmatpush1.bf16.msra.mxu1 %v8847_v58  ;;  %6793 = vmatprep.subr.bf16.mxu0 %v8854_v30  ;;  %v8901_v58 = vcombine.low %v3909_v45, %v3913_v46  ;;  %v8903_v30 = vcombine.low %v3910_v47, %v3914_v48  ;;  %v8912_v61 = vcombine.high %v3918_v55, %v3922_v57  ;;  %v3965_v46 = vld [vmem:[#allocation6 + $0xbc0] sm:$0xff]  ;;  %v3966_v48 = vld [vmem:[#allocation6 + $0xbc8] sm:$0xff] }
 0x2b8   :  { %6965 = vmatprep.subr.bf16.mxu1 %v8856_v60  ;;  %v8910_v60 = vcombine.high %v3917_v53, %v3921_v54  ;;  %v3969_v47 = vld [vmem:[#allocation6 + $0xbe0] sm:$0xff] }
 0x2ba   :  { %6794 = vmatpush1.bf16.msra.mxu0 %v8853_v8  ;;  %v3930_v8 = vld [vmem:[#allocation6 + $0xaa8] sm:$0xff] }
 0x2bb   :  { %6966 = vmatpush1.bf16.msra.mxu1 %v8855_v9  ;;  %6795 = vmatprep.subr.bf16.mxu0 %v8862_v10  ;;  %v8909_v9 = vcombine.low %v3917_v53, %v3921_v54  ;;  %v8911_v10 = vcombine.low %v3918_v55, %v3922_v57  ;;  %v8920_v12 = vcombine.high %v3926_v7, %v3930_v8  ;;  %v9814_v54 = vld [vmem:[#allocation6 + $0xc00] sm:$0xff]  ;;  %v9818_v57 = vld [vmem:[#allocation6 + $0xc08] sm:$0xff] }
 0x2bc   :  { %6967 = vmatprep.subr.bf16.mxu1 %v8864_v11  ;;  %v8918_v11 = vcombine.high %v3925_v1, %v3929_v5  ;;  %v9816_v55 = vld [vmem:[#allocation6 + $0xc20] sm:$0xff] }
 0x2be   :  { %6796 = vmatpush1.bf16.msra.mxu0 %v8861_v16  ;;  %v3938_v16 = vld [vmem:[#allocation6 + $0xae8] sm:$0xff] }
 0x2bf   :  { %6968 = vmatpush1.bf16.msra.mxu1 %v8863_v17  ;;  %6797 = vmatprep.subr.bf16.mxu0 %v8870_v18  ;;  %v8917_v17 = vcombine.low %v3925_v1, %v3929_v5  ;;  %v8919_v18 = vcombine.low %v3926_v7, %v3930_v8  ;;  %v8928_v20 = vcombine.high %v3934_v15, %v3938_v16  ;;  %v579_v5 = vsub.s32 4, %v9781_v56 }
 0x2c0   :  { %6969 = vmatprep.subr.bf16.mxu1 %v8872_v19  ;;  %v8926_v19 = vcombine.high %v3933_v13, %v3937_v14  ;;  %v587_v7 = vsub.s32 6, %v9781_v56  ;;  %v583_v8 = vsub.s32 5, %v9781_v56 }
 0x2c2   :  { %6798 = vmatpush1.bf16.msra.mxu0 %v8869_v24  ;;  %v3946_v24 = vld [vmem:[#allocation6 + $0xb28] sm:$0xff] }
 0x2c3   :  { %6970 = vmatpush1.bf16.msra.mxu1 %v8871_v25  ;;  %6799 = vmatprep.subr.bf16.mxu0 %v8878_v26  ;;  %v8925_v25 = vcombine.low %v3933_v13, %v3937_v14  ;;  %v8927_v26 = vcombine.low %v3934_v15, %v3938_v16  ;;  %v8936_v28 = vcombine.high %v3942_v23, %v3946_v24 }
 0x2c4   :  { %6971 = vmatprep.subr.bf16.mxu1 %v8880_v27  ;;  %v8934_v27 = vcombine.high %v3941_v21, %v3945_v22 }
 0x2c6   :  { %6800 = vmatpush1.bf16.msra.mxu0 %v8877_v33  ;;  %v3954_v33 = vld [vmem:[#allocation6 + $0xb68] sm:$0xff] }
 0x2c7   :  { %6972 = vmatpush1.bf16.msra.mxu1 %v8879_v34  ;;  %6801 = vmatprep.subr.bf16.mxu0 %v8886_v35  ;;  %v8933_v34 = vcombine.low %v3941_v21, %v3945_v22  ;;  %v8935_v35 = vcombine.low %v3942_v23, %v3946_v24  ;;  %v8944_v37 = vcombine.high %v3950_v32, %v3954_v33 }
 0x2c8   :  { %6973 = vmatprep.subr.bf16.mxu1 %v8888_v36  ;;  %v8942_v36 = vcombine.high %v3949_v29, %v3953_v31 }
 0x2ca   :  { %6802 = vmatpush1.bf16.msra.mxu0 %v8885_v41  ;;  %v3962_v41 = vld [vmem:[#allocation6 + $0xba8] sm:$0xff] }
 0x2cb   :  { %6974 = vmatpush1.bf16.msra.mxu1 %v8887_v42  ;;  %6803 = vmatprep.subr.bf16.mxu0 %v8894_v43  ;;  %v8941_v42 = vcombine.low %v3949_v29, %v3953_v31  ;;  %v8943_v43 = vcombine.low %v3950_v32, %v3954_v33  ;;  %v8952_v45 = vcombine.high %v3958_v40, %v3962_v41 }
 0x2cc   :  { %6975 = vmatprep.subr.bf16.mxu1 %v8896_v44  ;;  %v8950_v44 = vcombine.high %v3957_v38, %v3961_v39 }
 0x2ce   :  { %6804 = vmatpush1.bf16.msra.mxu0 %v8893_v49  ;;  %v3970_v49 = vld [vmem:[#allocation6 + $0xbe8] sm:$0xff] }
 0x2cf   :  { %6976 = vmatpush1.bf16.msra.mxu1 %v8895_v50  ;;  %6805 = vmatprep.subr.bf16.mxu0 %v8902_v51  ;;  %v8949_v50 = vcombine.low %v3957_v38, %v3961_v39  ;;  %v8951_v51 = vcombine.low %v3958_v40, %v3962_v41  ;;  %v8960_v53 = vcombine.high %v3966_v48, %v3970_v49  ;;  %v3981_v38 = vld [vmem:[#allocation6 + $0xc40] sm:$0xff] }
 0x2d0   :  { %6977 = vmatprep.subr.bf16.mxu1 %v8904_v52  ;;  %v8958_v52 = vcombine.high %v3965_v46, %v3969_v47 }
 0x2d2   :  { %6806 = vmatpush1.bf16.msra.mxu0 %v8901_v58  ;;  %v9820_v58 = vld [vmem:[#allocation6 + $0xc28] sm:$0xff] }
 0x2d3   :  { %6978 = vmatpush1.bf16.msra.mxu1 %v8903_v30  ;;  %6807 = vmatprep.subr.bf16.mxu0 %v8910_v60  ;;  %v8957_v30 = vcombine.low %v3965_v46, %v3969_v47  ;;  %v8959_v60 = vcombine.low %v3966_v48, %v3970_v49  ;;  %v8968_v1 = vcombine.high %v9818_v57, %v9820_v58 }
 0x2d4   :  { %6979 = vmatprep.subr.bf16.mxu1 %v8912_v61  ;;  %v8966_v61 = vcombine.high %v9814_v54, %v9816_v55  ;;  %v8965_v47 = vcombine.low %v9814_v54, %v9816_v55  ;;  %v8967_v48 = vcombine.low %v9818_v57, %v9820_v58 }
 0x2d6   :  { %6808 = vmatpush1.bf16.msra.mxu0 %v8909_v9  ;;  %v591_v9 = vsub.s32 7, %v9781_v56 }
 0x2d7   :  { %6980 = vmatpush1.bf16.msra.mxu1 %v8911_v10  ;;  %6809 = vmatprep.subr.bf16.mxu0 %v8918_v11  ;;  %v9474_v10 = vld [vmem:[#allocation4] sm:$0xff] }
 0x2d8   :  { %6981 = vmatprep.subr.bf16.mxu1 %v8920_v12  ;;  %v580_v11 = vrot.slane %v9474_v10, %v579_v5  ;;  %v588_v12 = vrot.slane %v9474_v10, %v587_v7  ;;  %v584_v13 = vrot.slane %v9474_v10, %v583_v8  ;;  %v592_v14 = vrot.slane %v9474_v10, %v591_v9  ;;  %v3998_v10 = vld [vmem:[#allocation6 + $0xcc8] sm:$0xff] }
 0x2da   :  { %6810 = vmatpush1.bf16.msra.mxu0 %v8917_v17 }
 0x2db   :  { %6982 = vmatpush1.bf16.msra.mxu1 %v8919_v18  ;;  %6811 = vmatprep.subr.bf16.mxu0 %v8926_v19 }
 0x2dc   :  { %6983 = vmatprep.subr.bf16.mxu1 %v8928_v20 }
 0x2de   :  { %6812 = vmatpush1.bf16.msra.mxu0 %v8925_v25 }
 0x2df   :  { %6984 = vmatpush1.bf16.msra.mxu1 %v8927_v26  ;;  %6813 = vmatprep.subr.bf16.mxu0 %v8934_v27 }
 0x2e0   :  { %6985 = vmatprep.subr.bf16.mxu1 %v8936_v28 }
 0x2e2   :  { %6814 = vmatpush1.bf16.msra.mxu0 %v8933_v34 }
 0x2e3   :  { %6986 = vmatpush1.bf16.msra.mxu1 %v8935_v35  ;;  %6815 = vmatprep.subr.bf16.mxu0 %v8942_v36 }
 0x2e4   :  { %6987 = vmatprep.subr.bf16.mxu1 %v8944_v37 }
 0x2e6   :  { %6816 = vmatpush1.bf16.msra.mxu0 %v8941_v42  ;;  %v3985_v42 = vld [vmem:[#allocation6 + $0xc60] sm:$0xff] }
 0x2e7   :  { %6988 = vmatpush1.bf16.msra.mxu1 %v8943_v43  ;;  %6817 = vmatprep.subr.bf16.mxu0 %v8950_v44  ;;  %v3982_v43 = vld [vmem:[#allocation6 + $0xc48] sm:$0xff]  ;;  %v8973_v54 = vcombine.low %v3981_v38, %v3985_v42 }
 0x2e8   :  { %6989 = vmatprep.subr.bf16.mxu1 %v8952_v45  ;;  %v3986_v44 = vld [vmem:[#allocation6 + $0xc68] sm:$0xff] }
 0x2e9   :  { %v8975_v55 = vcombine.low %v3982_v43, %v3986_v44 }
 0x2ea   :  { %6818 = vmatpush1.bf16.msra.mxu0 %v8949_v50  ;;  %v3989_v50 = vld [vmem:[#allocation6 + $0xc80] sm:$0xff] }
 0x2eb   :  { %6990 = vmatpush1.bf16.msra.mxu1 %v8951_v51  ;;  %6819 = vmatprep.subr.bf16.mxu0 %v8958_v52  ;;  %v8974_v51 = vcombine.high %v3981_v38, %v3985_v42  ;;  %v8976_v52 = vcombine.high %v3982_v43, %v3986_v44  ;;  %v4029_v42 = vld [vmem:[#allocation6 + $0xdc0] sm:$0xff]  ;;  %v4030_v44 = vld [vmem:[#allocation6 + $0xdc8] sm:$0xff] }
 0x2ec   :  { %6991 = vmatprep.subr.bf16.mxu1 %v8960_v53  ;;  %v3993_v53 = vld [vmem:[#allocation6 + $0xca0] sm:$0xff] }
 0x2ed   :  { %v8982_v57 = vcombine.high %v3989_v50, %v3993_v53  ;;  %v4033_v43 = vld [vmem:[#allocation6 + $0xde0] sm:$0xff] }
 0x2ee   :  { %6820 = vmatpush1.bf16.msra.mxu0 %v8957_v30  ;;  %v3990_v30 = vld [vmem:[#allocation6 + $0xc88] sm:$0xff] }
 0x2ef   :  { %6992 = vmatpush1.bf16.msra.mxu1 %v8959_v60  ;;  %6832 = vmatprep.subr.bf16.mxu0 %v8966_v61  ;;  %v3994_v60 = vld [vmem:[#allocation6 + $0xca8] sm:$0xff]  ;;  %v3997_v61 = vld [vmem:[#allocation6 + $0xcc0] sm:$0xff] }
 0x2f0   :  { %7004 = vmatprep.subr.bf16.mxu1 %v8968_v1  ;;  %v8984_v58 = vcombine.high %v3990_v30, %v3994_v60  ;;  %v4001_v1 = vld [vmem:[#allocation6 + $0xce0] sm:$0xff] }
 0x304   :  { %v3384_v15 = vpop.f32.mrb[4].mxu0  ;;  %v3556_v17 = vpop.f32.mrb[4].mxu1 }
 0x305   :  { %v9254_v16 = vadd.f32 %v3384_v15, %v580_v11  ;;  %v3386_v18 = vpop.f32.mrb[5].mxu0  ;;  %v9258_v19 = vadd.f32 %v3556_v17, %v588_v12  ;;  %v3558_v21 = vpop.f32.mrb[5].mxu1  ;;  %v4009_v17 = vld [vmem:[#allocation6 + $0xd20] sm:$0xff] }
 0x306   :  { %v9255_v20 = vadd.f32 %v3386_v18, %v584_v13  ;;  %v3388_v22 = vpop.f32.mrb[6].mxu0  ;;  %v9259_v23 = vadd.f32 %v3558_v21, %v592_v14  ;;  %v3560_v25 = vpop.f32.mrb[6].mxu1  ;;  %v4006_v18 = vld [vmem:[#allocation6 + $0xd08] sm:$0xff] }
 0x307   :  { %v9256_v24 = vadd.f32 %v3388_v22, %v580_v11  ;;  %v3390_v26 = vpop.f32.mrb[7].mxu0  ;;  %v9260_v27 = vadd.f32 %v3560_v25, %v588_v12  ;;  %v3562_v29 = vpop.f32.mrb[7].mxu1  ;;  %v3569_v31 = vmax.f32 %v9254_v16, 0.0  ;;  %v3571_v34 = vmax.f32 %v9258_v19, 0.0  ;;  %v4002_v11 = vld [vmem:[#allocation6 + $0xce8] sm:$0xff]  ;;  %v4005_v16 = vld [vmem:[#allocation6 + $0xd00] sm:$0xff] }
 0x308   :  { %v9257_v28 = vadd.f32 %v3390_v26, %v584_v13  ;;  %v9261_v33 = vadd.f32 %v3562_v29, %v592_v14  ;;  %v3570_v35 = vmax.f32 %v9255_v20, 0.0  ;;  %v3572_v39 = vmax.f32 %v9259_v23, 0.0  ;;  %v4010_v19 = vld [vmem:[#allocation6 + $0xd28] sm:$0xff]  ;;  %v4017_v25 = vld [vmem:[#allocation6 + $0xd60] sm:$0xff] }
 0x309   :  { %v3577_v32 = vmax.f32 %v9256_v24, 0.0  ;;  %v3579_v36 = vmax.f32 %v9260_v27, 0.0  ;;  %v8981_v12 = vcombine.low %v3989_v50, %v3993_v53  ;;  %v8983_v13 = vcombine.low %v3990_v30, %v3994_v60  ;;  %v4013_v24 = vld [vmem:[#allocation6 + $0xd40] sm:$0xff]  ;;  %v4014_v26 = vld [vmem:[#allocation6 + $0xd48] sm:$0xff] }
 0x30a   :  { %v3578_v37 = vmax.f32 %v9257_v28, 0.0  ;;  %v3580_v41 = vmax.f32 %v9261_v33, 0.0  ;;  %v8990_v14 = vcombine.high %v3997_v61, %v4001_v1  ;;  %v8992_v15 = vcombine.high %v3998_v10, %v4002_v11  ;;  %v4018_v27 = vld [vmem:[#allocation6 + $0xd68] sm:$0xff]  ;;  %v4021_v33 = vld [vmem:[#allocation6 + $0xd80] sm:$0xff] }
 0x30b   :  { %v9838_v40 = vpack.c.bf16 %v3577_v32, %v3569_v31  ;;  %v9840_v45 = vpack.c.bf16 %v3579_v36, %v3571_v34  ;;  %v8989_v20 = vcombine.low %v3997_v61, %v4001_v1  ;;  %v8991_v21 = vcombine.low %v3998_v10, %v4002_v11  ;;  %v4025_v34 = vld [vmem:[#allocation6 + $0xda0] sm:$0xff]  ;;  %v4026_v36 = vld [vmem:[#allocation6 + $0xda8] sm:$0xff] }
 0x30c   :  { %v9842_v46 = vpack.c.bf16 %v3578_v37, %v3570_v35  ;;  %v9848_v49 = vpack.c.bf16 %v3580_v41, %v3572_v39  ;;  %v8998_v22 = vcombine.high %v4005_v16, %v4009_v17  ;;  %v9000_v23 = vcombine.high %v4006_v18, %v4010_v19  ;;  %v4022_v35 = vld [vmem:[#allocation6 + $0xd88] sm:$0xff]  ;;  %v4037_v53 = vld [vmem:[#allocation6 + $0xe00] sm:$0xff] }
 0x30d   :  { %v8997_v28 = vcombine.low %v4005_v16, %v4009_v17  ;;  %v8999_v29 = vcombine.low %v4006_v18, %v4010_v19  ;;  %v9006_v31 = vcombine.high %v4013_v24, %v4017_v25  ;;  %v9008_v32 = vcombine.high %v4014_v26, %v4018_v27  ;;  %v4041_v30 = vld [vmem:[#allocation6 + $0xe20] sm:$0xff]  ;;  %v4038_v60 = vld [vmem:[#allocation6 + $0xe08] sm:$0xff] }
 0x30e   :  { %6821 = vmatprep.mubr.bf16.mxu0 %v9842_v46  ;;  %6993 = vmatprep.mubr.bf16.mxu1 %v9842_v46  ;;  %v9005_v37 = vcombine.low %v4013_v24, %v4017_v25  ;;  %v9007_v38 = vcombine.low %v4014_v26, %v4018_v27  ;;  %v9014_v39 = vcombine.high %v4021_v33, %v4025_v34  ;;  %v4045_v1 = vld [vmem:[#allocation6 + $0xe40] sm:$0xff]  ;;  %v4046_v11 = vld [vmem:[#allocation6 + $0xe48] sm:$0xff] }
 0x30f   :  { %6822 = vmatmul.mubr.bf16.vlgmr.msra.gmra.mrb[8].mxu0 %v9838_v40  ;;  %6994 = vmatmul.mubr.bf16.vlgmr.msra.gmra.mrb[8].mxu1 %v9838_v40  ;;  %v9016_v41 = vcombine.high %v4022_v35, %v4026_v36  ;;  %v9015_v50 = vcombine.low %v4022_v35, %v4026_v36  ;;  %v4049_v10 = vld [vmem:[#allocation6 + $0xe60] sm:$0xff]  ;;  %v4054_v19 = vld [vmem:[#allocation6 + $0xe88] sm:$0xff] }
 0x310   :  { %6833 = vmatpush1.bf16.msra.mxu0 %v8965_v47  ;;  %7005 = vmatpush1.bf16.msra.mxu1 %v8967_v48  ;;  %v4034_v47 = vld [vmem:[#allocation6 + $0xde8] sm:$0xff]  ;;  %v9013_v48 = vcombine.low %v4021_v33, %v4025_v34  ;;  %v4053_v17 = vld [vmem:[#allocation6 + $0xe80] sm:$0xff] }
 0x311   :  { %6864 = vmatprep.mubr.bf16.mxu0 %v9848_v49  ;;  %7036 = vmatprep.mubr.bf16.mxu1 %v9848_v49  ;;  %v4057_v18 = vld [vmem:[#allocation6 + $0xea0] sm:$0xff]  ;;  %v4062_v27 = vld [vmem:[#allocation6 + $0xec8] sm:$0xff] }
 0x312   :  { %6834 = vmatprep.subr.bf16.mxu0 %v8974_v51  ;;  %7006 = vmatprep.subr.bf16.mxu1 %v8976_v52  ;;  %v9022_v51 = vcombine.high %v4029_v42, %v4033_v43  ;;  %v9024_v52 = vcombine.high %v4030_v44, %v4034_v47  ;;  %v4061_v25 = vld [vmem:[#allocation6 + $0xec0] sm:$0xff]  ;;  %v4070_v36 = vld [vmem:[#allocation6 + $0xf08] sm:$0xff] }
 0x313   :  { %v4065_v26 = vld [vmem:[#allocation6 + $0xee0] sm:$0xff] }
 0x314   :  { %6835 = vmatpush1.bf16.msra.mxu0 %v8973_v54  ;;  %7007 = vmatpush1.bf16.msra.mxu1 %v8975_v55  ;;  %v4042_v54 = vld [vmem:[#allocation6 + $0xe28] sm:$0xff]  ;;  %v9021_v55 = vcombine.low %v4029_v42, %v4033_v43  ;;  %v4069_v34 = vld [vmem:[#allocation6 + $0xf00] sm:$0xff] }
 0x315   :  { %6836 = vmatprep.subr.bf16.mxu0 %v8982_v57  ;;  %7008 = vmatprep.subr.bf16.mxu1 %v8984_v58  ;;  %v9023_v57 = vcombine.low %v4030_v44, %v4034_v47  ;;  %v9030_v58 = vcombine.high %v4037_v53, %v4041_v30  ;;  %v9032_v61 = vcombine.high %v4038_v60, %v4042_v54  ;;  %v4073_v35 = vld [vmem:[#allocation6 + $0xf20] sm:$0xff]  ;;  %v4078_v47 = vld [vmem:[#allocation6 + $0xf48] sm:$0xff] }
 0x316   :  { %v4077_v43 = vld [vmem:[#allocation6 + $0xf40] sm:$0xff] }
 0x317   :  { %v4081_v44 = vld [vmem:[#allocation6 + $0xf60] sm:$0xff] }
 0x318   :  { %6837 = vmatpush1.bf16.msra.mxu0 %v8981_v12  ;;  %7009 = vmatpush1.bf16.msra.mxu1 %v8983_v13  ;;  %v4050_v12 = vld [vmem:[#allocation6 + $0xe68] sm:$0xff]  ;;  %v9029_v13 = vcombine.low %v4037_v53, %v4041_v30  ;;  %v4085_v30 = vld [vmem:[#allocation6 + $0xf80] sm:$0xff] }
 0x319   :  { %6838 = vmatprep.subr.bf16.mxu0 %v8990_v14  ;;  %7010 = vmatprep.subr.bf16.mxu1 %v8992_v15  ;;  %v9031_v14 = vcombine.low %v4038_v60, %v4042_v54  ;;  %v9038_v15 = vcombine.high %v4045_v1, %v4049_v10  ;;  %v9040_v16 = vcombine.high %v4046_v11, %v4050_v12  ;;  %v4089_v60 = vld [vmem:[#allocation6 + $0xfa0] sm:$0xff]  ;;  %v4086_v54 = vld [vmem:[#allocation6 + $0xf88] sm:$0xff] }
 0x31c   :  { %6839 = vmatpush1.bf16.msra.mxu0 %v8989_v20  ;;  %7011 = vmatpush1.bf16.msra.mxu1 %v8991_v21  ;;  %v4058_v20 = vld [vmem:[#allocation6 + $0xea8] sm:$0xff]  ;;  %v9037_v21 = vcombine.low %v4045_v1, %v4049_v10  ;;  %v4093_v10 = vld [vmem:[#allocation6 + $0xfc0] sm:$0xff] }
 0x31d   :  { %6840 = vmatprep.subr.bf16.mxu0 %v8998_v22  ;;  %7012 = vmatprep.subr.bf16.mxu1 %v9000_v23  ;;  %v9039_v22 = vcombine.low %v4046_v11, %v4050_v12  ;;  %v9046_v23 = vcombine.high %v4053_v17, %v4057_v18  ;;  %v9048_v24 = vcombine.high %v4054_v19, %v4058_v20  ;;  %v4097_v11 = vld [vmem:[#allocation6 + $0xfe0] sm:$0xff]  ;;  %v4094_v12 = vld [vmem:[#allocation6 + $0xfc8] sm:$0xff] }
 0x320   :  { %6841 = vmatpush1.bf16.msra.mxu0 %v8997_v28  ;;  %7013 = vmatpush1.bf16.msra.mxu1 %v8999_v29  ;;  %v4066_v28 = vld [vmem:[#allocation6 + $0xee8] sm:$0xff]  ;;  %v9045_v29 = vcombine.low %v4053_v17, %v4057_v18  ;;  %v3591_v18 = vld [vmem:[#allocation6 + $0x10] sm:$0xff] }
 0x321   :  { %6842 = vmatprep.subr.bf16.mxu0 %v9006_v31  ;;  %7014 = vmatprep.subr.bf16.mxu1 %v9008_v32  ;;  %v9047_v31 = vcombine.low %v4054_v19, %v4058_v20  ;;  %v9054_v32 = vcombine.high %v4061_v25, %v4065_v26  ;;  %v9056_v33 = vcombine.high %v4062_v27, %v4066_v28  ;;  %v3595_v19 = vld [vmem:[#allocation6 + $0x30] sm:$0xff]  ;;  %v3592_v20 = vld [vmem:[#allocation6 + $0x18] sm:$0xff] }
 0x324   :  { %6843 = vmatpush1.bf16.msra.mxu0 %v9005_v37  ;;  %7015 = vmatpush1.bf16.msra.mxu1 %v9007_v38  ;;  %v4074_v37 = vld [vmem:[#allocation6 + $0xf28] sm:$0xff]  ;;  %v9053_v38 = vcombine.low %v4061_v25, %v4065_v26  ;;  %v3599_v26 = vld [vmem:[#allocation6 + $0x50] sm:$0xff] }
 0x325   :  { %6844 = vmatprep.subr.bf16.mxu0 %v9014_v39  ;;  %7016 = vmatprep.subr.bf16.mxu1 %v9016_v41  ;;  %v9055_v39 = vcombine.low %v4062_v27, %v4066_v28  ;;  %v9062_v41 = vcombine.high %v4069_v34, %v4073_v35  ;;  %v9064_v42 = vcombine.high %v4070_v36, %v4074_v37  ;;  %v3603_v27 = vld [vmem:[#allocation6 + $0x70] sm:$0xff]  ;;  %v3600_v28 = vld [vmem:[#allocation6 + $0x58] sm:$0xff] }
 0x328   :  { %6845 = vmatpush1.bf16.msra.mxu0 %v9013_v48  ;;  %7017 = vmatpush1.bf16.msra.mxu1 %v9015_v50  ;;  %v4082_v48 = vld [vmem:[#allocation6 + $0xf68] sm:$0xff]  ;;  %v9061_v50 = vcombine.low %v4069_v34, %v4073_v35  ;;  %v3607_v35 = vld [vmem:[#allocation6 + $0x90] sm:$0xff] }
 0x329   :  { %6846 = vmatprep.subr.bf16.mxu0 %v9022_v51  ;;  %7018 = vmatprep.subr.bf16.mxu1 %v9024_v52  ;;  %v9063_v51 = vcombine.low %v4070_v36, %v4074_v37  ;;  %v9070_v52 = vcombine.high %v4077_v43, %v4081_v44  ;;  %v9072_v53 = vcombine.high %v4078_v47, %v4082_v48  ;;  %v3611_v36 = vld [vmem:[#allocation6 + $0xb0] sm:$0xff]  ;;  %v3608_v37 = vld [vmem:[#allocation6 + $0x98] sm:$0xff] }
 0x32c   :  { %6847 = vmatpush1.bf16.msra.mxu0 %v9021_v55  ;;  %7019 = vmatpush1.bf16.msra.mxu1 %v9023_v57  ;;  %v4090_v55 = vld [vmem:[#allocation6 + $0xfa8] sm:$0xff]  ;;  %v9069_v57 = vcombine.low %v4077_v43, %v4081_v44  ;;  %v3615_v44 = vld [vmem:[#allocation6 + $0xd0] sm:$0xff] }
 0x32d   :  { %6848 = vmatprep.subr.bf16.mxu0 %v9030_v58  ;;  %7020 = vmatprep.subr.bf16.mxu1 %v9032_v61  ;;  %v9071_v58 = vcombine.low %v4078_v47, %v4082_v48  ;;  %v9078_v61 = vcombine.high %v4085_v30, %v4089_v60  ;;  %v9080_v1 = vcombine.high %v4086_v54, %v4090_v55  ;;  %v3619_v47 = vld [vmem:[#allocation6 + $0xf0] sm:$0xff]  ;;  %v3616_v48 = vld [vmem:[#allocation6 + $0xd8] sm:$0xff] }
 0x330   :  { %6849 = vmatpush1.bf16.msra.mxu0 %v9029_v13  ;;  %7021 = vmatpush1.bf16.msra.mxu1 %v9031_v14  ;;  %v4098_v13 = vld [vmem:[#allocation6 + $0xfe8] sm:$0xff]  ;;  %v9077_v14 = vcombine.low %v4085_v30, %v4089_v60  ;;  %v3623_v60 = vld [vmem:[#allocation6 + $0x110] sm:$0xff] }
 0x331   :  { %6850 = vmatprep.subr.bf16.mxu0 %v9038_v15  ;;  %7022 = vmatprep.subr.bf16.mxu1 %v9040_v16  ;;  %v9079_v15 = vcombine.low %v4086_v54, %v4090_v55  ;;  %v9086_v16 = vcombine.high %v4093_v10, %v4097_v11  ;;  %v9088_v17 = vcombine.high %v4094_v12, %v4098_v13  ;;  %v3627_v54 = vld [vmem:[#allocation6 + $0x130] sm:$0xff]  ;;  %v3628_v55 = vld [vmem:[#allocation6 + $0x138] sm:$0xff] }
 0x334   :  { %6851 = vmatpush1.bf16.msra.mxu0 %v9037_v21  ;;  %7023 = vmatpush1.bf16.msra.mxu1 %v9039_v22  ;;  %v3596_v21 = vld [vmem:[#allocation6 + $0x38] sm:$0xff]  ;;  %v9085_v22 = vcombine.low %v4093_v10, %v4097_v11  ;;  %v3631_v10 = vld [vmem:[#allocation6 + $0x150] sm:$0xff] }
 0x335   :  { %6852 = vmatprep.subr.bf16.mxu0 %v9046_v23  ;;  %7024 = vmatprep.subr.bf16.mxu1 %v9048_v24  ;;  %v9087_v23 = vcombine.low %v4094_v12, %v4098_v13  ;;  %v8586_v24 = vcombine.high %v3591_v18, %v3595_v19  ;;  %v8588_v25 = vcombine.high %v3592_v20, %v3596_v21  ;;  %v3635_v11 = vld [vmem:[#allocation6 + $0x170] sm:$0xff]  ;;  %v3632_v12 = vld [vmem:[#allocation6 + $0x158] sm:$0xff] }
 0x336   :  { %v3636_v13 = vld [vmem:[#allocation6 + $0x178] sm:$0xff] }
 0x338   :  { %6853 = vmatpush1.bf16.msra.mxu0 %v9045_v29  ;;  %7025 = vmatpush1.bf16.msra.mxu1 %v9047_v31  ;;  %v3604_v29 = vld [vmem:[#allocation6 + $0x78] sm:$0xff]  ;;  %v8585_v31 = vcombine.low %v3591_v18, %v3595_v19  ;;  %v3639_v18 = vld [vmem:[#allocation6 + $0x190] sm:$0xff] }
 0x339   :  { %6854 = vmatprep.subr.bf16.mxu0 %v9054_v32  ;;  %7026 = vmatprep.subr.bf16.mxu1 %v9056_v33  ;;  %v8587_v32 = vcombine.low %v3592_v20, %v3596_v21  ;;  %v8594_v33 = vcombine.high %v3599_v26, %v3603_v27  ;;  %v8596_v34 = vcombine.high %v3600_v28, %v3604_v29  ;;  %v3643_v19 = vld [vmem:[#allocation6 + $0x1b0] sm:$0xff]  ;;  %v3640_v20 = vld [vmem:[#allocation6 + $0x198] sm:$0xff] }
 0x33a   :  { %v3644_v21 = vld [vmem:[#allocation6 + $0x1b8] sm:$0xff] }
 0x33c   :  { %6855 = vmatpush1.bf16.msra.mxu0 %v9053_v38  ;;  %7027 = vmatpush1.bf16.msra.mxu1 %v9055_v39  ;;  %v3612_v38 = vld [vmem:[#allocation6 + $0xb8] sm:$0xff]  ;;  %v8593_v39 = vcombine.low %v3599_v26, %v3603_v27  ;;  %v3647_v26 = vld [vmem:[#allocation6 + $0x1d0] sm:$0xff] }
 0x33d   :  { %6856 = vmatprep.subr.bf16.mxu0 %v9062_v41  ;;  %7028 = vmatprep.subr.bf16.mxu1 %v9064_v42  ;;  %v8595_v41 = vcombine.low %v3600_v28, %v3604_v29  ;;  %v8602_v42 = vcombine.high %v3607_v35, %v3611_v36  ;;  %v8604_v43 = vcombine.high %v3608_v37, %v3612_v38  ;;  %v3651_v27 = vld [vmem:[#allocation6 + $0x1f0] sm:$0xff]  ;;  %v3648_v28 = vld [vmem:[#allocation6 + $0x1d8] sm:$0xff] }
 0x33e   :  { %v3652_v29 = vld [vmem:[#allocation6 + $0x1f8] sm:$0xff] }
 0x340   :  { %6857 = vmatpush1.bf16.msra.mxu0 %v9061_v50  ;;  %7029 = vmatpush1.bf16.msra.mxu1 %v9063_v51  ;;  %v3620_v50 = vld [vmem:[#allocation6 + $0xf8] sm:$0xff]  ;;  %v8601_v51 = vcombine.low %v3607_v35, %v3611_v36  ;;  %v3655_v35 = vld [vmem:[#allocation6 + $0x210] sm:$0xff] }
 0x341   :  { %6858 = vmatprep.subr.bf16.mxu0 %v9070_v52  ;;  %7030 = vmatprep.subr.bf16.mxu1 %v9072_v53  ;;  %v8603_v52 = vcombine.low %v3608_v37, %v3612_v38  ;;  %v8610_v53 = vcombine.high %v3615_v44, %v3619_v47  ;;  %v8612_v30 = vcombine.high %v3616_v48, %v3620_v50  ;;  %v3659_v36 = vld [vmem:[#allocation6 + $0x230] sm:$0xff]  ;;  %v3656_v37 = vld [vmem:[#allocation6 + $0x218] sm:$0xff] }
 0x342   :  { %v3660_v38 = vld [vmem:[#allocation6 + $0x238] sm:$0xff] }
 0x344   :  { %6859 = vmatpush1.bf16.msra.mxu0 %v9069_v57  ;;  %7031 = vmatpush1.bf16.msra.mxu1 %v9071_v58  ;;  %v8609_v57 = vcombine.low %v3615_v44, %v3619_v47  ;;  %v8611_v58 = vcombine.low %v3616_v48, %v3620_v50  ;;  %v3663_v44 = vld [vmem:[#allocation6 + $0x250] sm:$0xff]  ;;  %v3664_v48 = vld [vmem:[#allocation6 + $0x258] sm:$0xff] }
 0x345   :  { %6860 = vmatprep.subr.bf16.mxu0 %v9078_v61  ;;  %7032 = vmatprep.subr.bf16.mxu1 %v9080_v1  ;;  %v8618_v61 = vcombine.high %v3623_v60, %v3627_v54  ;;  %v3667_v47 = vld [vmem:[#allocation6 + $0x270] sm:$0xff]  ;;  %v3668_v50 = vld [vmem:[#allocation6 + $0x278] sm:$0xff] }
 0x348   :  { %6861 = vmatpush1.bf16.msra.mxu0 %v9077_v14  ;;  %7033 = vmatpush1.bf16.msra.mxu1 %v9079_v15  ;;  %v8617_v14 = vcombine.low %v3623_v60, %v3627_v54  ;;  %v3671_v60 = vld [vmem:[#allocation6 + $0x290] sm:$0xff] }
 0x349   :  { %6862 = vmatprep.subr.bf16.mxu0 %v9086_v16  ;;  %7034 = vmatprep.subr.bf16.mxu1 %v9088_v17  ;;  %v8626_v16 = vcombine.high %v3631_v10, %v3635_v11  ;;  %v8628_v17 = vcombine.high %v3632_v12, %v3636_v13  ;;  %v3675_v54 = vld [vmem:[#allocation6 + $0x2b0] sm:$0xff] }
 0x34c   :  { %6863 = vmatpush1.bf16.msra.mxu0 %v9085_v22  ;;  %7035 = vmatpush1.bf16.msra.mxu1 %v9087_v23  ;;  %v8625_v22 = vcombine.low %v3631_v10, %v3635_v11  ;;  %v8627_v23 = vcombine.low %v3632_v12, %v3636_v13  ;;  %v3679_v10 = vld [vmem:[#allocation6 + $0x2d0] sm:$0xff]  ;;  %v3680_v12 = vld [vmem:[#allocation6 + $0x2d8] sm:$0xff] }
 0x34d   :  { %7047 = vmatprep.subr.bf16.mxu0 %v8586_v24  ;;  %7219 = vmatprep.subr.bf16.mxu1 %v8588_v25  ;;  %v8634_v24 = vcombine.high %v3639_v18, %v3643_v19  ;;  %v8636_v25 = vcombine.high %v3640_v20, %v3644_v21  ;;  %v3683_v11 = vld [vmem:[#allocation6 + $0x2f0] sm:$0xff]  ;;  %v3684_v13 = vld [vmem:[#allocation6 + $0x2f8] sm:$0xff] }
 0x34f   :  { %6865 = vmatmul.mubr.bf16.vlgmr.msra.gmra.mrb[8].mxu0 %v9840_v45  ;;  %7037 = vmatmul.mubr.bf16.vlgmr.msra.gmra.mrb[8].mxu1 %v9840_v45 }
 0x350   :  { %7048 = vmatpush1.bf16.msra.mxu0 %v8585_v31  ;;  %7079 = vmatprep.mubr.bf16.mxu0 %v9799_v0  ;;  %v8633_v31 = vcombine.low %v3639_v18, %v3643_v19  ;;  %v3687_v18 = vld [vmem:[#allocation6 + $0x310] sm:$0xff] }
 0x351   :  { %7220 = vmatpush1.bf16.msra.mxu1 %v8587_v32  ;;  %7251 = vmatprep.mubr.bf16.mxu1 %v9799_v0  ;;  %v3624_v0 = vld [vmem:[#allocation6 + $0x118] sm:$0xff]  ;;  %v8635_v32 = vcombine.low %v3640_v20, %v3644_v21  ;;  %v3691_v19 = vld [vmem:[#allocation6 + $0x330] sm:$0xff] }
 0x352   :  { %7049 = vmatprep.subr.bf16.mxu0 %v8594_v33  ;;  %7221 = vmatprep.subr.bf16.mxu1 %v8596_v34  ;;  %v8620_v1 = vcombine.high %v3624_v0, %v3628_v55  ;;  %v8619_v15 = vcombine.low %v3624_v0, %v3628_v55  ;;  %v8642_v33 = vcombine.high %v3647_v26, %v3651_v27  ;;  %v3672_v0 = vld [vmem:[#allocation6 + $0x298] sm:$0xff] }
 0x353   :  { %v8644_v34 = vcombine.high %v3648_v28, %v3652_v29  ;;  %v3676_v55 = vld [vmem:[#allocation6 + $0x2b8] sm:$0xff] }
 0x354   :  { %7050 = vmatpush1.bf16.msra.mxu0 %v8593_v39  ;;  %v8641_v39 = vcombine.low %v3647_v26, %v3651_v27  ;;  %v3688_v20 = vld [vmem:[#allocation6 + $0x318] sm:$0xff]  ;;  %v3695_v26 = vld [vmem:[#allocation6 + $0x350] sm:$0xff] }
 0x355   :  { %7222 = vmatpush1.bf16.msra.mxu1 %v8595_v41  ;;  %7051 = vmatprep.subr.bf16.mxu0 %v8602_v42  ;;  %v8643_v41 = vcombine.low %v3648_v28, %v3652_v29  ;;  %v8650_v42 = vcombine.high %v3655_v35, %v3659_v36  ;;  %v3692_v21 = vld [vmem:[#allocation6 + $0x338] sm:$0xff]  ;;  %v3699_v27 = vld [vmem:[#allocation6 + $0x370] sm:$0xff] }
 0x356   :  { %7223 = vmatprep.subr.bf16.mxu1 %v8604_v43  ;;  %v8652_v43 = vcombine.high %v3656_v37, %v3660_v38  ;;  %v3696_v28 = vld [vmem:[#allocation6 + $0x358] sm:$0xff] }
 0x357   :  { %v3700_v29 = vld [vmem:[#allocation6 + $0x378] sm:$0xff] }
 0x358   :  { %7052 = vmatpush1.bf16.msra.mxu0 %v8601_v51  ;;  %v8649_v51 = vcombine.low %v3655_v35, %v3659_v36  ;;  %v3703_v35 = vld [vmem:[#allocation6 + $0x390] sm:$0xff] }
 0x359   :  { %7224 = vmatpush1.bf16.msra.mxu1 %v8603_v52  ;;  %7053 = vmatprep.subr.bf16.mxu0 %v8610_v53  ;;  %v8651_v52 = vcombine.low %v3656_v37, %v3660_v38  ;;  %v8658_v53 = vcombine.high %v3663_v44, %v3667_v47  ;;  %v3707_v36 = vld [vmem:[#allocation6 + $0x3b0] sm:$0xff]  ;;  %v3704_v37 = vld [vmem:[#allocation6 + $0x398] sm:$0xff] }
 0x35a   :  { %7225 = vmatprep.subr.bf16.mxu1 %v8612_v30  ;;  %v8660_v30 = vcombine.high %v3664_v48, %v3668_v50  ;;  %v3708_v38 = vld [vmem:[#allocation6 + $0x3b8] sm:$0xff] }
 0x35c   :  { %7054 = vmatpush1.bf16.msra.mxu0 %v8609_v57  ;;  %v8657_v57 = vcombine.low %v3663_v44, %v3667_v47  ;;  %v3711_v44 = vld [vmem:[#allocation6 + $0x3d0] sm:$0xff] }
 0x35d   :  { %7226 = vmatpush1.bf16.msra.mxu1 %v8611_v58  ;;  %7055 = vmatprep.subr.bf16.mxu0 %v8618_v61  ;;  %v8659_v58 = vcombine.low %v3664_v48, %v3668_v50  ;;  %v8666_v61 = vcombine.high %v3671_v60, %v3675_v54  ;;  %v3715_v47 = vld [vmem:[#allocation6 + $0x3f0] sm:$0xff]  ;;  %v3712_v48 = vld [vmem:[#allocation6 + $0x3d8] sm:$0xff] }
 0x35e   :  { %7227 = vmatprep.subr.bf16.mxu1 %v8620_v1  ;;  %v8668_v1 = vcombine.high %v3672_v0, %v3676_v55  ;;  %v3716_v50 = vld [vmem:[#allocation6 + $0x3f8] sm:$0xff] }
 0x360   :  { %7056 = vmatpush1.bf16.msra.mxu0 %v8617_v14  ;;  %v8665_v14 = vcombine.low %v3671_v60, %v3675_v54  ;;  %v3719_v60 = vld [vmem:[#allocation6 + $0x410] sm:$0xff] }
 0x361   :  { %7228 = vmatpush1.bf16.msra.mxu1 %v8619_v15  ;;  %7057 = vmatprep.subr.bf16.mxu0 %v8626_v16  ;;  %v8667_v15 = vcombine.low %v3672_v0, %v3676_v55  ;;  %v8674_v16 = vcombine.high %v3679_v10, %v3683_v11  ;;  %v3723_v54 = vld [vmem:[#allocation6 + $0x430] sm:$0xff]  ;;  %v3720_v0 = vld [vmem:[#allocation6 + $0x418] sm:$0xff] }
 0x362   :  { %7229 = vmatprep.subr.bf16.mxu1 %v8628_v17  ;;  %v8676_v17 = vcombine.high %v3680_v12, %v3684_v13  ;;  %v3724_v55 = vld [vmem:[#allocation6 + $0x438] sm:$0xff] }
 0x364   :  { %7058 = vmatpush1.bf16.msra.mxu0 %v8625_v22  ;;  %v8673_v22 = vcombine.low %v3679_v10, %v3683_v11  ;;  %v3727_v10 = vld [vmem:[#allocation6 + $0x450] sm:$0xff] }
 0x365   :  { %7230 = vmatpush1.bf16.msra.mxu1 %v8627_v23  ;;  %7059 = vmatprep.subr.bf16.mxu0 %v8634_v24  ;;  %v8675_v23 = vcombine.low %v3680_v12, %v3684_v13  ;;  %v8682_v24 = vcombine.high %v3687_v18, %v3691_v19  ;;  %v3731_v11 = vld [vmem:[#allocation6 + $0x470] sm:$0xff]  ;;  %v8713_v12 = vcombine.low %v3719_v60, %v3723_v54  ;;  %v3728_v13 = vld [vmem:[#allocation6 + $0x458] sm:$0xff] }
 0x366   :  { %7231 = vmatprep.subr.bf16.mxu1 %v8636_v25  ;;  %v8684_v25 = vcombine.high %v3688_v20, %v3692_v21 }
 0x368   :  { %7060 = vmatpush1.bf16.msra.mxu0 %v8633_v31  ;;  %v8681_v31 = vcombine.low %v3687_v18, %v3691_v19  ;;  %v3739_v18 = vld [vmem:[#allocation6 + $0x4b0] sm:$0xff] }
 0x369   :  { %7232 = vmatpush1.bf16.msra.mxu1 %v8635_v32  ;;  %7061 = vmatprep.subr.bf16.mxu0 %v8642_v33  ;;  %v8683_v32 = vcombine.low %v3688_v20, %v3692_v21  ;;  %v8690_v33 = vcombine.high %v3695_v26, %v3699_v27  ;;  %v3736_v20 = vld [vmem:[#allocation6 + $0x498] sm:$0xff] }
 0x36a   :  { %7233 = vmatprep.subr.bf16.mxu1 %v8644_v34  ;;  %v8692_v34 = vcombine.high %v3696_v28, %v3700_v29  ;;  %v3740_v21 = vld [vmem:[#allocation6 + $0x4b8] sm:$0xff] }
 0x36c   :  { %7062 = vmatpush1.bf16.msra.mxu0 %v8641_v39  ;;  %v8689_v39 = vcombine.low %v3695_v26, %v3699_v27  ;;  %v3743_v26 = vld [vmem:[#allocation6 + $0x4d0] sm:$0xff] }
 0x36d   :  { %7234 = vmatpush1.bf16.msra.mxu1 %v8643_v41  ;;  %7063 = vmatprep.subr.bf16.mxu0 %v8650_v42  ;;  %v8691_v41 = vcombine.low %v3696_v28, %v3700_v29  ;;  %v8698_v42 = vcombine.high %v3703_v35, %v3707_v36  ;;  %v3747_v27 = vld [vmem:[#allocation6 + $0x4f0] sm:$0xff]  ;;  %v3744_v28 = vld [vmem:[#allocation6 + $0x4d8] sm:$0xff] }
 0x36e   :  { %7235 = vmatprep.subr.bf16.mxu1 %v8652_v43  ;;  %v8700_v43 = vcombine.high %v3704_v37, %v3708_v38  ;;  %v3748_v29 = vld [vmem:[#allocation6 + $0x4f8] sm:$0xff] }
 0x370   :  { %7064 = vmatpush1.bf16.msra.mxu0 %v8649_v51  ;;  %v8697_v51 = vcombine.low %v3703_v35, %v3707_v36  ;;  %v3755_v35 = vld [vmem:[#allocation6 + $0x530] sm:$0xff]  ;;  %v3752_v36 = vld [vmem:[#allocation6 + $0x518] sm:$0xff] }
 0x371   :  { %7236 = vmatpush1.bf16.msra.mxu1 %v8651_v52  ;;  %7065 = vmatprep.subr.bf16.mxu0 %v8658_v53  ;;  %v8699_v52 = vcombine.low %v3704_v37, %v3708_v38  ;;  %v8706_v53 = vcombine.high %v3711_v44, %v3715_v47  ;;  %v3756_v37 = vld [vmem:[#allocation6 + $0x538] sm:$0xff]  ;;  %v8739_v38 = vcombine.low %v3744_v28, %v3748_v29 }
 0x372   :  { %7237 = vmatprep.subr.bf16.mxu1 %v8660_v30  ;;  %v8708_v30 = vcombine.high %v3712_v48, %v3716_v50 }
 0x374   :  { %7066 = vmatpush1.bf16.msra.mxu0 %v8657_v57  ;;  %v8705_v57 = vcombine.low %v3711_v44, %v3715_v47  ;;  %v3760_v44 = vld [vmem:[#allocation6 + $0x558] sm:$0xff] }
 0x375   :  { %7238 = vmatpush1.bf16.msra.mxu1 %v8659_v58  ;;  %7067 = vmatprep.subr.bf16.mxu0 %v8666_v61  ;;  %v8707_v58 = vcombine.low %v3712_v48, %v3716_v50  ;;  %v8714_v61 = vcombine.high %v3719_v60, %v3723_v54  ;;  %v3764_v47 = vld [vmem:[#allocation6 + $0x578] sm:$0xff]  ;;  %v8747_v50 = vcombine.low %v3752_v36, %v3756_v37 }
 0x376   :  { %7239 = vmatprep.subr.bf16.mxu1 %v8668_v1  ;;  %v8716_v1 = vcombine.high %v3720_v0, %v3724_v55  ;;  %v3768_v60 = vld [vmem:[#allocation6 + $0x598] sm:$0xff] }
 0x377   :  { %v3772_v54 = vld [vmem:[#allocation6 + $0x5b8] sm:$0xff] }
 0x378   :  { %7068 = vmatpush1.bf16.msra.mxu0 %v8665_v14  ;;  %v3732_v14 = vld [vmem:[#allocation6 + $0x478] sm:$0xff] }
 0x379   :  { %7240 = vmatpush1.bf16.msra.mxu1 %v8667_v15  ;;  %7069 = vmatprep.subr.bf16.mxu0 %v8674_v16  ;;  %v8715_v15 = vcombine.low %v3720_v0, %v3724_v55  ;;  %v8722_v16 = vcombine.high %v3727_v10, %v3731_v11  ;;  %v8724_v19 = vcombine.high %v3728_v13, %v3732_v14 }
 0x37a   :  { %7241 = vmatprep.subr.bf16.mxu1 %v8676_v17  ;;  %v3735_v17 = vld [vmem:[#allocation6 + $0x490] sm:$0xff]  ;;  %v8755_v55 = vcombine.low %v3760_v44, %v3764_v47 }
 0x37c   :  { %7070 = vmatpush1.bf16.msra.mxu0 %v8673_v22  ;;  %v8721_v22 = vcombine.low %v3727_v10, %v3731_v11  ;;  %v3776_v10 = vld [vmem:[#allocation6 + $0x5d8] sm:$0xff] }
 0x37d   :  { %7242 = vmatpush1.bf16.msra.mxu1 %v8675_v23  ;;  %7071 = vmatprep.subr.bf16.mxu0 %v8682_v24  ;;  %v8723_v23 = vcombine.low %v3728_v13, %v3732_v14  ;;  %v8730_v24 = vcombine.high %v3735_v17, %v3739_v18  ;;  %v3780_v11 = vld [vmem:[#allocation6 + $0x5f8] sm:$0xff]  ;;  %v8763_v13 = vcombine.low %v3768_v60, %v3772_v54 }
 0x37e   :  { %7243 = vmatprep.subr.bf16.mxu1 %v8684_v25  ;;  %v8732_v25 = vcombine.high %v3736_v20, %v3740_v21 }
 0x380   :  { %7072 = vmatpush1.bf16.msra.mxu0 %v8681_v31  ;;  %v8729_v31 = vcombine.low %v3735_v17, %v3739_v18  ;;  %v3787_v17 = vld [vmem:[#allocation6 + $0x630] sm:$0xff]  ;;  %v3784_v18 = vld [vmem:[#allocation6 + $0x618] sm:$0xff] }
 0x381   :  { %7244 = vmatpush1.bf16.msra.mxu1 %v8683_v32  ;;  %7073 = vmatprep.subr.bf16.mxu0 %v8690_v33  ;;  %v8738_v32 = vcombine.high %v3743_v26, %v3747_v27  ;;  %v8740_v33 = vcombine.high %v3744_v28, %v3748_v29 }
 0x382   :  { %7245 = vmatprep.subr.bf16.mxu1 %v8692_v34  ;;  %v3751_v34 = vld [vmem:[#allocation6 + $0x510] sm:$0xff] }
 0x383   :  { %v8745_v48 = vcombine.low %v3751_v34, %v3755_v35 }
 0x384   :  { %7074 = vmatpush1.bf16.msra.mxu0 %v8689_v39  ;;  %v8746_v39 = vcombine.high %v3751_v34, %v3755_v35  ;;  %v3800_v34 = vld [vmem:[#allocation6 + $0x698] sm:$0xff] }
 0x385   :  { %7246 = vmatpush1.bf16.msra.mxu1 %v8691_v41  ;;  %7075 = vmatprep.subr.bf16.mxu0 %v8698_v42  ;;  %v8748_v41 = vcombine.high %v3752_v36, %v3756_v37  ;;  %v3759_v42 = vld [vmem:[#allocation6 + $0x550] sm:$0xff]  ;;  %v3804_v35 = vld [vmem:[#allocation6 + $0x6b8] sm:$0xff] }
 0x386   :  { %7247 = vmatprep.subr.bf16.mxu1 %v8700_v43  ;;  %v3763_v43 = vld [vmem:[#allocation6 + $0x570] sm:$0xff] }
 0x387   :  { %v8753_v0 = vcombine.low %v3759_v42, %v3763_v43 }
 0x388   :  { %7076 = vmatpush1.bf16.msra.mxu0 %v8697_v51  ;;  %v8754_v51 = vcombine.high %v3759_v42, %v3763_v43  ;;  %v3808_v42 = vld [vmem:[#allocation6 + $0x6d8] sm:$0xff] }
 0x389   :  { %7248 = vmatpush1.bf16.msra.mxu1 %v8699_v52  ;;  %7077 = vmatprep.subr.bf16.mxu0 %v8706_v53  ;;  %v8756_v52 = vcombine.high %v3760_v44, %v3764_v47  ;;  %v3767_v53 = vld [vmem:[#allocation6 + $0x590] sm:$0xff]  ;;  %v3812_v43 = vld [vmem:[#allocation6 + $0x6f8] sm:$0xff]  ;;  %v8795_v47 = vcombine.low %v3800_v34, %v3804_v35 }
 0x38a   :  { %7249 = vmatprep.subr.bf16.mxu1 %v8708_v30  ;;  %v3771_v30 = vld [vmem:[#allocation6 + $0x5b0] sm:$0xff] }
 0x38c   :  { %7078 = vmatpush1.bf16.msra.mxu0 %v8705_v57  ;;  %v8762_v57 = vcombine.high %v3767_v53, %v3771_v30 }
 0x38d   :  { %7250 = vmatpush1.bf16.msra.mxu1 %v8707_v58  ;;  %7090 = vmatprep.subr.bf16.mxu0 %v8714_v61  ;;  %v8764_v58 = vcombine.high %v3768_v60, %v3772_v54  ;;  %v3775_v61 = vld [vmem:[#allocation6 + $0x5d0] sm:$0xff]  ;;  %v8803_v54 = vcombine.low %v3808_v42, %v3812_v43 }
 0x38e   :  { %7262 = vmatprep.subr.bf16.mxu1 %v8716_v1  ;;  %v3779_v1 = vld [vmem:[#allocation6 + $0x5f0] sm:$0xff] }
 0x38f   :  { %7080 = vmatmul.mubr.bf16.vlgmr.msra.gmra.mrb[12].mxu0 %v9795_v59  ;;  %v8770_v14 = vcombine.high %v3775_v61, %v3779_v1 }
 0x390   :  { %7252 = vmatmul.mubr.bf16.vlgmr.msra.gmra.mrb[12].mxu1 %v9795_v59  ;;  %7091 = vmatpush1.bf16.msra.mxu0 %v8713_v12  ;;  %v8731_v59 = vcombine.low %v3736_v20, %v3740_v21  ;;  %v8761_v12 = vcombine.low %v3767_v53, %v3771_v30  ;;  %v8769_v20 = vcombine.low %v3775_v61, %v3779_v1  ;;  %v3816_v53 = vld [vmem:[#allocation6 + $0x718] sm:$0xff] }
 0x391   :  { %7122 = vmatprep.mubr.bf16.mxu0 %v9801_v2  ;;  %7263 = vmatpush1.bf16.msra.mxu1 %v8715_v15  ;;  %v8772_v15 = vcombine.high %v3776_v10, %v3780_v11  ;;  %v8771_v21 = vcombine.low %v3776_v10, %v3780_v11  ;;  %v3820_v30 = vld [vmem:[#allocation6 + $0x738] sm:$0xff] }
 0x392   :  { %7294 = vmatprep.mubr.bf16.mxu1 %v9801_v2  ;;  %7092 = vmatprep.subr.bf16.mxu0 %v8722_v16  ;;  %v8737_v2 = vcombine.low %v3743_v26, %v3747_v27  ;;  %v3783_v16 = vld [vmem:[#allocation6 + $0x610] sm:$0xff]  ;;  %v3792_v26 = vld [vmem:[#allocation6 + $0x658] sm:$0xff]  ;;  %v8811_v11 = vcombine.low %v3816_v53, %v3820_v30 }
 0x393   :  { %7264 = vmatprep.subr.bf16.mxu1 %v8724_v19  ;;  %v3788_v19 = vld [vmem:[#allocation6 + $0x638] sm:$0xff]  ;;  %v8777_v28 = vcombine.low %v3783_v16, %v3787_v17 }
 0x394   :  { %7093 = vmatpush1.bf16.msra.mxu0 %v8721_v22  ;;  %v8778_v22 = vcombine.high %v3783_v16, %v3787_v17  ;;  %v3796_v27 = vld [vmem:[#allocation6 + $0x678] sm:$0xff]  ;;  %v8779_v29 = vcombine.low %v3784_v18, %v3788_v19 }
 0x395   :  { %7265 = vmatpush1.bf16.msra.mxu1 %v8723_v23  ;;  %7094 = vmatprep.subr.bf16.mxu0 %v8730_v24  ;;  %v8780_v23 = vcombine.high %v3784_v18, %v3788_v19  ;;  %v3791_v24 = vld [vmem:[#allocation6 + $0x650] sm:$0xff]  ;;  %v8787_v37 = vcombine.low %v3792_v26, %v3796_v27  ;;  %v3824_v61 = vld [vmem:[#allocation6 + $0x758] sm:$0xff] }
 0x396   :  { %7266 = vmatprep.subr.bf16.mxu1 %v8732_v25  ;;  %v3795_v25 = vld [vmem:[#allocation6 + $0x670] sm:$0xff]  ;;  %v3828_v1 = vld [vmem:[#allocation6 + $0x778] sm:$0xff] }
 0x397   :  { %v8785_v36 = vcombine.low %v3791_v24, %v3795_v25  ;;  %v3832_v16 = vld [vmem:[#allocation6 + $0x798] sm:$0xff]  ;;  %v8819_v19 = vcombine.low %v3824_v61, %v3828_v1 }
 0x398   :  { %7095 = vmatpush1.bf16.msra.mxu0 %v8729_v31  ;;  %v8786_v31 = vcombine.high %v3791_v24, %v3795_v25  ;;  %v3836_v17 = vld [vmem:[#allocation6 + $0x7b8] sm:$0xff] }
 0x399   :  { %7267 = vmatpush1.bf16.msra.mxu1 %v8731_v59  ;;  %7096 = vmatprep.subr.bf16.mxu0 %v8738_v32  ;;  %v8788_v59 = vcombine.high %v3792_v26, %v3796_v27  ;;  %v3799_v32 = vld [vmem:[#allocation6 + $0x690] sm:$0xff]  ;;  %v3840_v24 = vld [vmem:[#allocation6 + $0x7d8] sm:$0xff]  ;;  %v8827_v27 = vcombine.low %v3832_v16, %v3836_v17 }
 0x39a   :  { %7268 = vmatprep.subr.bf16.mxu1 %v8740_v33  ;;  %v3803_v33 = vld [vmem:[#allocation6 + $0x6b0] sm:$0xff]  ;;  %v3844_v25 = vld [vmem:[#allocation6 + $0x7f8] sm:$0xff] }
 0x39b   :  { %v8793_v44 = vcombine.low %v3799_v32, %v3803_v33 }
 0x39c   :  { %7097 = vmatpush1.bf16.msra.mxu0 %v8737_v2  ;;  %v8794_v2 = vcombine.high %v3799_v32, %v3803_v33  ;;  %v3848_v32 = vld [vmem:[#allocation6 + $0x818] sm:$0xff] }
 0x39d   :  { %7269 = vmatpush1.bf16.msra.mxu1 %v8739_v38  ;;  %7098 = vmatprep.subr.bf16.mxu0 %v8746_v39  ;;  %v8796_v38 = vcombine.high %v3800_v34, %v3804_v35  ;;  %v3807_v39 = vld [vmem:[#allocation6 + $0x6d0] sm:$0xff]  ;;  %v3852_v33 = vld [vmem:[#allocation6 + $0x838] sm:$0xff]  ;;  %v8835_v35 = vcombine.low %v3840_v24, %v3844_v25 }
 0x39e   :  { %7270 = vmatprep.subr.bf16.mxu1 %v8748_v41  ;;  %v3811_v41 = vld [vmem:[#allocation6 + $0x6f0] sm:$0xff] }
 0x39f   :  { %v8801_v60 = vcombine.low %v3807_v39, %v3811_v41 }
 0x3a0   :  { %7099 = vmatpush1.bf16.msra.mxu0 %v8745_v48  ;;  %v8802_v48 = vcombine.high %v3807_v39, %v3811_v41  ;;  %v3856_v41 = vld [vmem:[#allocation6 + $0x858] sm:$0xff] }
 0x3a1   :  { %7271 = vmatpush1.bf16.msra.mxu1 %v8747_v50  ;;  %7100 = vmatprep.subr.bf16.mxu0 %v8754_v51  ;;  %v8804_v50 = vcombine.high %v3808_v42, %v3812_v43  ;;  %v3815_v51 = vld [vmem:[#allocation6 + $0x710] sm:$0xff]  ;;  %v3860_v42 = vld [vmem:[#allocation6 + $0x878] sm:$0xff]  ;;  %v8843_v43 = vcombine.low %v3848_v32, %v3852_v33 }
 0x3a2   :  { %7272 = vmatprep.subr.bf16.mxu1 %v8756_v52  ;;  %v3819_v52 = vld [vmem:[#allocation6 + $0x730] sm:$0xff] }
 0x3a3   :  { %v8809_v10 = vcombine.low %v3815_v51, %v3819_v52 }
 0x3a4   :  { %7101 = vmatpush1.bf16.msra.mxu0 %v8753_v0  ;;  %v8810_v0 = vcombine.high %v3815_v51, %v3819_v52  ;;  %v3864_v51 = vld [vmem:[#allocation6 + $0x898] sm:$0xff] }
 0x3a5   :  { %7273 = vmatpush1.bf16.msra.mxu1 %v8755_v55  ;;  %7102 = vmatprep.subr.bf16.mxu0 %v8762_v57  ;;  %v8812_v55 = vcombine.high %v3816_v53, %v3820_v30  ;;  %v3823_v57 = vld [vmem:[#allocation6 + $0x750] sm:$0xff]  ;;  %v3868_v52 = vld [vmem:[#allocation6 + $0x8b8] sm:$0xff]  ;;  %v8851_v30 = vcombine.low %v3856_v41, %v3860_v42 }
 0x3a6   :  { %7274 = vmatprep.subr.bf16.mxu1 %v8764_v58  ;;  %v3827_v58 = vld [vmem:[#allocation6 + $0x770] sm:$0xff] }
 0x3a7   :  { %v8817_v18 = vcombine.low %v3823_v57, %v3827_v58 }
 0x3a8   :  { %7103 = vmatpush1.bf16.msra.mxu0 %v8761_v12  ;;  %v8818_v12 = vcombine.high %v3823_v57, %v3827_v58  ;;  %v3872_v57 = vld [vmem:[#allocation6 + $0x8d8] sm:$0xff] }
 0x3a9   :  { %7275 = vmatpush1.bf16.msra.mxu1 %v8763_v13  ;;  %7104 = vmatprep.subr.bf16.mxu0 %v8770_v14  ;;  %v8820_v13 = vcombine.high %v3824_v61, %v3828_v1  ;;  %v3831_v14 = vld [vmem:[#allocation6 + $0x790] sm:$0xff]  ;;  %v3876_v58 = vld [vmem:[#allocation6 + $0x8f8] sm:$0xff] }
 0x3aa   :  { %7276 = vmatprep.subr.bf16.mxu1 %v8772_v15  ;;  %v3835_v15 = vld [vmem:[#allocation6 + $0x7b0] sm:$0xff] }
 0x3ab   :  { %v8825_v26 = vcombine.low %v3831_v14, %v3835_v15 }
 0x3ac   :  { %7105 = vmatpush1.bf16.msra.mxu0 %v8769_v20  ;;  %v8826_v20 = vcombine.high %v3831_v14, %v3835_v15  ;;  %v3884_v14 = vld [vmem:[#allocation6 + $0x938] sm:$0xff]  ;;  %v8867_v15 = vcombine.low %v3872_v57, %v3876_v58 }
 0x3ad   :  { %7277 = vmatpush1.bf16.msra.mxu1 %v8771_v21  ;;  %7106 = vmatprep.subr.bf16.mxu0 %v8778_v22  ;;  %v8828_v21 = vcombine.high %v3832_v16, %v3836_v17  ;;  %v3839_v22 = vld [vmem:[#allocation6 + $0x7d0] sm:$0xff] }
 0x3ae   :  { %7278 = vmatprep.subr.bf16.mxu1 %v8780_v23  ;;  %v3843_v23 = vld [vmem:[#allocation6 + $0x7f0] sm:$0xff] }
 0x3af   :  { %v8833_v34 = vcombine.low %v3839_v22, %v3843_v23 }
 0x3b0   :  { %7107 = vmatpush1.bf16.msra.mxu0 %v8777_v28  ;;  %v8834_v28 = vcombine.high %v3839_v22, %v3843_v23 }
 0x3b1   :  { %7279 = vmatpush1.bf16.msra.mxu1 %v8779_v29  ;;  %7108 = vmatprep.subr.bf16.mxu0 %v8786_v31  ;;  %v8836_v29 = vcombine.high %v3840_v24, %v3844_v25  ;;  %v3847_v31 = vld [vmem:[#allocation6 + $0x810] sm:$0xff] }
 0x3b2   :  { %7280 = vmatprep.subr.bf16.mxu1 %v8788_v59  ;;  %v3851_v59 = vld [vmem:[#allocation6 + $0x830] sm:$0xff] }
 0x3b3   :  { %v8841_v39 = vcombine.low %v3847_v31, %v3851_v59 }
 0x3b4   :  { %7109 = vmatpush1.bf16.msra.mxu0 %v8785_v36  ;;  %v8842_v36 = vcombine.high %v3847_v31, %v3851_v59 }
 0x3b5   :  { %7281 = vmatpush1.bf16.msra.mxu1 %v8787_v37  ;;  %7110 = vmatprep.subr.bf16.mxu0 %v8794_v2  ;;  %v8844_v37 = vcombine.high %v3848_v32, %v3852_v33  ;;  %v3855_v2 = vld [vmem:[#allocation6 + $0x850] sm:$0xff] }
 0x3b6   :  { %7282 = vmatprep.subr.bf16.mxu1 %v8796_v38  ;;  %v3859_v38 = vld [vmem:[#allocation6 + $0x870] sm:$0xff] }
 0x3b7   :  { %v8849_v53 = vcombine.low %v3855_v2, %v3859_v38 }
 0x3b8   :  { %7111 = vmatpush1.bf16.msra.mxu0 %v8793_v44  ;;  %v8850_v44 = vcombine.high %v3855_v2, %v3859_v38 }
 0x3b9   :  { %7283 = vmatpush1.bf16.msra.mxu1 %v8795_v47  ;;  %7112 = vmatprep.subr.bf16.mxu0 %v8802_v48  ;;  %v3863_v47 = vld [vmem:[#allocation6 + $0x890] sm:$0xff] }
 0x3ba   :  { %7284 = vmatprep.subr.bf16.mxu1 %v8804_v50  ;;  %v3867_v48 = vld [vmem:[#allocation6 + $0x8b0] sm:$0xff]  ;;  %v8852_v50 = vcombine.high %v3856_v41, %v3860_v42 }
 0x3bb   :  { %v8857_v61 = vcombine.low %v3863_v47, %v3867_v48  ;;  %v3911_v42 = vld [vmem:[#allocation6 + $0xa10] sm:$0xff] }
 0x3bc   :  { %7113 = vmatpush1.bf16.msra.mxu0 %v8801_v60  ;;  %v8858_v60 = vcombine.high %v3863_v47, %v3867_v48  ;;  %v3916_v47 = vld [vmem:[#allocation6 + $0xa38] sm:$0xff] }
 0x3bd   :  { %7285 = vmatpush1.bf16.msra.mxu1 %v8803_v54  ;;  %7114 = vmatprep.subr.bf16.mxu0 %v8810_v0  ;;  %v8860_v54 = vcombine.high %v3864_v51, %v3868_v52  ;;  %v3871_v0 = vld [vmem:[#allocation6 + $0x8d0] sm:$0xff] }
 0x3be   :  { %7286 = vmatprep.subr.bf16.mxu1 %v8812_v55  ;;  %v3875_v55 = vld [vmem:[#allocation6 + $0x8f0] sm:$0xff] }
 0x3bf   :  { %v8866_v1 = vcombine.high %v3871_v0, %v3875_v55 }
 0x3c0   :  { %7115 = vmatpush1.bf16.msra.mxu0 %v8809_v10  ;;  %v8868_v10 = vcombine.high %v3872_v57, %v3876_v58 }
 0x3c1   :  { %7287 = vmatpush1.bf16.msra.mxu1 %v8811_v11  ;;  %7116 = vmatprep.subr.bf16.mxu0 %v8818_v12  ;;  %v3879_v11 = vld [vmem:[#allocation6 + $0x910] sm:$0xff] }
 0x3c2   :  { %7288 = vmatprep.subr.bf16.mxu1 %v8820_v13  ;;  %v3883_v12 = vld [vmem:[#allocation6 + $0x930] sm:$0xff]  ;;  %v3880_v13 = vld [vmem:[#allocation6 + $0x918] sm:$0xff] }
 0x3c3   :  { %v8874_v16 = vcombine.high %v3879_v11, %v3883_v12  ;;  %v8876_v17 = vcombine.high %v3880_v13, %v3884_v14  ;;  %v8873_v22 = vcombine.low %v3879_v11, %v3883_v12  ;;  %v8875_v23 = vcombine.low %v3880_v13, %v3884_v14 }
 0x3c4   :  { %7117 = vmatpush1.bf16.msra.mxu0 %v8817_v18  ;;  %v3887_v18 = vld [vmem:[#allocation6 + $0x950] sm:$0xff] }
 0x3c5   :  { %7289 = vmatpush1.bf16.msra.mxu1 %v8819_v19  ;;  %7118 = vmatprep.subr.bf16.mxu0 %v8826_v20  ;;  %v3891_v19 = vld [vmem:[#allocation6 + $0x970] sm:$0xff]  ;;  %v3888_v20 = vld [vmem:[#allocation6 + $0x958] sm:$0xff] }
 0x3c6   :  { %7290 = vmatprep.subr.bf16.mxu1 %v8828_v21  ;;  %v3892_v21 = vld [vmem:[#allocation6 + $0x978] sm:$0xff]  ;;  %v8882_v24 = vcombine.high %v3887_v18, %v3891_v19  ;;  %v8881_v31 = vcombine.low %v3887_v18, %v3891_v19 }
 0x3c7   :  { %v8884_v25 = vcombine.high %v3888_v20, %v3892_v21  ;;  %v8883_v59 = vcombine.low %v3888_v20, %v3892_v21 }
 0x3c8   :  { %7119 = vmatpush1.bf16.msra.mxu0 %v8825_v26  ;;  %v3895_v26 = vld [vmem:[#allocation6 + $0x990] sm:$0xff] }
 0x3c9   :  { %7291 = vmatpush1.bf16.msra.mxu1 %v8827_v27  ;;  %7120 = vmatprep.subr.bf16.mxu0 %v8834_v28  ;;  %v3899_v27 = vld [vmem:[#allocation6 + $0x9b0] sm:$0xff]  ;;  %v3896_v28 = vld [vmem:[#allocation6 + $0x998] sm:$0xff] }
 0x3ca   :  { %7292 = vmatprep.subr.bf16.mxu1 %v8836_v29  ;;  %v3900_v29 = vld [vmem:[#allocation6 + $0x9b8] sm:$0xff]  ;;  %v8890_v32 = vcombine.high %v3895_v26, %v3899_v27  ;;  %v8889_v2 = vcombine.low %v3895_v26, %v3899_v27 }
 0x3cb   :  { %v8892_v33 = vcombine.high %v3896_v28, %v3900_v29  ;;  %v8891_v38 = vcombine.low %v3896_v28, %v3900_v29 }
 0x3cc   :  { %7121 = vmatpush1.bf16.msra.mxu0 %v8833_v34  ;;  %v3903_v34 = vld [vmem:[#allocation6 + $0x9d0] sm:$0xff] }
 0x3cd   :  { %7293 = vmatpush1.bf16.msra.mxu1 %v8835_v35  ;;  %7133 = vmatprep.subr.bf16.mxu0 %v8842_v36  ;;  %v3907_v35 = vld [vmem:[#allocation6 + $0x9f0] sm:$0xff]  ;;  %v3904_v36 = vld [vmem:[#allocation6 + $0x9d8] sm:$0xff] }
 0x3ce   :  { %7305 = vmatprep.subr.bf16.mxu1 %v8844_v37  ;;  %v3908_v37 = vld [vmem:[#allocation6 + $0x9f8] sm:$0xff]  ;;  %v8897_v48 = vcombine.low %v3903_v34, %v3907_v35 }
 0x3cf   :  { %7123 = vmatmul.mubr.bf16.vlgmr.msra.gmra.mrb[12].mxu0 %v9797_v63  ;;  %v8900_v41 = vcombine.high %v3904_v36, %v3908_v37 }
 0x3d0   :  { %7295 = vmatmul.mubr.bf16.vlgmr.msra.gmra.mrb[12].mxu1 %v9797_v63  ;;  %7134 = vmatpush1.bf16.msra.mxu0 %v8841_v39  ;;  %v8859_v63 = vcombine.low %v3864_v51, %v3868_v52  ;;  %v8898_v39 = vcombine.high %v3903_v34, %v3907_v35 }
 0x3d1   :  { %7165 = vmatprep.mubr.bf16.mxu0 %v9842_v46  ;;  %7306 = vmatpush1.bf16.msra.mxu1 %v8843_v43  ;;  %v3915_v43 = vld [vmem:[#allocation6 + $0xa30] sm:$0xff] }
 0x3d2   :  { %7337 = vmatprep.mubr.bf16.mxu1 %v9842_v46  ;;  %7135 = vmatprep.subr.bf16.mxu0 %v8850_v44  ;;  %v8865_v46 = vcombine.low %v3871_v0, %v3875_v55  ;;  %v3912_v44 = vld [vmem:[#allocation6 + $0xa18] sm:$0xff]  ;;  %v8906_v51 = vcombine.high %v3911_v42, %v3915_v43  ;;  %v8905_v0 = vcombine.low %v3911_v42, %v3915_v43 }
 0x3d3   :  { %7307 = vmatprep.subr.bf16.mxu1 %v8852_v50  ;;  %v8899_v50 = vcombine.low %v3904_v36, %v3908_v37  ;;  %v8908_v52 = vcombine.high %v3912_v44, %v3916_v47  ;;  %v8907_v55 = vcombine.low %v3912_v44, %v3916_v47 }
 0x3d4   :  { %7136 = vmatpush1.bf16.msra.mxu0 %v8849_v53  ;;  %v3919_v53 = vld [vmem:[#allocation6 + $0xa50] sm:$0xff] }
 0x3d5   :  { %7308 = vmatpush1.bf16.msra.mxu1 %v8851_v30  ;;  %7137 = vmatprep.subr.bf16.mxu0 %v8858_v60  ;;  %v3923_v30 = vld [vmem:[#allocation6 + $0xa70] sm:$0xff]  ;;  %v3920_v60 = vld [vmem:[#allocation6 + $0xa58] sm:$0xff] }
 0x3d6   :  { %7309 = vmatprep.subr.bf16.mxu1 %v8860_v54  ;;  %v3924_v54 = vld [vmem:[#allocation6 + $0xa78] sm:$0xff]  ;;  %v8914_v57 = vcombine.high %v3919_v53, %v3923_v30  ;;  %v8913_v11 = vcombine.low %v3919_v53, %v3923_v30 }
 0x3d7   :  { %v8916_v58 = vcombine.high %v3920_v60, %v3924_v54  ;;  %v8915_v12 = vcombine.low %v3920_v60, %v3924_v54 }
 0x3d8   :  { %7138 = vmatpush1.bf16.msra.mxu0 %v8857_v61  ;;  %v3927_v61 = vld [vmem:[#allocation6 + $0xa90] sm:$0xff] }
 0x3d9   :  { %7310 = vmatpush1.bf16.msra.mxu1 %v8859_v63  ;;  %7139 = vmatprep.subr.bf16.mxu0 %v8866_v1  ;;  %v3931_v63 = vld [vmem:[#allocation6 + $0xab0] sm:$0xff]  ;;  %v3928_v1 = vld [vmem:[#allocation6 + $0xa98] sm:$0xff] }
 0x3da   :  { %7311 = vmatprep.subr.bf16.mxu1 %v8868_v10  ;;  %v3932_v10 = vld [vmem:[#allocation6 + $0xab8] sm:$0xff]  ;;  %v8922_v13 = vcombine.high %v3927_v61, %v3931_v63  ;;  %v8921_v18 = vcombine.low %v3927_v61, %v3931_v63 }
 0x3db   :  { %v8924_v14 = vcombine.high %v3928_v1, %v3932_v10  ;;  %v8923_v19 = vcombine.low %v3928_v1, %v3932_v10 }
 0x3dc   :  { %7140 = vmatpush1.bf16.msra.mxu0 %v8865_v46  ;;  %v3935_v46 = vld [vmem:[#allocation6 + $0xad0] sm:$0xff] }
 0x3dd   :  { %7312 = vmatpush1.bf16.msra.mxu1 %v8867_v15  ;;  %7141 = vmatprep.subr.bf16.mxu0 %v8874_v16  ;;  %v3939_v15 = vld [vmem:[#allocation6 + $0xaf0] sm:$0xff]  ;;  %v3936_v16 = vld [vmem:[#allocation6 + $0xad8] sm:$0xff] }
 0x3de   :  { %7313 = vmatprep.subr.bf16.mxu1 %v8876_v17  ;;  %v3940_v17 = vld [vmem:[#allocation6 + $0xaf8] sm:$0xff]  ;;  %v8930_v20 = vcombine.high %v3935_v46, %v3939_v15  ;;  %v8929_v26 = vcombine.low %v3935_v46, %v3939_v15 }
 0x3df   :  { %v8932_v21 = vcombine.high %v3936_v16, %v3940_v17  ;;  %v8931_v27 = vcombine.low %v3936_v16, %v3940_v17  ;;  %v3988_v46 = vld [vmem:[#allocation6 + $0xc78] sm:$0xff]  ;;  %v3991_v17 = vld [vmem:[#allocation6 + $0xc90] sm:$0xff] }
 0x3e0   :  { %7142 = vmatpush1.bf16.msra.mxu0 %v8873_v22  ;;  %v3943_v22 = vld [vmem:[#allocation6 + $0xb10] sm:$0xff] }
 0x3e1   :  { %7314 = vmatpush1.bf16.msra.mxu1 %v8875_v23  ;;  %7143 = vmatprep.subr.bf16.mxu0 %v8882_v24  ;;  %v3947_v23 = vld [vmem:[#allocation6 + $0xb30] sm:$0xff]  ;;  %v3944_v24 = vld [vmem:[#allocation6 + $0xb18] sm:$0xff] }
 0x3e2   :  { %7315 = vmatprep.subr.bf16.mxu1 %v8884_v25  ;;  %v3948_v25 = vld [vmem:[#allocation6 + $0xb38] sm:$0xff]  ;;  %v8938_v28 = vcombine.high %v3943_v22, %v3947_v23  ;;  %v8937_v34 = vcombine.low %v3943_v22, %v3947_v23 }
 0x3e3   :  { %v8940_v29 = vcombine.high %v3944_v24, %v3948_v25  ;;  %v8939_v35 = vcombine.low %v3944_v24, %v3948_v25 }
 0x3e4   :  { %7144 = vmatpush1.bf16.msra.mxu0 %v8881_v31  ;;  %v3951_v31 = vld [vmem:[#allocation6 + $0xb50] sm:$0xff] }
 0x3e5   :  { %7316 = vmatpush1.bf16.msra.mxu1 %v8883_v59  ;;  %7145 = vmatprep.subr.bf16.mxu0 %v8890_v32  ;;  %v3955_v59 = vld [vmem:[#allocation6 + $0xb70] sm:$0xff]  ;;  %v3952_v32 = vld [vmem:[#allocation6 + $0xb58] sm:$0xff] }
 0x3e6   :  { %7317 = vmatprep.subr.bf16.mxu1 %v8892_v33  ;;  %v3956_v33 = vld [vmem:[#allocation6 + $0xb78] sm:$0xff]  ;;  %v8946_v36 = vcombine.high %v3951_v31, %v3955_v59  ;;  %v8945_v42 = vcombine.low %v3951_v31, %v3955_v59 }
 0x3e7   :  { %v8948_v37 = vcombine.high %v3952_v32, %v3956_v33  ;;  %v8947_v43 = vcombine.low %v3952_v32, %v3956_v33  ;;  %v4007_v33 = vld [vmem:[#allocation6 + $0xd10] sm:$0xff] }
 0x3e8   :  { %7146 = vmatpush1.bf16.msra.mxu0 %v8889_v2  ;;  %v3959_v2 = vld [vmem:[#allocation6 + $0xb90] sm:$0xff] }
 0x3e9   :  { %7318 = vmatpush1.bf16.msra.mxu1 %v8891_v38  ;;  %7147 = vmatprep.subr.bf16.mxu0 %v8898_v39  ;;  %v3963_v38 = vld [vmem:[#allocation6 + $0xbb0] sm:$0xff]  ;;  %v3960_v39 = vld [vmem:[#allocation6 + $0xb98] sm:$0xff] }
 0x3ea   :  { %7319 = vmatprep.subr.bf16.mxu1 %v8900_v41  ;;  %v3964_v41 = vld [vmem:[#allocation6 + $0xbb8] sm:$0xff]  ;;  %v8954_v44 = vcombine.high %v3959_v2, %v3963_v38  ;;  %v8953_v53 = vcombine.low %v3959_v2, %v3963_v38 }
 0x3eb   :  { %v8956_v47 = vcombine.high %v3960_v39, %v3964_v41  ;;  %v8955_v30 = vcombine.low %v3960_v39, %v3964_v41  ;;  %v4015_v39 = vld [vmem:[#allocation6 + $0xd50] sm:$0xff] }
 0x3ec   :  { %7148 = vmatpush1.bf16.msra.mxu0 %v8897_v48  ;;  %v3967_v48 = vld [vmem:[#allocation6 + $0xbd0] sm:$0xff] }
 0x3ed   :  { %7320 = vmatpush1.bf16.msra.mxu1 %v8899_v50  ;;  %7149 = vmatprep.subr.bf16.mxu0 %v8906_v51  ;;  %v3971_v50 = vld [vmem:[#allocation6 + $0xbf0] sm:$0xff]  ;;  %v3968_v51 = vld [vmem:[#allocation6 + $0xbd8] sm:$0xff] }
 0x3ee   :  { %7321 = vmatprep.subr.bf16.mxu1 %v8908_v52  ;;  %v3972_v52 = vld [vmem:[#allocation6 + $0xbf8] sm:$0xff]  ;;  %v8962_v60 = vcombine.high %v3967_v48, %v3971_v50  ;;  %v8961_v61 = vcombine.low %v3967_v48, %v3971_v50  ;;  %v4019_v41 = vld [vmem:[#allocation6 + $0xd70] sm:$0xff] }
 0x3ef   :  { %v8964_v54 = vcombine.high %v3968_v51, %v3972_v52  ;;  %v8963_v63 = vcombine.low %v3968_v51, %v3972_v52  ;;  %v9010_v50 = vcombine.high %v4015_v39, %v4019_v41  ;;  %v4023_v52 = vld [vmem:[#allocation6 + $0xd90] sm:$0xff] }
 0x3f0   :  { %7150 = vmatpush1.bf16.msra.mxu0 %v8905_v0  ;;  %v3975_v0 = vld [vmem:[#allocation6 + $0xc10] sm:$0xff] }
 0x3f1   :  { %7322 = vmatpush1.bf16.msra.mxu1 %v8907_v55  ;;  %7151 = vmatprep.subr.bf16.mxu0 %v8914_v57  ;;  %v3979_v55 = vld [vmem:[#allocation6 + $0xc30] sm:$0xff]  ;;  %v3976_v57 = vld [vmem:[#allocation6 + $0xc18] sm:$0xff] }
 0x3f2   :  { %7323 = vmatprep.subr.bf16.mxu1 %v8916_v58  ;;  %v3980_v58 = vld [vmem:[#allocation6 + $0xc38] sm:$0xff]  ;;  %v8970_v1 = vcombine.high %v3975_v0, %v3979_v55 }
 0x3f3   :  { %v8972_v10 = vcombine.high %v3976_v57, %v3980_v58  ;;  %v8971_v15 = vcombine.low %v3976_v57, %v3980_v58  ;;  %v9009_v58 = vcombine.low %v4015_v39, %v4019_v41 }
 0x3f4   :  { %7152 = vmatpush1.bf16.msra.mxu0 %v8913_v11  ;;  %v3983_v11 = vld [vmem:[#allocation6 + $0xc50] sm:$0xff] }
 0x3f5   :  { %7324 = vmatpush1.bf16.msra.mxu1 %v8915_v12  ;;  %7153 = vmatprep.subr.bf16.mxu0 %v8922_v13  ;;  %v3987_v12 = vld [vmem:[#allocation6 + $0xc70] sm:$0xff]  ;;  %v8969_v13 = vcombine.low %v3975_v0, %v3979_v55  ;;  %v4028_v0 = vld [vmem:[#allocation6 + $0xdb8] sm:$0xff] }
 0x3f6   :  { %7325 = vmatprep.subr.bf16.mxu1 %v8924_v14  ;;  %v3984_v14 = vld [vmem:[#allocation6 + $0xc58] sm:$0xff]  ;;  %v8978_v16 = vcombine.high %v3983_v11, %v3987_v12  ;;  %v8977_v22 = vcombine.low %v3983_v11, %v3987_v12 }
 0x3f7   :  { %v8979_v23 = vcombine.low %v3984_v14, %v3988_v46 }
 0x3f8   :  { %7154 = vmatpush1.bf16.msra.mxu0 %v8921_v18  ;;  %v3995_v18 = vld [vmem:[#allocation6 + $0xcb0] sm:$0xff] }
 0x3f9   :  { %7326 = vmatpush1.bf16.msra.mxu1 %v8923_v19  ;;  %7155 = vmatprep.subr.bf16.mxu0 %v8930_v20  ;;  %v8980_v19 = vcombine.high %v3984_v14, %v3988_v46  ;;  %v3992_v20 = vld [vmem:[#allocation6 + $0xc98] sm:$0xff]  ;;  %v8986_v24 = vcombine.high %v3991_v17, %v3995_v18  ;;  %v8985_v31 = vcombine.low %v3991_v17, %v3995_v18 }
 0x3fa   :  { %7327 = vmatprep.subr.bf16.mxu1 %v8932_v21  ;;  %v3996_v21 = vld [vmem:[#allocation6 + $0xcb8] sm:$0xff] }
 0x3fb   :  { %v8988_v25 = vcombine.high %v3992_v20, %v3996_v21 }
 0x3fc   :  { %7156 = vmatpush1.bf16.msra.mxu0 %v8929_v26  ;;  %v3999_v26 = vld [vmem:[#allocation6 + $0xcd0] sm:$0xff] }
 0x3fd   :  { %7328 = vmatpush1.bf16.msra.mxu1 %v8931_v27  ;;  %7157 = vmatprep.subr.bf16.mxu0 %v8938_v28  ;;  %v4003_v27 = vld [vmem:[#allocation6 + $0xcf0] sm:$0xff]  ;;  %v4000_v28 = vld [vmem:[#allocation6 + $0xcd8] sm:$0xff] }
 0x3fe   :  { %7329 = vmatprep.subr.bf16.mxu1 %v8940_v29  ;;  %v4004_v29 = vld [vmem:[#allocation6 + $0xcf8] sm:$0xff]  ;;  %v8994_v59 = vcombine.high %v3999_v26, %v4003_v27 }
 0x3ff   :  { %v8996_v32 = vcombine.high %v4000_v28, %v4004_v29 }
 0x400   :  { %7158 = vmatpush1.bf16.msra.mxu0 %v8937_v34  ;;  %v4011_v34 = vld [vmem:[#allocation6 + $0xd30] sm:$0xff] }
 0x401   :  { %7330 = vmatpush1.bf16.msra.mxu1 %v8939_v35  ;;  %7159 = vmatprep.subr.bf16.mxu0 %v8946_v36  ;;  %v4008_v35 = vld [vmem:[#allocation6 + $0xd18] sm:$0xff]  ;;  %v9002_v2 = vcombine.high %v4007_v33, %v4011_v34 }
 0x402   :  { %7331 = vmatprep.subr.bf16.mxu1 %v8948_v37  ;;  %v4012_v36 = vld [vmem:[#allocation6 + $0xd38] sm:$0xff]  ;;  %v8995_v37 = vcombine.low %v4000_v28, %v4004_v29 }
 0x403   :  { %v9004_v38 = vcombine.high %v4008_v35, %v4012_v36  ;;  %v9003_v48 = vcombine.low %v4008_v35, %v4012_v36  ;;  %v4040_v36 = vld [vmem:[#allocation6 + $0xe18] sm:$0xff] }
 0x404   :  { %7160 = vmatpush1.bf16.msra.mxu0 %v8945_v42  ;;  %v4016_v42 = vld [vmem:[#allocation6 + $0xd58] sm:$0xff] }
 0x405   :  { %7332 = vmatpush1.bf16.msra.mxu1 %v8947_v43  ;;  %7161 = vmatprep.subr.bf16.mxu0 %v8954_v44  ;;  %v4020_v43 = vld [vmem:[#allocation6 + $0xd78] sm:$0xff]  ;;  %v9001_v44 = vcombine.low %v4007_v33, %v4011_v34 }
 0x406   :  { %7333 = vmatprep.subr.bf16.mxu1 %v8956_v47  ;;  %v9872_v47 = vld [vmem:[#allocation7] sm:$0xff]  ;;  %v9012_v51 = vcombine.high %v4016_v42, %v4020_v43 }
 0x407   :  { %v4110_v55 = vrot.slane %v9872_v47, %v567_v4  ;;  %v4118_v57 = vrot.slane %v9872_v47, %v575_v6 }
 0x408   :  { %7162 = vmatpush1.bf16.msra.mxu0 %v8953_v53  ;;  %v4027_v53 = vld [vmem:[#allocation6 + $0xdb0] sm:$0xff] }
 0x409   :  { %7334 = vmatpush1.bf16.msra.mxu1 %v8955_v30  ;;  %7163 = vmatprep.subr.bf16.mxu0 %v8962_v60  ;;  %v4106_v30 = vrot.slane %v9872_v47, %v563_v62  ;;  %v4114_v60 = vrot.slane %v9872_v47, %v571_v3  ;;  %v9018_v62 = vcombine.high %v4023_v52, %v4027_v53 }
 0x40a   :  { %7335 = vmatprep.subr.bf16.mxu1 %v8964_v54  ;;  %v4024_v54 = vld [vmem:[#allocation6 + $0xd98] sm:$0xff]  ;;  %v9017_v4 = vcombine.low %v4023_v52, %v4027_v53  ;;  %v4051_v52 = vld [vmem:[#allocation6 + $0xe70] sm:$0xff] }
 0x40b   :  { %v9020_v11 = vcombine.high %v4024_v54, %v4028_v0  ;;  %v4048_v53 = vld [vmem:[#allocation6 + $0xe58] sm:$0xff] }
 0x40c   :  { %7164 = vmatpush1.bf16.msra.mxu0 %v8961_v61  ;;  %v9011_v61 = vcombine.low %v4016_v42, %v4020_v43 }
 0x40d   :  { %7336 = vmatpush1.bf16.msra.mxu1 %v8963_v63  ;;  %7176 = vmatprep.subr.bf16.mxu0 %v8970_v1  ;;  %v4031_v63 = vld [vmem:[#allocation6 + $0xdd0] sm:$0xff] }
 0x40e   :  { %7348 = vmatprep.subr.bf16.mxu1 %v8972_v10  ;;  %v4035_v1 = vld [vmem:[#allocation6 + $0xdf0] sm:$0xff] }
 0x40f   :  { %7166 = vmatmul.mubr.bf16.vlgmr.msra.gmra.mrb[12].mxu0 %v9838_v40 }
 0x410   :  { %7338 = vmatmul.mubr.bf16.vlgmr.msra.gmra.mrb[12].mxu1 %v9838_v40  ;;  %7177 = vmatpush1.bf16.msra.mxu0 %v8969_v13  ;;  %v8987_v40 = vcombine.low %v3992_v20, %v3996_v21  ;;  %v9019_v20 = vcombine.low %v4024_v54, %v4028_v0  ;;  %v9025_v21 = vcombine.low %v4031_v63, %v4035_v1 }
 0x411   :  { %7208 = vmatprep.mubr.bf16.mxu0 %v9848_v49  ;;  %7349 = vmatpush1.bf16.msra.mxu1 %v8971_v15  ;;  %v4032_v15 = vld [vmem:[#allocation6 + $0xdd8] sm:$0xff] }
 0x412   :  { %7380 = vmatprep.mubr.bf16.mxu1 %v9848_v49  ;;  %7178 = vmatprep.subr.bf16.mxu0 %v8978_v16  ;;  %v8993_v49 = vcombine.low %v3999_v26, %v4003_v27  ;;  %v4036_v16 = vld [vmem:[#allocation6 + $0xdf8] sm:$0xff]  ;;  %v9026_v26 = vcombine.high %v4031_v63, %v4035_v1 }
 0x413   :  { %7350 = vmatprep.subr.bf16.mxu1 %v8980_v19  ;;  %v9027_v29 = vcombine.low %v4032_v15, %v4036_v16 }
 0x414   :  { %7179 = vmatpush1.bf16.msra.mxu0 %v8977_v22 }
 0x415   :  { %7351 = vmatpush1.bf16.msra.mxu1 %v8979_v23  ;;  %7180 = vmatprep.subr.bf16.mxu0 %v8986_v24 }
 0x416   :  { %7352 = vmatprep.subr.bf16.mxu1 %v8988_v25 }
 0x418   :  { %7181 = vmatpush1.bf16.msra.mxu0 %v8985_v31  ;;  %v9028_v31 = vcombine.high %v4032_v15, %v4036_v16 }
 0x419   :  { %7353 = vmatpush1.bf16.msra.mxu1 %v8987_v40  ;;  %7182 = vmatprep.subr.bf16.mxu0 %v8994_v59  ;;  %v4039_v40 = vld [vmem:[#allocation6 + $0xe10] sm:$0xff] }
 0x41a   :  { %7354 = vmatprep.subr.bf16.mxu1 %v8996_v32  ;;  %v4043_v59 = vld [vmem:[#allocation6 + $0xe30] sm:$0xff] }
 0x41b   :  { %v9034_v43 = vcombine.high %v4039_v40, %v4043_v59 }
 0x41c   :  { %7183 = vmatpush1.bf16.msra.mxu0 %v8993_v49  ;;  %v4044_v49 = vld [vmem:[#allocation6 + $0xe38] sm:$0xff] }
 0x41d   :  { %7355 = vmatpush1.bf16.msra.mxu1 %v8995_v37  ;;  %7184 = vmatprep.subr.bf16.mxu0 %v9002_v2  ;;  %v9035_v54 = vcombine.low %v4040_v36, %v4044_v49 }
 0x41e   :  { %7356 = vmatprep.subr.bf16.mxu1 %v9004_v38 }
 0x420   :  { %7185 = vmatpush1.bf16.msra.mxu0 %v9001_v44 }
 0x421   :  { %7357 = vmatpush1.bf16.msra.mxu1 %v9003_v48  ;;  %7186 = vmatprep.subr.bf16.mxu0 %v9010_v50  ;;  %v9036_v50 = vcombine.high %v4040_v36, %v4044_v49 }
 0x422   :  { %v6866_v10 = vpop.f32.mrb[8].mxu0  ;;  %v7038_v3 = vpop.f32.mrb[8].mxu1  ;;  %7358 = vmatprep.subr.bf16.mxu1 %v9012_v51  ;;  %v4047_v51 = vld [vmem:[#allocation6 + $0xe50] sm:$0xff] }
 0x423   :  { %v9262_v12 = vadd.f32 %v6866_v10, %v4106_v30  ;;  %v9266_v13 = vadd.f32 %v7038_v3, %v4114_v60  ;;  %v6868_v14 = vpop.f32.mrb[9].mxu0  ;;  %v7040_v46 = vpop.f32.mrb[9].mxu1  ;;  %v9042_v0 = vcombine.high %v4047_v51, %v4051_v52  ;;  %v9041_v63 = vcombine.low %v4047_v51, %v4051_v52 }
 0x424   :  { %v9263_v17 = vadd.f32 %v6868_v14, %v4110_v55  ;;  %v9267_v6 = vadd.f32 %v7040_v46, %v4118_v57  ;;  %v6870_v18 = vpop.f32.mrb[10].mxu0  ;;  %v7042_v19 = vpop.f32.mrb[10].mxu1  ;;  %7187 = vmatpush1.bf16.msra.mxu0 %v9009_v58  ;;  %v4059_v58 = vld [vmem:[#allocation6 + $0xeb0] sm:$0xff]  ;;  %v4068_v14 = vld [vmem:[#allocation6 + $0xef8] sm:$0xff] }
 0x425   :  { %v9264_v22 = vadd.f32 %v6870_v18, %v4106_v30  ;;  %v9268_v23 = vadd.f32 %v7042_v19, %v4114_v60  ;;  %7359 = vmatpush1.bf16.msra.mxu1 %v9011_v61  ;;  %v6872_v24 = vpop.f32.mrb[11].mxu0  ;;  %v7044_v25 = vpop.f32.mrb[11].mxu1  ;;  %7188 = vmatprep.subr.bf16.mxu0 %v9018_v62  ;;  %v7391_v32 = vmax.f32 %v9262_v12, 0.0  ;;  %v7393_v33 = vmax.f32 %v9266_v13, 0.0  ;;  %v4052_v30 = vld [vmem:[#allocation6 + $0xe78] sm:$0xff]  ;;  %v4067_v12 = vld [vmem:[#allocation6 + $0xef0] sm:$0xff] }
 0x426   :  { %v9265_v27 = vadd.f32 %v6872_v24, %v4110_v55  ;;  %v9269_v28 = vadd.f32 %v7044_v25, %v4118_v57  ;;  %7360 = vmatprep.subr.bf16.mxu1 %v9020_v11  ;;  %v7392_v37 = vmax.f32 %v9263_v17, 0.0  ;;  %v7394_v2 = vmax.f32 %v9267_v6, 0.0  ;;  %v4055_v57 = vld [vmem:[#allocation6 + $0xe90] sm:$0xff]  ;;  %v4056_v61 = vld [vmem:[#allocation6 + $0xe98] sm:$0xff] }
 0x427   :  { %v7399_v34 = vmax.f32 %v9264_v22, 0.0  ;;  %v7401_v35 = vmax.f32 %v9268_v23, 0.0  ;;  %v9033_v60 = vcombine.low %v4039_v40, %v4043_v59  ;;  %v9044_v55 = vcombine.high %v4048_v53, %v4052_v30  ;;  %v4060_v62 = vld [vmem:[#allocation6 + $0xeb8] sm:$0xff]  ;;  %v4063_v11 = vld [vmem:[#allocation6 + $0xed0] sm:$0xff] }
 0x428   :  { %v7400_v38 = vmax.f32 %v9265_v27, 0.0  ;;  %v7402_v39 = vmax.f32 %v9269_v28, 0.0  ;;  %7189 = vmatpush1.bf16.msra.mxu0 %v9017_v4  ;;  %v9043_v1 = vcombine.low %v4048_v53, %v4052_v30  ;;  %v9050_v10 = vcombine.high %v4055_v57, %v4059_v58  ;;  %v4064_v13 = vld [vmem:[#allocation6 + $0xed8] sm:$0xff]  ;;  %v4071_v17 = vld [vmem:[#allocation6 + $0xf10] sm:$0xff] }
 0x429   :  { %v9886_v41 = vpack.c.bf16 %v7399_v34, %v7391_v32  ;;  %v9888_v42 = vpack.c.bf16 %v7401_v35, %v7393_v33  ;;  %7361 = vmatpush1.bf16.msra.mxu1 %v9019_v20  ;;  %7190 = vmatprep.subr.bf16.mxu0 %v9026_v26  ;;  %v9052_v3 = vcombine.high %v4056_v61, %v4060_v62  ;;  %v4075_v6 = vld [vmem:[#allocation6 + $0xf30] sm:$0xff]  ;;  %v4072_v18 = vld [vmem:[#allocation6 + $0xf18] sm:$0xff] }
 0x42a   :  { %v9890_v44 = vpack.c.bf16 %v7400_v38, %v7392_v37  ;;  %v9892_v48 = vpack.c.bf16 %v7402_v39, %v7394_v2  ;;  %7362 = vmatprep.subr.bf16.mxu1 %v9028_v31  ;;  %v9049_v46 = vcombine.low %v4055_v57, %v4059_v58  ;;  %v9051_v4 = vcombine.low %v4056_v61, %v4060_v62  ;;  %v4076_v19 = vld [vmem:[#allocation6 + $0xf38] sm:$0xff]  ;;  %v4079_v24 = vld [vmem:[#allocation6 + $0xf50] sm:$0xff]  ;;  %v9398_v57 = vld [vmem:[#allocation9 + $0x80] sm:$0xff]  }
 0x42b   :  { %v9058_v15 = vcombine.high %v4063_v11, %v4067_v12  ;;  %v9060_v16 = vcombine.high %v4064_v13, %v4068_v14  ;;  %v9057_v20 = vcombine.low %v4063_v11, %v4067_v12  ;;  %v9066_v22 = vcombine.high %v4071_v17, %v4075_v6  ;;  %v4083_v25 = vld [vmem:[#allocation6 + $0xf70] sm:$0xff]  ;;  %v4080_v26 = vld [vmem:[#allocation6 + $0xf58] sm:$0xff]  ;;  %v9407_v12 = vld [vmem:[#allocation9 + $0x58] sm:$0xff]  }
 0x42c   :  { %7191 = vmatpush1.bf16.msra.mxu0 %v9025_v21  ;;  %v9059_v21 = vcombine.low %v4064_v13, %v4068_v14  ;;  %v9068_v23 = vcombine.high %v4072_v18, %v4076_v19  ;;  %v4084_v27 = vld [vmem:[#allocation6 + $0xf78] sm:$0xff]  ;;  %v9065_v28 = vcombine.low %v4071_v17, %v4075_v6  ;;  %v9074_v31 = vcombine.high %v4079_v24, %v4083_v25  ;;  %v4087_v59 = vld [vmem:[#allocation6 + $0xf90] sm:$0xff]  ;;  %v9409_v13 = vld [vmem:[#allocation9 + $0x18] sm:$0xff]  }
 0x42d   :  { %7363 = vmatpush1.bf16.msra.mxu1 %v9027_v29  ;;  %7192 = vmatprep.subr.bf16.mxu0 %v9034_v43  ;;  %v9067_v29 = vcombine.low %v4072_v18, %v4076_v19  ;;  %v9076_v40 = vcombine.high %v4080_v26, %v4084_v27  ;;  %v4091_v32 = vld [vmem:[#allocation6 + $0xfb0] sm:$0xff]  ;;  %v4088_v33 = vld [vmem:[#allocation6 + $0xf98] sm:$0xff]  ;;  %v9073_v35 = vcombine.low %v4079_v24, %v4083_v25  ;;  %v9411_v14 = vld [vmem:[#allocation9 + $0x60] sm:$0xff]  }
 0x42e   :  { %7364 = vmatprep.subr.bf16.mxu1 %v9036_v50  ;;  %v4092_v34 = vld [vmem:[#allocation6 + $0xfb8] sm:$0xff]  ;;  %v9075_v36 = vcombine.low %v4080_v26, %v4084_v27  ;;  %v9082_v49 = vcombine.high %v4087_v59, %v4091_v32  ;;  %v4095_v2 = vld [vmem:[#allocation6 + $0xfd0] sm:$0xff]  ;;  %v9081_v50 = vcombine.low %v4087_v59, %v4091_v32  ;;  %v9425_v24 = vld [vmem:[#allocation9 + $0x38] sm:$0xff]  }
 0x42f   :  { %v9084_v37 = vcombine.high %v4088_v33, %v4092_v34  ;;  %v4099_v38 = vld [vmem:[#allocation6 + $0xff0] sm:$0xff]  ;;  %v4096_v39 = vld [vmem:[#allocation6 + $0xfd8] sm:$0xff]  ;;  %v9083_v51 = vcombine.low %v4088_v33, %v4092_v34  ;;  %v9426_v25 = vld [vmem:[#allocation9 + $0xb8] sm:$0xff]  }
 0x430   :  { %7193 = vmatpush1.bf16.msra.mxu0 %v9033_v60  ;;  %v4100_v43 = vld [vmem:[#allocation6 + $0xff8] sm:$0xff]  ;;  %v9090_v52 = vcombine.high %v4095_v2, %v4099_v38  ;;  %v9089_v30 = vcombine.low %v4095_v2, %v4099_v38  ;;  %v9399_v58 = vld [vmem:[#allocation9 + $0x48] sm:$0xff]   ;;  %v9427_v26 = vld [vmem:[#allocation9 + $0x140] sm:$0xff]  }
 0x431   :  { %7365 = vmatpush1.bf16.msra.mxu1 %v9035_v54  ;;  %7194 = vmatprep.subr.bf16.mxu0 %v9042_v0  ;;  %v9092_v53 = vcombine.high %v4096_v39, %v4100_v43  ;;  %v9091_v60 = vcombine.low %v4096_v39, %v4100_v43  ;;  %v9395_v54 = vld [vmem:[#allocation9 + $0x40] sm:$0xff]   ;;  %v9400_v61 = vld [vmem:[#allocation9 + $0xc8] sm:$0xff]   ;;  %v9406_v11 = vld [vmem:[#allocation9 + $0x90] sm:$0xff]  }
 0x432   :  { %7366 = vmatprep.subr.bf16.mxu1 %v9044_v55  ;;  %v9396_v0 = vld [vmem:[#allocation9 + $0xc0] sm:$0xff]   ;;  %v9401_v62 = vld [vmem:[#allocation9 + $0x8] sm:$0xff]   ;;  %v9419_v18 = vld [vmem:[#allocation9 + $0x70] sm:$0xff]  }
 0x433   :  { %v9397_v55 = vld [vmem:[#allocation9] sm:$0xff]   ;;  %v9417_v17 = vld [vmem:[#allocation9 + $0x28] sm:$0xff]   ;;  %v9420_v19 = vld [vmem:[#allocation9 + $0xf0] sm:$0xff]  }
 0x434   :  { %7195 = vmatpush1.bf16.msra.mxu0 %v9041_v63  ;;  %v9402_v63 = vld [vmem:[#allocation9 + $0x88] sm:$0xff]   ;;  %v9428_v27 = vld [vmem:[#allocation9 + $0x1c0] sm:$0xff]   ;;  %v9435_v33 = vld [vmem:[#allocation9 + $0x150] sm:$0xff]  }
 0x435   :  { %7367 = vmatpush1.bf16.msra.mxu1 %v9043_v1  ;;  %7196 = vmatprep.subr.bf16.mxu0 %v9050_v10  ;;  %v9403_v1 = vld [vmem:[#allocation9 + $0x50] sm:$0xff]   ;;  %v9418_v6 = vld [vmem:[#allocation9 + $0xa8] sm:$0xff]   ;;  %v9443_v2 = vld [vmem:[#allocation9 + $0x160] sm:$0xff]  }
 0x436   :  { %7368 = vmatprep.subr.bf16.mxu1 %v9052_v3  ;;  %v9404_v10 = vld [vmem:[#allocation9 + $0xd0] sm:$0xff]   ;;  %v9433_v59 = vld [vmem:[#allocation9 + $0x108] sm:$0xff]   ;;  %v9444_v38 = vld [vmem:[#allocation9 + $0x1e0] sm:$0xff]  }
 0x437   :  { %v9405_v3 = vld [vmem:[#allocation9 + $0x10] sm:$0xff]   ;;  %v9434_v32 = vld [vmem:[#allocation9 + $0x188] sm:$0xff]   ;;  %v9445_v39 = vld [vmem:[#allocation9 + $0x120] sm:$0xff]  }
 0x438   :  { %7197 = vmatpush1.bf16.msra.mxu0 %v9049_v46  ;;  %v9412_v46 = vld [vmem:[#allocation9 + $0xe0] sm:$0xff]   ;;  %v9436_v34 = vld [vmem:[#allocation9 + $0x1d0] sm:$0xff]  }
 0x439   :  { %7369 = vmatpush1.bf16.msra.mxu1 %v9051_v4  ;;  %7198 = vmatprep.subr.bf16.mxu0 %v9058_v15  ;;  %v9414_v4 = vld [vmem:[#allocation9 + $0xa0] sm:$0xff]   ;;  %v9415_v15 = vld [vmem:[#allocation9 + $0x68] sm:$0xff]  }
 0x43a   :  { %7370 = vmatprep.subr.bf16.mxu1 %v9060_v16  ;;  %v9416_v16 = vld [vmem:[#allocation9 + $0xe8] sm:$0xff]   ;;  %v9446_v43 = vld [vmem:[#allocation9 + $0x1a0] sm:$0xff]  }
 0x43c   :  { %7199 = vmatpush1.bf16.msra.mxu0 %v9057_v20  ;;  %v9421_v20 = vld [vmem:[#allocation9 + $0x30] sm:$0xff]  }
 0x43d   :  { %7371 = vmatpush1.bf16.msra.mxu1 %v9059_v21  ;;  %7200 = vmatprep.subr.bf16.mxu0 %v9066_v22  ;;  %v9422_v21 = vld [vmem:[#allocation9 + $0xb0] sm:$0xff]   ;;  %v9423_v22 = vld [vmem:[#allocation9 + $0x78] sm:$0xff]  }
 0x43e   :  { %7372 = vmatprep.subr.bf16.mxu1 %v9068_v23  ;;  %v9424_v23 = vld [vmem:[#allocation9 + $0xf8] sm:$0xff]  }
 0x440   :  { %7201 = vmatpush1.bf16.msra.mxu0 %v9065_v28  ;;  %v9429_v28 = vld [vmem:[#allocation9 + $0x100] sm:$0xff]  }
 0x441   :  { %7373 = vmatpush1.bf16.msra.mxu1 %v9067_v29  ;;  %7202 = vmatprep.subr.bf16.mxu0 %v9074_v31  ;;  %v9430_v29 = vld [vmem:[#allocation9 + $0x180] sm:$0xff]   ;;  %v9431_v31 = vld [vmem:[#allocation9 + $0x148] sm:$0xff]  }
 0x442   :  { %7374 = vmatprep.subr.bf16.mxu1 %v9076_v40  ;;  %v9432_v40 = vld [vmem:[#allocation9 + $0x1c8] sm:$0xff]  }
 0x444   :  { %7203 = vmatpush1.bf16.msra.mxu0 %v9073_v35  ;;  %v9437_v35 = vld [vmem:[#allocation9 + $0x110] sm:$0xff]  }
 0x445   :  { %7375 = vmatpush1.bf16.msra.mxu1 %v9075_v36  ;;  %7204 = vmatprep.subr.bf16.mxu0 %v9082_v49  ;;  %v9438_v36 = vld [vmem:[#allocation9 + $0x190] sm:$0xff]   ;;  %v9439_v49 = vld [vmem:[#allocation9 + $0x158] sm:$0xff]  }
 0x446   :  { %7376 = vmatprep.subr.bf16.mxu1 %v9084_v37  ;;  %v9440_v37 = vld [vmem:[#allocation9 + $0x1d8] sm:$0xff]  }
 0x448   :  { %7205 = vmatpush1.bf16.msra.mxu0 %v9081_v50  ;;  %v9447_v50 = vld [vmem:[#allocation9 + $0x168] sm:$0xff]  }
 0x449   :  { %7377 = vmatpush1.bf16.msra.mxu1 %v9083_v51  ;;  %7206 = vmatprep.subr.bf16.mxu0 %v9090_v52  ;;  %v9448_v51 = vld [vmem:[#allocation9 + $0x1e8] sm:$0xff]  }
 0x44a   :  { %7378 = vmatprep.subr.bf16.mxu1 %v9092_v53  ;;  %v9449_v52 = vld [vmem:[#allocation9 + $0x128] sm:$0xff]  }
 0x44b   :  { %v9450_v53 = vld [vmem:[#allocation9 + $0x1a8] sm:$0xff]  }
 0x44c   :  { %7207 = vmatpush1.bf16.msra.mxu0 %v9089_v30  ;;  %v9451_v30 = vld [vmem:[#allocation9 + $0x170] sm:$0xff]  }
 0x44d   :  { %7379 = vmatpush1.bf16.msra.mxu1 %v9091_v60  ;;  %9158 = vmatprep.subr.bf16.mxu0 %v9395_v54  ;;  %v9452_v60 = vld [vmem:[#allocation9 + $0x1f0] sm:$0xff]  }
 0x44e   :  { %9180 = vmatprep.subr.bf16.mxu1 %v9396_v0  ;;  %v9453_v54 = vld [vmem:[#allocation9 + $0x130] sm:$0xff]  }
 0x44f   :  { %7209 = vmatmul.mubr.bf16.vlgmr.msra.gmra.mrb[12].mxu0 %v9840_v45  ;;  %v9454_v0 = vld [vmem:[#allocation9 + $0x1b0] sm:$0xff]  }
 0x450   :  { %7381 = vmatmul.mubr.bf16.vlgmr.msra.gmra.mrb[12].mxu1 %v9840_v45  ;;  %9159 = vmatpush3.bf16.msra.mxu0 %v9397_v55  ;;  %v9408_v45 = vld [vmem:[#allocation9 + $0xd8] sm:$0xff]  }
 0x451   :  { %7966 = vmatprep.mubr.bf16.mxu0 %v9890_v44  ;;  %9181 = vmatpush3.bf16.msra.mxu1 %v9398_v57  ;;  %v9410_v44 = vld [vmem:[#allocation9 + $0x98] sm:$0xff]  }
 0x452   :  { %8007 = vmatprep.mubr.bf16.mxu1 %v9892_v48  ;;  %9160 = vmatprep.subr.bf16.mxu0 %v9399_v58  ;;  %v9413_v48 = vld [vmem:[#allocation9 + $0x20] sm:$0xff]   ;;  %v9455_v55 = vld [vmem:[#allocation9 + $0x178] sm:$0xff]  }
 0x453   :  { %9182 = vmatprep.subr.bf16.mxu1 %v9400_v61  ;;  %v9456_v57 = vld [vmem:[#allocation9 + $0x1f8] sm:$0xff]  }
 0x454   :  { %9161 = vmatpush3.bf16.msra.mxu0 %v9401_v62  ;;  %v9457_v58 = vld [vmem:[#allocation9 + $0x138] sm:$0xff]   ;;  %v4122_v62 = vrot.slane %v9872_v47, %v579_v5 }
 0x455   :  { %9183 = vmatpush3.bf16.msra.mxu1 %v9402_v63  ;;  %9162 = vmatprep.subr.bf16.mxu0 %v9403_v1  ;;  %v9458_v61 = vld [vmem:[#allocation9 + $0x1b8] sm:$0xff]   ;;  %v4130_v63 = vrot.slane %v9872_v47, %v587_v7  ;;  %v4126_v1 = vrot.slane %v9872_v47, %v583_v8 }
 0x456   :  { %9184 = vmatprep.subr.bf16.mxu1 %v9404_v10  ;;  %v4134_v10 = vrot.slane %v9872_v47, %v591_v9 }
 0x458   :  { %9163 = vmatpush3.bf16.msra.mxu0 %v9405_v3 }
 0x459   :  { %9185 = vmatpush3.bf16.msra.mxu1 %v9406_v11  ;;  %9164 = vmatprep.subr.bf16.mxu0 %v9407_v12 }
 0x45a   :  { %9186 = vmatprep.subr.bf16.mxu1 %v9408_v45 }
 0x45c   :  { %9165 = vmatpush3.bf16.msra.mxu0 %v9409_v13 }
 0x45d   :  { %9187 = vmatpush3.bf16.msra.mxu1 %v9410_v44  ;;  %9166 = vmatprep.subr.bf16.mxu0 %v9411_v14 }
 0x45e   :  { %9188 = vmatprep.subr.bf16.mxu1 %v9412_v46 }
 0x460   :  { %9167 = vmatpush3.bf16.msra.mxu0 %v9413_v48 }
 0x461   :  { %9189 = vmatpush3.bf16.msra.mxu1 %v9414_v4  ;;  %9168 = vmatprep.subr.bf16.mxu0 %v9415_v15 }
 0x462   :  { %9190 = vmatprep.subr.bf16.mxu1 %v9416_v16 }
 0x464   :  { %9169 = vmatpush3.bf16.msra.mxu0 %v9417_v17 }
 0x465   :  { %9191 = vmatpush3.bf16.msra.mxu1 %v9418_v6  ;;  %9170 = vmatprep.subr.bf16.mxu0 %v9419_v18 }
 0x466   :  { %9192 = vmatprep.subr.bf16.mxu1 %v9420_v19 }
 0x468   :  { %9171 = vmatpush3.bf16.msra.mxu0 %v9421_v20 }
 0x469   :  { %9193 = vmatpush3.bf16.msra.mxu1 %v9422_v21  ;;  %9172 = vmatprep.subr.bf16.mxu0 %v9423_v22 }
 0x46a   :  { %9194 = vmatprep.subr.bf16.mxu1 %v9424_v23 }
 0x46c   :  { %9173 = vmatpush3.bf16.msra.mxu0 %v9425_v24 }
 0x46d   :  { %9195 = vmatpush3.bf16.msra.mxu1 %v9426_v25  ;;  %9202 = vmatprep.subr.bf16.mxu0 %v9427_v26 }
 0x46e   :  { %9224 = vmatprep.subr.bf16.mxu1 %v9428_v27 }
 0x46f   :  { %7967 = vmatmul.mubr.bf16.vlgmr.msra.gmra.mrb[16].mxu0 %v9886_v41  ;;  %v9441_v41 = vld [vmem:[#allocation9 + $0x118] sm:$0xff]  }
 0x470   :  { %8008 = vmatmul.mubr.bf16.vlgmr.msra.gmra.mrb[16].mxu1 %v9888_v42  ;;  %9203 = vmatpush3.bf16.msra.mxu0 %v9429_v28  ;;  %v9442_v42 = vld [vmem:[#allocation9 + $0x198] sm:$0xff]   ;;  %v9093_v28 = vld [vmem:[#allocation10] ss:$0 sm:$0xff] }
 0x471   :  { %9225 = vmatpush3.bf16.msra.mxu1 %v9430_v29  ;;  %9204 = vmatprep.subr.bf16.mxu0 %v9431_v31 }
 0x472   :  { %9226 = vmatprep.subr.bf16.mxu1 %v9432_v40 }
 0x474   :  { %9205 = vmatpush3.bf16.msra.mxu0 %v9433_v59 }
 0x475   :  { %9227 = vmatpush3.bf16.msra.mxu1 %v9434_v32  ;;  %9206 = vmatprep.subr.bf16.mxu0 %v9435_v33 }
 0x476   :  { %9228 = vmatprep.subr.bf16.mxu1 %v9436_v34 }
 0x478   :  { %9207 = vmatpush3.bf16.msra.mxu0 %v9437_v35 }
 0x479   :  { %9229 = vmatpush3.bf16.msra.mxu1 %v9438_v36  ;;  %9208 = vmatprep.subr.bf16.mxu0 %v9439_v49 }
 0x47a   :  { %9230 = vmatprep.subr.bf16.mxu1 %v9440_v37 }
 0x47c   :  { %9209 = vmatpush3.bf16.msra.mxu0 %v9441_v41 }
 0x47d   :  { %9231 = vmatpush3.bf16.msra.mxu1 %v9442_v42  ;;  %9210 = vmatprep.subr.bf16.mxu0 %v9443_v2 }
 0x47e   :  { %9232 = vmatprep.subr.bf16.mxu1 %v9444_v38 }
 0x480   :  { %9211 = vmatpush3.bf16.msra.mxu0 %v9445_v39 }
 0x481   :  { %9233 = vmatpush3.bf16.msra.mxu1 %v9446_v43  ;;  %9212 = vmatprep.subr.bf16.mxu0 %v9447_v50 }
 0x482   :  { %9234 = vmatprep.subr.bf16.mxu1 %v9448_v51 }
 0x484   :  { %9213 = vmatpush3.bf16.msra.mxu0 %v9449_v52 }
 0x485   :  { %9235 = vmatpush3.bf16.msra.mxu1 %v9450_v53  ;;  %9214 = vmatprep.subr.bf16.mxu0 %v9451_v30 }
 0x486   :  { %9236 = vmatprep.subr.bf16.mxu1 %v9452_v60 }
 0x488   :  { %9215 = vmatpush3.bf16.msra.mxu0 %v9453_v54 }
 0x489   :  { %9237 = vmatpush3.bf16.msra.mxu1 %v9454_v0  ;;  %9216 = vmatprep.subr.bf16.mxu0 %v9455_v55 }
 0x48a   :  { %9238 = vmatprep.subr.bf16.mxu1 %v9456_v57 }
 0x48c   :  { %9217 = vmatpush3.bf16.msra.mxu0 %v9457_v58 }
 0x48d   :  { %9239 = vmatpush3.bf16.msra.mxu1 %v9458_v61 }
 0x522   :  { %v7210_v3 = vpop.f32.mrb[12].mxu0 }
 0x523   :  { %v9270_v11 = vadd.f32 %v7210_v3, %v4122_v62  ;;  %v7382_v12 = vpop.f32.mrb[12].mxu1  ;;  %v7212_v45 = vpop.f32.mrb[13].mxu0 }
 0x524   :  { %v9274_v13 = vadd.f32 %v7382_v12, %v4130_v63  ;;  %v9271_v44 = vadd.f32 %v7212_v45, %v4126_v1  ;;  %v7384_v14 = vpop.f32.mrb[13].mxu1  ;;  %v7214_v5 = vpop.f32.mrb[14].mxu0 }
 0x525   :  { %v9275_v46 = vadd.f32 %v7384_v14, %v4134_v10  ;;  %v9272_v48 = vadd.f32 %v7214_v5, %v4122_v62  ;;  %v7386_v4 = vpop.f32.mrb[14].mxu1  ;;  %v7216_v7 = vpop.f32.mrb[15].mxu0  ;;  %v7395_v8 = vmax.f32 %v9270_v11, 0.0 }
 0x526   :  { %v9276_v15 = vadd.f32 %v7386_v4, %v4130_v63  ;;  %v9273_v16 = vadd.f32 %v7216_v7, %v4126_v1  ;;  %v7388_v17 = vpop.f32.mrb[15].mxu1  ;;  %v7397_v18 = vmax.f32 %v9274_v13, 0.0  ;;  %v7396_v9 = vmax.f32 %v9271_v44, 0.0 }
 0x527   :  { %v7403_v6 = vmax.f32 %v9272_v48, 0.0  ;;  %v9277_v56 = vadd.f32 %v7388_v17, %v4134_v10  ;;  %v7398_v20 = vmax.f32 %v9275_v46, 0.0 }
 0x528   :  { %v7405_v47 = vmax.f32 %v9276_v15, 0.0  ;;  %v7404_v19 = vmax.f32 %v9273_v16, 0.0 }
 0x529   :  { %v7411_v21 = vpack.c.bf16 %v7403_v6, %v7395_v8  ;;  %v7406_v22 = vmax.f32 %v9277_v56, 0.0 }
 0x52a   :  { %v7413_v23 = vpack.c.bf16 %v7405_v47, %v7397_v18  ;;  %v7412_v24 = vpack.c.bf16 %v7404_v19, %v7396_v9 }
 0x52b   :  { %v7414_v25 = vpack.c.bf16 %v7406_v22, %v7398_v20 }
 0x52c   :  { %8048 = vmatprep.mubr.bf16.mxu0 %v7412_v24 }
 0x52d   :  { %8089 = vmatprep.mubr.bf16.mxu1 %v7414_v25  ;;  %8049 = vmatmul.mubr.bf16.vlgmr.msra.gmra.mrb[20].mxu0 %v7411_v21 }
 0x52e   :  { %8090 = vmatmul.mubr.bf16.vlgmr.msra.gmra.mrb[20].mxu1 %v7413_v23 }
 0x542   :  { %v9174_v26 = vpop.f32.mrb[16].mxu0 }
 0x543   :  { %v9196_v27 = vpop.f32.mrb[16].mxu1  ;;  %v9175_v29 = vpop.f32.mrb[17].mxu0 }
 0x544   :  { %v9176_v31 = vadd.f32 %v9175_v29, %v9174_v26  ;;  %v9197_v40 = vpop.f32.mrb[17].mxu1  ;;  %v9177_v59 = vpop.f32.mrb[18].mxu0 }
 0x545   :  { %v9198_v32 = vadd.f32 %v9197_v40, %v9196_v27  ;;  %v9199_v33 = vpop.f32.mrb[18].mxu1  ;;  %v9178_v34 = vpop.f32.mrb[19].mxu0 }
 0x546   :  { %v7969_v35 = vadd.f32 %v9176_v31, %v9093_v28  ;;  %v9179_v36 = vadd.f32 %v9178_v34, %v9177_v59  ;;  %v9200_v49 = vpop.f32.mrb[19].mxu1 }
 0x547   :  { %v9201_v37 = vadd.f32 %v9200_v49, %v9199_v33 }
 0x548   :  { %v8010_v41 = vadd.f32 %v9198_v32, %v7969_v35  ;;  %v7972_v42 = vadd.f32 %v9179_v36, %v9093_v28 }
 0x54a   :  { %v8013_v2 = vadd.f32 %v9201_v37, %v7972_v42 }
 0x600   :  { %v9218_v38 = vpop.f32.mrb[20].mxu0 }
 0x601   :  { %v9240_v39 = vpop.f32.mrb[20].mxu1  ;;  %v9219_v43 = vpop.f32.mrb[21].mxu0 }
 0x602   :  { %v9220_v50 = vadd.f32 %v9219_v43, %v9218_v38  ;;  %v9241_v51 = vpop.f32.mrb[21].mxu1  ;;  %v9221_v52 = vpop.f32.mrb[22].mxu0 }
 0x603   :  { %v9242_v53 = vadd.f32 %v9241_v51, %v9240_v39  ;;  %v9243_v30 = vpop.f32.mrb[22].mxu1  ;;  %v9222_v60 = vpop.f32.mrb[23].mxu0 }
 0x604   :  { %v8051_v54 = vadd.f32 %v9220_v50, %v8010_v41  ;;  %v9223_v0 = vadd.f32 %v9222_v60, %v9221_v52  ;;  %v9244_v55 = vpop.f32.mrb[23].mxu1 }
 0x605   :  { %v9245_v57 = vadd.f32 %v9244_v55, %v9243_v30 }
 0x606   :  { %v8054_v58 = vadd.f32 %v9223_v0, %v8013_v2  ;;  %v8092_v61 = vadd.f32 %v9242_v53, %v8051_v54 }
 0x608   :  { %8098 = vmax.xlane.f32.xlu0 %v8092_v61  ;;  %v8095_v62 = vadd.f32 %v9245_v57, %v8054_v58 }
 0x60c   :  { %8100 = vmax.xlane.f32.xlu0 %v8095_v62 }
 0x695   :  { %v8099_v63 = vpop.xlane.xlu0 %8098 }
 0x696   :  { %v8102_v1 = vsub.f32 %v8092_v61, %v8099_v63 }
 0x698   :  { %v8104_v10 = vmul.f32 1.442695, %v8102_v1 }
 0x699   :  { %v8101_v3 = vpop.xlane.xlu0 %8100 }
 0x69a   :  { %9459 = vpow2.f32 %v8104_v10  ;;  %v8103_v11 = vsub.f32 %v8095_v62, %v8101_v3 }
 0x69c   :  { %v8106_v12 = vmul.f32 1.442695, %v8103_v11 }
 0x69e   :  { %9461 = vpow2.f32 %v8106_v12 }
 0x6a4   :  { %v9460_v45 = vpop.eup %9459 }
 0x6a5   :  { %8108 = vadd.xlane.f32.xlu1 %v9460_v45 }
 0x6a8   :  { %v9462_v13 = vpop.eup %9461 }
 0x6a9   :  { %8110 = vadd.xlane.f32.xlu1 %v9462_v13 }
 0x732   :  { %v8109_v44 = vpop.xlane.xlu1 %8108 }
 0x733   :  { %9463 = vrcp.f32 %v8109_v44 }
 0x736   :  { %v8111_v14 = vpop.xlane.xlu1 %8110 }
 0x737   :  { %9465 = vrcp.f32 %v8111_v14 }
 0x73d   :  { %v9464_v5 = vpop.eup %9463 }
 0x73e   :  { %v8114_v46 = vmul.f32 %v9464_v5, %v9460_v45 }
 0x740   :  { %8116 = vst [vmem:[%s9925_s7] sm:$0xff] %v8114_v46 }
 0x741   :  { %v9466_v48 = vpop.eup %9465 }
 0x742   :  { %v8115_v4 = vmul.f32 %v9466_v48, %v9462_v13 }
 0x744   :  { %8117 = vst [vmem:[%s9925_s7 + $0x8] sm:$0xff] %v8115_v4 }
 0x745   :  { %8122 = vsyncpa [#allocation3], 1 }
 0x746   :  { %8123 = vsyncpa [#allocation5], 1 }
 0x747   :  { %8124 = vsyncpa [#allocation8], 1 }
 0x748   :  { %8125 = vsyncpa [#allocation11], 1 }

</bundles_post_ra>
